<compile_context>
chip_gen: v7x
topology: tpu7x:2x2x1
jax: 0.10.0
libtpu: 0.0.40
codegen_flags: <defaults>
</compile_context>

<pallas_src>
import jax
import jax.numpy as jnp
from jax import lax
from jax.experimental import pallas as pl
from jax.experimental.pallas import tpu as pltpu


def _sigmoid(z):
    # logistic via tanh: one EUP op, no long-latency f32 divide on the
    # recurrent critical path (exact identity: sigmoid(z) = 0.5*(1+tanh(z/2))).
    return 0.5 * jnp.tanh(0.5 * z) + 0.5


# ----------------------------- Pallas kernel --------------------------------

def _make_bilstm_kernel(T, B, H):
    """Build the fused bi-LSTM kernel for a (B batch-rows, T steps) block.

    Row layout inside a block is (t, b): rows [t*B, t*B+B) hold time step t for
    all B batch elements, so every step touches one sublane-aligned slab.

    Gate column order (each block is [fwd | bwd], H columns each):
        [i_f i_b | f_f f_b | o_f o_b | g_f g_b]
    """
    H2, H8 = 2 * H, 8 * H
    S3 = 3 * H2   # sigmoid gates occupy the first 3*2H columns

    def kernel(x_ref, wx_ref, b_ref, wh_ref, out_ref, g_scr):
        # x_ref:   (T*B, 2F)  row t*B+b = [x_t(b) | x_{T-1-t}(b)]
        # wx_ref:  (2F, 8H)   packed input weights
        # b_ref:   (1, 8H)    packed bias (b_ih + b_hh per direction/gate)
        # wh_ref:  (2H, 8H)   packed recurrent weights (fwd rows 0:H, bwd rows H:2H)
        # out_ref: (T*B, 2H)  row t*B+b = [h_fwd(t,b) | h_bwd(step t, b)]
        # g_scr:   (T*B, 8H)  f32 scratch: input-projected pre-gate activations

        # ---- 1) input projection, all steps & both directions: one matmul ----
        x = x_ref[...].astype(jnp.float32)
        wx = wx_ref[...].astype(jnp.float32)
        g_scr[...] = (jnp.dot(x, wx, preferred_element_type=jnp.float32)
                      + b_ref[...].astype(jnp.float32))

        # ---- 2) fused fwd+bwd recurrence, batch folded into the sublanes ----
        wh = wh_ref[...].astype(jnp.float32)          # hoisted out of the loop

        def one_step(t, h, c):
            row = pl.multiple_of(t * B, B)            # aligned (B, .) slab
            pre = g_scr[pl.ds(row, B), :] + jnp.dot(
                h, wh, preferred_element_type=jnp.float32)
            sig = _sigmoid(pre[:, :S3])               # [i | f | o] in one launch
            g = jnp.tanh(pre[:, S3:])                 # [g]
            i = sig[:, 0:H2]
            f = sig[:, H2:2 * H2]
            o = sig[:, 2 * H2:S3]
            c_new = f * c + i * g
            h_new = o * jnp.tanh(c_new)
            out_ref[pl.ds(row, B), :] = h_new         # one aligned (B, 2H) store
            return h_new, c_new

        unroll = 1
        for cand in (8, 4, 2):
            if T % cand == 0:
                unroll = cand
                break

        def block_step(bi, carry):
            h, c = carry
            base = bi * unroll
            for u in range(unroll):   # manual unroll -> bigger basic block
                h, c = one_step(base + u, h, c)
            return h, c

        h0 = jnp.zeros((B, H2), jnp.float32)
        c0 = jnp.zeros((B, H2), jnp.float32)
        # TODO(synk): the time recurrence is inherently sequential (LSTM), so a
        # serial loop over T is unavoidable.
        lax.fori_loop(0, T // unroll, block_step, (h0, c0))

    return kernel


# ----------------------------- pallas_call wrapper ---------------------------

def bilstm_pallas(xcat, wx, b, wh, hidden_size, batch_block=8):
    """xcat: (N, T, 2F) with row t = [x_t | x_{T-1-t}].

    Returns (N, T, 2H): columns [:H] = forward hidden at time t,
    columns [H:] = backward hidden at *kernel step* t (true time T-1-t).
    """
    N, T, F2 = xcat.shape
    H = hidden_size
    H2, H8 = 2 * H, 8 * H
    B = batch_block
    n_blocks = -(-N // B)
    N_pad = n_blocks * B
    if N_pad != N:
        xcat = jnp.pad(xcat, ((0, N_pad - N), (0, 0), (0, 0)))

    # Row order inside a block: (t, b) -> every step reads/writes an aligned slab.
    x2 = (xcat.reshape(n_blocks, B, T, F2)
              .transpose(0, 2, 1, 3)
              .reshape(n_blocks * T * B, F2))

    kernel = _make_bilstm_kernel(T, B, H)
    out2 = pl.pallas_call(
        kernel,
        out_shape=jax.ShapeDtypeStruct((n_blocks * T * B, H2), jnp.float32),
        grid=(n_blocks,),
        in_specs=[
            pl.BlockSpec((T * B, F2), lambda n: (n, 0)),
            pl.BlockSpec((F2, H8), lambda n: (0, 0)),
            pl.BlockSpec((1, H8), lambda n: (0, 0)),
            pl.BlockSpec((H2, H8), lambda n: (0, 0)),
        ],
        out_specs=pl.BlockSpec((T * B, H2), lambda n: (n, 0)),
        scratch_shapes=[pltpu.VMEM((T * B, H8), jnp.float32)],
        compiler_params=pltpu.CompilerParams(dimension_semantics=("parallel",)),
    )(x2, wx, b, wh)

    out = (out2.reshape(n_blocks, T, B, H2)
               .transpose(0, 2, 1, 3)
               .reshape(N_pad, T, H2))[:N]
    return out


# ----------------------------- forward pass ----------------------------------

def context_module_forward(packed, hidden_size, x_nchw, batch_block=8):
    N, C, Hsp, Wsp = x_nchw.shape
    T = Hsp * Wsp
    H = hidden_size
    x_seq = jnp.transpose(x_nchw, (0, 2, 3, 1)).reshape(N, T, C).astype(jnp.float32)
    # row t carries both directions' inputs: [x_t | x_{T-1-t}] (tiny XLA prep)
    xcat = jnp.concatenate([x_seq, x_seq[:, ::-1, :]], axis=-1)          # (N, T, 2C)
    out = bilstm_pallas(xcat, packed["wx"], packed["b"], packed["wh"], H, batch_block)
    # split directions + time-align the backward direction in the XLA wrapper
    fwd = out[..., :H]                  # forward hidden at time t
    bwd = out[:, ::-1, H:]              # backward hidden, re-aligned to time t
    full = jnp.concatenate([fwd, bwd], axis=-1)                          # (N, T, 2H)
    return full.reshape(N, Hsp, Wsp, 2 * H).transpose(0, 3, 1, 2)


# ----------------------------- parameters (deterministic, PyTorch-style) -----

def init_lstm_params(key, input_size, hidden_size):
    H, Fi = hidden_size, input_size
    k = 1.0 / float(H) ** 0.5
    ks = jax.random.split(key, 8)
    u = lambda kk, shape: jax.random.uniform(kk, shape, jnp.float32, -k, k)
    return {
        "w_ih_f": u(ks[0], (4 * H, Fi)), "w_hh_f": u(ks[1], (4 * H, H)),
        "b_ih_f": u(ks[2], (4 * H,)),    "b_hh_f": u(ks[3], (4 * H,)),
        "w_ih_b": u(ks[4], (4 * H, Fi)), "w_hh_b": u(ks[5], (4 * H, H)),
        "b_ih_b": u(ks[6], (4 * H,)),    "b_hh_b": u(ks[7], (4 * H,)),
    }


def pack_lstm_params(raw, input_size, hidden_size):
    """Pack both directions into one set of kernel matrices.

    Kernel gate-block order: [i, f, o, g]  (sigmoid gates contiguous), each
    block is [fwd | bwd] (H columns each) -> columns [i_f,i_b,f_f,f_b,o_f,o_b,g_f,g_b].
    PyTorch row-block order inside w_ih / w_hh is i, f, g, o.
    """
    Fi, H = input_size, hidden_size
    gate_order = (0, 1, 3, 2)            # pytorch gate index for kernel blocks i,f,o,g
    wx = jnp.zeros((2 * Fi, 8 * H), jnp.float32)
    wh = jnp.zeros((2 * H, 8 * H), jnp.float32)
    bc = jnp.zeros((8 * H,), jnp.float32)
    b_f = raw["b_ih_f"] + raw["b_hh_f"]
    b_b = raw["b_ih_b"] + raw["b_hh_b"]
    for blk, g in enumerate(gate_order):
        src = slice(g * H, (g + 1) * H)
        col_f = slice((2 * blk) * H, (2 * blk + 1) * H)
        col_b = slice((2 * blk + 1) * H, (2 * blk + 2) * H)
        wx = wx.at[0:Fi, col_f].set(raw["w_ih_f"][src].T)
        wx = wx.at[Fi:2 * Fi, col_b].set(raw["w_ih_b"][src].T)
        wh = wh.at[0:H, col_f].set(raw["w_hh_f"][src].T)
        wh = wh.at[H:2 * H, col_b].set(raw["w_hh_b"][src].T)
        bc = bc.at[col_f].set(b_f[src])
        bc = bc.at[col_b].set(b_b[src])
    return {"wx": wx, "wh": wh, "b": bc[None, :]}


# ----------------------------- pure-JAX reference (correctness check) --------

def _lstm_dir_ref(x_seq, w_ih, w_hh, b_ih, b_hh):
    H = w_hh.shape[1]
    wx, wh = w_ih.T, w_hh.T
    b = (b_ih + b_hh)[None, :]

    def step(carry, x_t):
        h, c = carry
        z = (jnp.dot(x_t, wx, precision=lax.Precision.HIGHEST)
             + jnp.dot(h, wh, precision=lax.Precision.HIGHEST) + b)
        i = jax.nn.sigmoid(z[:, 0:H])
        f = jax.nn.sigmoid(z[:, H:2 * H])
        g = jnp.tanh(z[:, 2 * H:3 * H])
        o = jax.nn.sigmoid(z[:, 3 * H:4 * H])
        c = f * c + i * g
        h = o * jnp.tanh(c)
        return (h, c), h

    bs = x_seq.shape[0]
    init = (jnp.zeros((bs, H), jnp.float32), jnp.zeros((bs, H), jnp.float32))
    _, hs = lax.scan(step, init, jnp.swapaxes(x_seq, 0, 1))
    return jnp.swapaxes(hs, 0, 1)


def context_module_ref(raw, hidden_size, x_nchw):
    N, C, Hsp, Wsp = x_nchw.shape
    T = Hsp * Wsp
    x_seq = jnp.transpose(x_nchw, (0, 2, 3, 1)).reshape(N, T, C).astype(jnp.float32)
    of = _lstm_dir_ref(x_seq, raw["w_ih_f"], raw["w_hh_f"], raw["b_ih_f"], raw["b_hh_f"])
    ob = _lstm_dir_ref(x_seq[:, ::-1], raw["w_ih_b"], raw["w_hh_b"],
                       raw["b_ih_b"], raw["b_hh_b"])[:, ::-1]
    out = jnp.concatenate([of, ob], axis=-1)
    return out.reshape(N, Hsp, Wsp, 2 * hidden_size).transpose(0, 3, 1, 2)


# ----------------------------- main -------------------------------------------

if __name__ == "__main__":
    key = jax.random.PRNGKey(0)
    k_p, k_x = jax.random.split(key)

    input_size, hidden_size = 16, 32
    N, Hsp, Wsp = 2, 16, 16                    # T = 256 sequence positions

    raw = init_lstm_params(k_p, input_size, hidden_size)
    packed = pack_lstm_params(raw, input_size, hidden_size)
    x = jax.random.normal(k_x, (N, input_size, Hsp, Wsp), jnp.float32)

    fwd_fn = jax.jit(lambda inp: context_module_forward(packed, hidden_size, inp))
    out = jax.block_until_ready(fwd_fn(x))

    assert out.shape == (N, 2 * hidden_size, Hsp, Wsp), out.shape
    assert bool(jnp.all(jnp.isfinite(out)))

    ref = jax.jit(lambda inp: context_module_ref(raw, hidden_size, inp))(x)
    err = float(jnp.max(jnp.abs(out - ref)))
    assert err < 5e-3, f"max abs err vs reference = {err}"

    print("KERNEL_OK")
</pallas_src>

<mosaic_0001>
module attributes {stable_mosaic.version = 11 : i64} {
  func.func @kernel(%arg0: i32, %arg1: memref<2048x32xf32, #tpu.memory_space<vmem>>, %arg2: memref<32x256xf32, #tpu.memory_space<vmem>>, %arg3: memref<1x256xf32, #tpu.memory_space<vmem>>, %arg4: memref<64x256xf32, #tpu.memory_space<vmem>>, %arg5: memref<2048x64xf32, #tpu.memory_space<vmem>>, %arg6: memref<2048x256xf32, #tpu.memory_space<vmem>>) attributes {dimension_semantics = [#tpu.dimension_semantics<parallel>], iteration_bounds = array<i64: 1>, scalar_prefetch = 0 : i64, scratch_operands = 1 : i64, tpu.core_type = #tpu.core_type<tc>, window_params = [{transform_indices = @transform_0, window_bounds = array<i64: 2048, 32>}, {pipeline_mode = #tpu.pipeline_mode<synchronous>, transform_indices = @transform_1, window_bounds = array<i64: 32, 256>}, {pipeline_mode = #tpu.pipeline_mode<synchronous>, transform_indices = @transform_2, window_bounds = array<i64: 1, 256>}, {pipeline_mode = #tpu.pipeline_mode<synchronous>, transform_indices = @transform_3, window_bounds = array<i64: 64, 256>}, {transform_indices = @transform_4, window_bounds = array<i64: 2048, 64>}]} {
    %c0 = arith.constant 0 : index
    %c0_0 = arith.constant 0 : index
    %0 = vector.load %arg1[%c0, %c0_0] : memref<2048x32xf32, #tpu.memory_space<vmem>>, vector<2048x32xf32>
    %c0_1 = arith.constant 0 : index
    %c0_2 = arith.constant 0 : index
    %1 = vector.load %arg2[%c0_1, %c0_2] : memref<32x256xf32, #tpu.memory_space<vmem>>, vector<32x256xf32>
    %cst = arith.constant dense<0.000000e+00> : vector<2048x256xf32>
    %2 = tpu.matmul %0, %1, %cst {dimension_numbers = #tpu.dot_dimension_numbers<[1], [0], [0], [1], [0, 0, 1, 1], [], []>} : vector<2048x32xf32>, vector<32x256xf32>, vector<2048x256xf32> -> vector<2048x256xf32>
    %c0_3 = arith.constant 0 : index
    %c0_4 = arith.constant 0 : index
    %3 = vector.load %arg3[%c0_3, %c0_4] : memref<1x256xf32, #tpu.memory_space<vmem>>, vector<1x256xf32>
    %4 = vector.broadcast %3 : vector<1x256xf32> to vector<2048x256xf32>
    %5 = arith.addf %2, %4 : vector<2048x256xf32>
    %c0_5 = arith.constant 0 : index
    %c0_6 = arith.constant 0 : index
    %6 = vector.load %arg6[%c0_5, %c0_6] : memref<2048x256xf32, #tpu.memory_space<vmem>>, vector<2048x256xf32>
    tpu.vector_store %arg6[%c0_5, %c0_6], %5 {strides = array<i32>} : memref<2048x256xf32, #tpu.memory_space<vmem>>, vector<2048x256xf32>,
    %c0_7 = arith.constant 0 : index
    %c0_8 = arith.constant 0 : index
    %7 = vector.load %arg4[%c0_7, %c0_8] : memref<64x256xf32, #tpu.memory_space<vmem>>, vector<64x256xf32>
    %cst_9 = arith.constant 0.000000e+00 : f32
    %8 = vector.broadcast %cst_9 : f32 to vector<8x64xf32>
    %cst_10 = arith.constant 0.000000e+00 : f32
    %9 = vector.broadcast %cst_10 : f32 to vector<8x64xf32>
    %c0_i32 = arith.constant 0 : i32
    %c32_i32 = arith.constant 32 : i32
    %10 = arith.addi %c0_i32, %c32_i32 : i32
    %c1_i32 = arith.constant 1 : i32
    %11:2 = scf.for %arg7 = %c0_i32 to %10 step %c1_i32 iter_args(%arg8 = %8, %arg9 = %9) -> (vector<8x64xf32>, vector<8x64xf32>)  : i32 {
      %c8_i32 = arith.constant 8 : i32
      %12 = arith.muli %arg7, %c8_i32 : i32
      %c0_i32_12 = arith.constant 0 : i32
      %13 = arith.addi %12, %c0_i32_12 : i32
      %c8_i32_13 = arith.constant 8 : i32
      %14 = arith.muli %13, %c8_i32_13 : i32
      %15 = tpu.assume_multiple %14, 8 : i32
      %16 = arith.index_cast %15 : i32 to index
      %c0_14 = arith.constant 0 : index
      %17 = vector.load %arg6[%16, %c0_14] : memref<2048x256xf32, #tpu.memory_space<vmem>>, vector<8x256xf32>
      %cst_15 = arith.constant dense<0.000000e+00> : vector<8x256xf32>
      %18 = tpu.matmul %arg8, %7, %cst_15 {dimension_numbers = #tpu.dot_dimension_numbers<[1], [0], [0], [1], [0, 0, 1, 1], [], []>} : vector<8x64xf32>, vector<64x256xf32>, vector<8x256xf32> -> vector<8x256xf32>
      %19 = arith.addf %17, %18 : vector<8x256xf32>
      %20 = vector.extract_strided_slice %19 {offsets = [0, 0], sizes = [8, 192], strides = [1, 1]} : vector<8x256xf32> to vector<8x192xf32>
      %cst_16 = arith.constant 5.000000e-01 : f32
      %21 = vector.broadcast %cst_16 : f32 to vector<8x192xf32>
      %22 = arith.mulf %21, %20 : vector<8x192xf32>
      %23 = math.tanh %22 : vector<8x192xf32>
      %cst_17 = arith.constant 5.000000e-01 : f32
      %24 = vector.broadcast %cst_17 : f32 to vector<8x192xf32>
      %25 = arith.mulf %24, %23 : vector<8x192xf32>
      %cst_18 = arith.constant 5.000000e-01 : f32
      %26 = vector.broadcast %cst_18 : f32 to vector<8x192xf32>
      %27 = arith.addf %25, %26 : vector<8x192xf32>
      %28 = vector.extract_strided_slice %19 {offsets = [0, 192], sizes = [8, 64], strides = [1, 1]} : vector<8x256xf32> to vector<8x64xf32>
      %29 = math.tanh %28 : vector<8x64xf32>
      %30 = vector.extract_strided_slice %27 {offsets = [0, 0], sizes = [8, 64], strides = [1, 1]} : vector<8x192xf32> to vector<8x64xf32>
      %31 = vector.extract_strided_slice %27 {offsets = [0, 64], sizes = [8, 64], strides = [1, 1]} : vector<8x192xf32> to vector<8x64xf32>
      %32 = vector.extract_strided_slice %27 {offsets = [0, 128], sizes = [8, 64], strides = [1, 1]} : vector<8x192xf32> to vector<8x64xf32>
      %33 = arith.mulf %31, %arg9 : vector<8x64xf32>
      %34 = arith.mulf %30, %29 : vector<8x64xf32>
      %35 = arith.addf %33, %34 : vector<8x64xf32>
      %36 = math.tanh %35 : vector<8x64xf32>
      %37 = arith.mulf %32, %36 : vector<8x64xf32>
      %38 = arith.index_cast %15 : i32 to index
      %c0_19 = arith.constant 0 : index
      %39 = vector.load %arg5[%38, %c0_19] : memref<2048x64xf32, #tpu.memory_space<vmem>>, vector<8x64xf32>
      tpu.vector_store %arg5[%38, %c0_19], %37 {strides = array<i32>} : memref<2048x64xf32, #tpu.memory_space<vmem>>, vector<8x64xf32>,
      %c1_i32_20 = arith.constant 1 : i32
      %40 = arith.addi %12, %c1_i32_20 : i32
      %c8_i32_21 = arith.constant 8 : i32
      %41 = arith.muli %40, %c8_i32_21 : i32
      %42 = tpu.assume_multiple %41, 8 : i32
      %43 = arith.index_cast %42 : i32 to index
      %c0_22 = arith.constant 0 : index
      %44 = vector.load %arg6[%43, %c0_22] : memref<2048x256xf32, #tpu.memory_space<vmem>>, vector<8x256xf32>
      %cst_23 = arith.constant dense<0.000000e+00> : vector<8x256xf32>
      %45 = tpu.matmul %37, %7, %cst_23 {dimension_numbers = #tpu.dot_dimension_numbers<[1], [0], [0], [1], [0, 0, 1, 1], [], []>} : vector<8x64xf32>, vector<64x256xf32>, vector<8x256xf32> -> vector<8x256xf32>
      %46 = arith.addf %44, %45 : vector<8x256xf32>
      %47 = vector.extract_strided_slice %46 {offsets = [0, 0], sizes = [8, 192], strides = [1, 1]} : vector<8x256xf32> to vector<8x192xf32>
      %cst_24 = arith.constant 5.000000e-01 : f32
      %48 = vector.broadcast %cst_24 : f32 to vector<8x192xf32>
      %49 = arith.mulf %48, %47 : vector<8x192xf32>
      %50 = math.tanh %49 : vector<8x192xf32>
      %cst_25 = arith.constant 5.000000e-01 : f32
      %51 = vector.broadcast %cst_25 : f32 to vector<8x192xf32>
      %52 = arith.mulf %51, %50 : vector<8x192xf32>
      %cst_26 = arith.constant 5.000000e-01 : f32
      %53 = vector.broadcast %cst_26 : f32 to vector<8x192xf32>
      %54 = arith.addf %52, %53 : vector<8x192xf32>
      %55 = vector.extract_strided_slice %46 {offsets = [0, 192], sizes = [8, 64], strides = [1, 1]} : vector<8x256xf32> to vector<8x64xf32>
      %56 = math.tanh %55 : vector<8x64xf32>
      %57 = vector.extract_strided_slice %54 {offsets = [0, 0], sizes = [8, 64], strides = [1, 1]} : vector<8x192xf32> to vector<8x64xf32>
      %58 = vector.extract_strided_slice %54 {offsets = [0, 64], sizes = [8, 64], strides = [1, 1]} : vector<8x192xf32> to vector<8x64xf32>
      %59 = vector.extract_strided_slice %54 {offsets = [0, 128], sizes = [8, 64], strides = [1, 1]} : vector<8x192xf32> to vector<8x64xf32>
      %60 = arith.mulf %58, %35 : vector<8x64xf32>
      %61 = arith.mulf %57, %56 : vector<8x64xf32>
      %62 = arith.addf %60, %61 : vector<8x64xf32>
      %63 = math.tanh %62 : vector<8x64xf32>
      %64 = arith.mulf %59, %63 : vector<8x64xf32>
      %65 = arith.index_cast %42 : i32 to index
      %c0_27 = arith.constant 0 : index
      %66 = vector.load %arg5[%65, %c0_27] : memref<2048x64xf32, #tpu.memory_space<vmem>>, vector<8x64xf32>
      tpu.vector_store %arg5[%65, %c0_27], %64 {strides = array<i32>} : memref<2048x64xf32, #tpu.memory_space<vmem>>, vector<8x64xf32>,
      %c2_i32 = arith.constant 2 : i32
      %67 = arith.addi %12, %c2_i32 : i32
      %c8_i32_28 = arith.constant 8 : i32
      %68 = arith.muli %67, %c8_i32_28 : i32
      %69 = tpu.assume_multiple %68, 8 : i32
      %70 = arith.index_cast %69 : i32 to index
      %c0_29 = arith.constant 0 : index
      %71 = vector.load %arg6[%70, %c0_29] : memref<2048x256xf32, #tpu.memory_space<vmem>>, vector<8x256xf32>
      %cst_30 = arith.constant dense<0.000000e+00> : vector<8x256xf32>
      %72 = tpu.matmul %64, %7, %cst_30 {dimension_numbers = #tpu.dot_dimension_numbers<[1], [0], [0], [1], [0, 0, 1, 1], [], []>} : vector<8x64xf32>, vector<64x256xf32>, vector<8x256xf32> -> vector<8x256xf32>
      %73 = arith.addf %71, %72 : vector<8x256xf32>
      %74 = vector.extract_strided_slice %73 {offsets = [0, 0], sizes = [8, 192], strides = [1, 1]} : vector<8x256xf32> to vector<8x192xf32>
      %cst_31 = arith.constant 5.000000e-01 : f32
      %75 = vector.broadcast %cst_31 : f32 to vector<8x192xf32>
      %76 = arith.mulf %75, %74 : vector<8x192xf32>
      %77 = math.tanh %76 : vector<8x192xf32>
      %cst_32 = arith.constant 5.000000e-01 : f32
      %78 = vector.broadcast %cst_32 : f32 to vector<8x192xf32>
      %79 = arith.mulf %78, %77 : vector<8x192xf32>
      %cst_33 = arith.constant 5.000000e-01 : f32
      %80 = vector.broadcast %cst_33 : f32 to vector<8x192xf32>
      %81 = arith.addf %79, %80 : vector<8x192xf32>
      %82 = vector.extract_strided_slice %73 {offsets = [0, 192], sizes = [8, 64], strides = [1, 1]} : vector<8x256xf32> to vector<8x64xf32>
      %83 = math.tanh %82 : vector<8x64xf32>
      %84 = vector.extract_strided_slice %81 {offsets = [0, 0], sizes = [8, 64], strides = [1, 1]} : vector<8x192xf32> to vector<8x64xf32>
      %85 = vector.extract_strided_slice %81 {offsets = [0, 64], sizes = [8, 64], strides = [1, 1]} : vector<8x192xf32> to vector<8x64xf32>
      %86 = vector.extract_strided_slice %81 {offsets = [0, 128], sizes = [8, 64], strides = [1, 1]} : vector<8x192xf32> to vector<8x64xf32>
      %87 = arith.mulf %85, %62 : vector<8x64xf32>
      %88 = arith.mulf %84, %83 : vector<8x64xf32>
      %89 = arith.addf %87, %88 : vector<8x64xf32>
      %90 = math.tanh %89 : vector<8x64xf32>
      %91 = arith.mulf %86, %90 : vector<8x64xf32>
      %92 = arith.index_cast %69 : i32 to index
      %c0_34 = arith.constant 0 : index
      %93 = vector.load %arg5[%92, %c0_34] : memref<2048x64xf32, #tpu.memory_space<vmem>>, vector<8x64xf32>
      tpu.vector_store %arg5[%92, %c0_34], %91 {strides = array<i32>} : memref<2048x64xf32, #tpu.memory_space<vmem>>, vector<8x64xf32>,
      %c3_i32 = arith.constant 3 : i32
      %94 = arith.addi %12, %c3_i32 : i32
      %c8_i32_35 = arith.constant 8 : i32
      %95 = arith.muli %94, %c8_i32_35 : i32
      %96 = tpu.assume_multiple %95, 8 : i32
      %97 = arith.index_cast %96 : i32 to index
      %c0_36 = arith.constant 0 : index
      %98 = vector.load %arg6[%97, %c0_36] : memref<2048x256xf32, #tpu.memory_space<vmem>>, vector<8x256xf32>
      %cst_37 = arith.constant dense<0.000000e+00> : vector<8x256xf32>
      %99 = tpu.matmul %91, %7, %cst_37 {dimension_numbers = #tpu.dot_dimension_numbers<[1], [0], [0], [1], [0, 0, 1, 1], [], []>} : vector<8x64xf32>, vector<64x256xf32>, vector<8x256xf32> -> vector<8x256xf32>
      %100 = arith.addf %98, %99 : vector<8x256xf32>
      %101 = vector.extract_strided_slice %100 {offsets = [0, 0], sizes = [8, 192], strides = [1, 1]} : vector<8x256xf32> to vector<8x192xf32>
      %cst_38 = arith.constant 5.000000e-01 : f32
      %102 = vector.broadcast %cst_38 : f32 to vector<8x192xf32>
      %103 = arith.mulf %102, %101 : vector<8x192xf32>
      %104 = math.tanh %103 : vector<8x192xf32>
      %cst_39 = arith.constant 5.000000e-01 : f32
      %105 = vector.broadcast %cst_39 : f32 to vector<8x192xf32>
      %106 = arith.mulf %105, %104 : vector<8x192xf32>
      %cst_40 = arith.constant 5.000000e-01 : f32
      %107 = vector.broadcast %cst_40 : f32 to vector<8x192xf32>
      %108 = arith.addf %106, %107 : vector<8x192xf32>
      %109 = vector.extract_strided_slice %100 {offsets = [0, 192], sizes = [8, 64], strides = [1, 1]} : vector<8x256xf32> to vector<8x64xf32>
      %110 = math.tanh %109 : vector<8x64xf32>
      %111 = vector.extract_strided_slice %108 {offsets = [0, 0], sizes = [8, 64], strides = [1, 1]} : vector<8x192xf32> to vector<8x64xf32>
      %112 = vector.extract_strided_slice %108 {offsets = [0, 64], sizes = [8, 64], strides = [1, 1]} : vector<8x192xf32> to vector<8x64xf32>
      %113 = vector.extract_strided_slice %108 {offsets = [0, 128], sizes = [8, 64], strides = [1, 1]} : vector<8x192xf32> to vector<8x64xf32>
      %114 = arith.mulf %112, %89 : vector<8x64xf32>
      %115 = arith.mulf %111, %110 : vector<8x64xf32>
      %116 = arith.addf %114, %115 : vector<8x64xf32>
      %117 = math.tanh %116 : vector<8x64xf32>
      %118 = arith.mulf %113, %117 : vector<8x64xf32>
      %119 = arith.index_cast %96 : i32 to index
      %c0_41 = arith.constant 0 : index
      %120 = vector.load %arg5[%119, %c0_41] : memref<2048x64xf32, #tpu.memory_space<vmem>>, vector<8x64xf32>
      tpu.vector_store %arg5[%119, %c0_41], %118 {strides = array<i32>} : memref<2048x64xf32, #tpu.memory_space<vmem>>, vector<8x64xf32>,
      %c4_i32 = arith.constant 4 : i32
      %121 = arith.addi %12, %c4_i32 : i32
      %c8_i32_42 = arith.constant 8 : i32
      %122 = arith.muli %121, %c8_i32_42 : i32
      %123 = tpu.assume_multiple %122, 8 : i32
      %124 = arith.index_cast %123 : i32 to index
      %c0_43 = arith.constant 0 : index
      %125 = vector.load %arg6[%124, %c0_43] : memref<2048x256xf32, #tpu.memory_space<vmem>>, vector<8x256xf32>
      %cst_44 = arith.constant dense<0.000000e+00> : vector<8x256xf32>
      %126 = tpu.matmul %118, %7, %cst_44 {dimension_numbers = #tpu.dot_dimension_numbers<[1], [0], [0], [1], [0, 0, 1, 1], [], []>} : vector<8x64xf32>, vector<64x256xf32>, vector<8x256xf32> -> vector<8x256xf32>
      %127 = arith.addf %125, %126 : vector<8x256xf32>
      %128 = vector.extract_strided_slice %127 {offsets = [0, 0], sizes = [8, 192], strides = [1, 1]} : vector<8x256xf32> to vector<8x192xf32>
      %cst_45 = arith.constant 5.000000e-01 : f32
      %129 = vector.broadcast %cst_45 : f32 to vector<8x192xf32>
      %130 = arith.mulf %129, %128 : vector<8x192xf32>
      %131 = math.tanh %130 : vector<8x192xf32>
      %cst_46 = arith.constant 5.000000e-01 : f32
      %132 = vector.broadcast %cst_46 : f32 to vector<8x192xf32>
      %133 = arith.mulf %132, %131 : vector<8x192xf32>
      %cst_47 = arith.constant 5.000000e-01 : f32
      %134 = vector.broadcast %cst_47 : f32 to vector<8x192xf32>
      %135 = arith.addf %133, %134 : vector<8x192xf32>
      %136 = vector.extract_strided_slice %127 {offsets = [0, 192], sizes = [8, 64], strides = [1, 1]} : vector<8x256xf32> to vector<8x64xf32>
      %137 = math.tanh %136 : vector<8x64xf32>
      %138 = vector.extract_strided_slice %135 {offsets = [0, 0], sizes = [8, 64], strides = [1, 1]} : vector<8x192xf32> to vector<8x64xf32>
      %139 = vector.extract_strided_slice %135 {offsets = [0, 64], sizes = [8, 64], strides = [1, 1]} : vector<8x192xf32> to vector<8x64xf32>
      %140 = vector.extract_strided_slice %135 {offsets = [0, 128], sizes = [8, 64], strides = [1, 1]} : vector<8x192xf32> to vector<8x64xf32>
      %141 = arith.mulf %139, %116 : vector<8x64xf32>
      %142 = arith.mulf %138, %137 : vector<8x64xf32>
      %143 = arith.addf %141, %142 : vector<8x64xf32>
      %144 = math.tanh %143 : vector<8x64xf32>
      %145 = arith.mulf %140, %144 : vector<8x64xf32>
      %146 = arith.index_cast %123 : i32 to index
      %c0_48 = arith.constant 0 : index
      %147 = vector.load %arg5[%146, %c0_48] : memref<2048x64xf32, #tpu.memory_space<vmem>>, vector<8x64xf32>
      tpu.vector_store %arg5[%146, %c0_48], %145 {strides = array<i32>} : memref<2048x64xf32, #tpu.memory_space<vmem>>, vector<8x64xf32>,
      %c5_i32 = arith.constant 5 : i32
      %148 = arith.addi %12, %c5_i32 : i32
      %c8_i32_49 = arith.constant 8 : i32
      %149 = arith.muli %148, %c8_i32_49 : i32
      %150 = tpu.assume_multiple %149, 8 : i32
      %151 = arith.index_cast %150 : i32 to index
      %c0_50 = arith.constant 0 : index
      %152 = vector.load %arg6[%151, %c0_50] : memref<2048x256xf32, #tpu.memory_space<vmem>>, vector<8x256xf32>
      %cst_51 = arith.constant dense<0.000000e+00> : vector<8x256xf32>
      %153 = tpu.matmul %145, %7, %cst_51 {dimension_numbers = #tpu.dot_dimension_numbers<[1], [0], [0], [1], [0, 0, 1, 1], [], []>} : vector<8x64xf32>, vector<64x256xf32>, vector<8x256xf32> -> vector<8x256xf32>
      %154 = arith.addf %152, %153 : vector<8x256xf32>
      %155 = vector.extract_strided_slice %154 {offsets = [0, 0], sizes = [8, 192], strides = [1, 1]} : vector<8x256xf32> to vector<8x192xf32>
      %cst_52 = arith.constant 5.000000e-01 : f32
      %156 = vector.broadcast %cst_52 : f32 to vector<8x192xf32>
      %157 = arith.mulf %156, %155 : vector<8x192xf32>
      %158 = math.tanh %157 : vector<8x192xf32>
      %cst_53 = arith.constant 5.000000e-01 : f32
      %159 = vector.broadcast %cst_53 : f32 to vector<8x192xf32>
      %160 = arith.mulf %159, %158 : vector<8x192xf32>
      %cst_54 = arith.constant 5.000000e-01 : f32
      %161 = vector.broadcast %cst_54 : f32 to vector<8x192xf32>
      %162 = arith.addf %160, %161 : vector<8x192xf32>
      %163 = vector.extract_strided_slice %154 {offsets = [0, 192], sizes = [8, 64], strides = [1, 1]} : vector<8x256xf32> to vector<8x64xf32>
      %164 = math.tanh %163 : vector<8x64xf32>
      %165 = vector.extract_strided_slice %162 {offsets = [0, 0], sizes = [8, 64], strides = [1, 1]} : vector<8x192xf32> to vector<8x64xf32>
      %166 = vector.extract_strided_slice %162 {offsets = [0, 64], sizes = [8, 64], strides = [1, 1]} : vector<8x192xf32> to vector<8x64xf32>
      %167 = vector.extract_strided_slice %162 {offsets = [0, 128], sizes = [8, 64], strides = [1, 1]} : vector<8x192xf32> to vector<8x64xf32>
      %168 = arith.mulf %166, %143 : vector<8x64xf32>
      %169 = arith.mulf %165, %164 : vector<8x64xf32>
      %170 = arith.addf %168, %169 : vector<8x64xf32>
      %171 = math.tanh %170 : vector<8x64xf32>
      %172 = arith.mulf %167, %171 : vector<8x64xf32>
      %173 = arith.index_cast %150 : i32 to index
      %c0_55 = arith.constant 0 : index
      %174 = vector.load %arg5[%173, %c0_55] : memref<2048x64xf32, #tpu.memory_space<vmem>>, vector<8x64xf32>
      tpu.vector_store %arg5[%173, %c0_55], %172 {strides = array<i32>} : memref<2048x64xf32, #tpu.memory_space<vmem>>, vector<8x64xf32>,
      %c6_i32 = arith.constant 6 : i32
      %175 = arith.addi %12, %c6_i32 : i32
      %c8_i32_56 = arith.constant 8 : i32
      %176 = arith.muli %175, %c8_i32_56 : i32
      %177 = tpu.assume_multiple %176, 8 : i32
      %178 = arith.index_cast %177 : i32 to index
      %c0_57 = arith.constant 0 : index
      %179 = vector.load %arg6[%178, %c0_57] : memref<2048x256xf32, #tpu.memory_space<vmem>>, vector<8x256xf32>
      %cst_58 = arith.constant dense<0.000000e+00> : vector<8x256xf32>
      %180 = tpu.matmul %172, %7, %cst_58 {dimension_numbers = #tpu.dot_dimension_numbers<[1], [0], [0], [1], [0, 0, 1, 1], [], []>} : vector<8x64xf32>, vector<64x256xf32>, vector<8x256xf32> -> vector<8x256xf32>
      %181 = arith.addf %179, %180 : vector<8x256xf32>
      %182 = vector.extract_strided_slice %181 {offsets = [0, 0], sizes = [8, 192], strides = [1, 1]} : vector<8x256xf32> to vector<8x192xf32>
      %cst_59 = arith.constant 5.000000e-01 : f32
      %183 = vector.broadcast %cst_59 : f32 to vector<8x192xf32>
      %184 = arith.mulf %183, %182 : vector<8x192xf32>
      %185 = math.tanh %184 : vector<8x192xf32>
      %cst_60 = arith.constant 5.000000e-01 : f32
      %186 = vector.broadcast %cst_60 : f32 to vector<8x192xf32>
      %187 = arith.mulf %186, %185 : vector<8x192xf32>
      %cst_61 = arith.constant 5.000000e-01 : f32
      %188 = vector.broadcast %cst_61 : f32 to vector<8x192xf32>
      %189 = arith.addf %187, %188 : vector<8x192xf32>
      %190 = vector.extract_strided_slice %181 {offsets = [0, 192], sizes = [8, 64], strides = [1, 1]} : vector<8x256xf32> to vector<8x64xf32>
      %191 = math.tanh %190 : vector<8x64xf32>
      %192 = vector.extract_strided_slice %189 {offsets = [0, 0], sizes = [8, 64], strides = [1, 1]} : vector<8x192xf32> to vector<8x64xf32>
      %193 = vector.extract_strided_slice %189 {offsets = [0, 64], sizes = [8, 64], strides = [1, 1]} : vector<8x192xf32> to vector<8x64xf32>
      %194 = vector.extract_strided_slice %189 {offsets = [0, 128], sizes = [8, 64], strides = [1, 1]} : vector<8x192xf32> to vector<8x64xf32>
      %195 = arith.mulf %193, %170 : vector<8x64xf32>
      %196 = arith.mulf %192, %191 : vector<8x64xf32>
      %197 = arith.addf %195, %196 : vector<8x64xf32>
      %198 = math.tanh %197 : vector<8x64xf32>
      %199 = arith.mulf %194, %198 : vector<8x64xf32>
      %200 = arith.index_cast %177 : i32 to index
      %c0_62 = arith.constant 0 : index
      %201 = vector.load %arg5[%200, %c0_62] : memref<2048x64xf32, #tpu.memory_space<vmem>>, vector<8x64xf32>
      tpu.vector_store %arg5[%200, %c0_62], %199 {strides = array<i32>} : memref<2048x64xf32, #tpu.memory_space<vmem>>, vector<8x64xf32>,
      %c7_i32 = arith.constant 7 : i32
      %202 = arith.addi %12, %c7_i32 : i32
      %c8_i32_63 = arith.constant 8 : i32
      %203 = arith.muli %202, %c8_i32_63 : i32
      %204 = tpu.assume_multiple %203, 8 : i32
      %205 = arith.index_cast %204 : i32 to index
      %c0_64 = arith.constant 0 : index
      %206 = vector.load %arg6[%205, %c0_64] : memref<2048x256xf32, #tpu.memory_space<vmem>>, vector<8x256xf32>
      %cst_65 = arith.constant dense<0.000000e+00> : vector<8x256xf32>
      %207 = tpu.matmul %199, %7, %cst_65 {dimension_numbers = #tpu.dot_dimension_numbers<[1], [0], [0], [1], [0, 0, 1, 1], [], []>} : vector<8x64xf32>, vector<64x256xf32>, vector<8x256xf32> -> vector<8x256xf32>
      %208 = arith.addf %206, %207 : vector<8x256xf32>
      %209 = vector.extract_strided_slice %208 {offsets = [0, 0], sizes = [8, 192], strides = [1, 1]} : vector<8x256xf32> to vector<8x192xf32>
      %cst_66 = arith.constant 5.000000e-01 : f32
      %210 = vector.broadcast %cst_66 : f32 to vector<8x192xf32>
      %211 = arith.mulf %210, %209 : vector<8x192xf32>
      %212 = math.tanh %211 : vector<8x192xf32>
      %cst_67 = arith.constant 5.000000e-01 : f32
      %213 = vector.broadcast %cst_67 : f32 to vector<8x192xf32>
      %214 = arith.mulf %213, %212 : vector<8x192xf32>
      %cst_68 = arith.constant 5.000000e-01 : f32
      %215 = vector.broadcast %cst_68 : f32 to vector<8x192xf32>
      %216 = arith.addf %214, %215 : vector<8x192xf32>
      %217 = vector.extract_strided_slice %208 {offsets = [0, 192], sizes = [8, 64], strides = [1, 1]} : vector<8x256xf32> to vector<8x64xf32>
      %218 = math.tanh %217 : vector<8x64xf32>
      %219 = vector.extract_strided_slice %216 {offsets = [0, 0], sizes = [8, 64], strides = [1, 1]} : vector<8x192xf32> to vector<8x64xf32>
      %220 = vector.extract_strided_slice %216 {offsets = [0, 64], sizes = [8, 64], strides = [1, 1]} : vector<8x192xf32> to vector<8x64xf32>
      %221 = vector.extract_strided_slice %216 {offsets = [0, 128], sizes = [8, 64], strides = [1, 1]} : vector<8x192xf32> to vector<8x64xf32>
      %222 = arith.mulf %220, %197 : vector<8x64xf32>
      %223 = arith.mulf %219, %218 : vector<8x64xf32>
      %224 = arith.addf %222, %223 : vector<8x64xf32>
      %225 = math.tanh %224 : vector<8x64xf32>
      %226 = arith.mulf %221, %225 : vector<8x64xf32>
      %227 = arith.index_cast %204 : i32 to index
      %c0_69 = arith.constant 0 : index
      %228 = vector.load %arg5[%227, %c0_69] : memref<2048x64xf32, #tpu.memory_space<vmem>>, vector<8x64xf32>
      tpu.vector_store %arg5[%227, %c0_69], %226 {strides = array<i32>} : memref<2048x64xf32, #tpu.memory_space<vmem>>, vector<8x64xf32>,
      scf.yield %226, %224 : vector<8x64xf32>, vector<8x64xf32>
    }
    %c32_i32_11 = arith.constant 32 : i32
    return
  }
  func.func @transform_0(%arg0: i32) -> (i32, i32) {
    %c0_i32 = arith.constant 0 : i32
    %c0_i32_0 = arith.constant 0 : i32
    return %arg0, %c0_i32 : i32, i32
  }
  func.func @transform_1(%arg0: i32) -> (i32, i32) {
    %c0_i32 = arith.constant 0 : i32
    %c0_i32_0 = arith.constant 0 : i32
    %c0_i32_1 = arith.constant 0 : i32
    return %c0_i32, %c0_i32_0 : i32, i32
  }
  func.func @transform_2(%arg0: i32) -> (i32, i32) {
    %c0_i32 = arith.constant 0 : i32
    %c0_i32_0 = arith.constant 0 : i32
    %c0_i32_1 = arith.constant 0 : i32
    return %c0_i32, %c0_i32_0 : i32, i32
  }
  func.func @transform_3(%arg0: i32) -> (i32, i32) {
    %c0_i32 = arith.constant 0 : i32
    %c0_i32_0 = arith.constant 0 : i32
    %c0_i32_1 = arith.constant 0 : i32
    return %c0_i32, %c0_i32_0 : i32, i32
  }
  func.func @transform_4(%arg0: i32) -> (i32, i32) {
    %c0_i32 = arith.constant 0 : i32
    %c0_i32_0 = arith.constant 0 : i32
    return %arg0, %c0_i32 : i32, i32
  }
}

</mosaic_0001>

<bundles_post_ra>
// kernel: _lambda_.1
= control target key start
LH: loop header
LB: loop body
LE: loop exit
PB: predicated region body
PF: predicated region fallthrough
CT: control target
= control target key end

     0   :  { %v4766_v3 = vmov 0.0   ;;  %vm293_vm0 = vcmask 261120   ;;  %s6887_s1 = inlined_call_operand.vmem [shape: f32[32,256], index: 1, kind: input, shape index: {}]   ;;  %s6888_s4 = inlined_call_operand.vmem [shape: f32[2048,64], index: 4, kind: output, shape index: {}]   ;;  %s6889_s0 = inlined_call_operand.vmem [shape: f32[2048,32], index: 0, kind: input, shape index: {}]   ;;  %s6890_s2 = inlined_call_operand.vmem [shape: f32[1,256], index: 2, kind: input, shape index: {}]   ;;  %s6891_s3 = inlined_call_operand.vmem [shape: f32[64,256], index: 3, kind: input, shape index: {}]  }
   0x1   :  { %v274_v0 = vld [vmem:[%s6887_s1 + $0x8] sm:$0xff]  ;;  %v276_v1 = vld [vmem:[%s6887_s1 + $0x18] sm:$0xff]  ;;  %v273_v2 = vld [vmem:[%s6887_s1] sm:$0xff]  ;;  %1126 = vmatprep.mubr.f32.mxu0 %v4766_v3  ;;  %1894 = vmatprep.mubr.f32.mxu1 %v4766_v3 }
   0x2   :  { %v4511_v4 = vpack.c.bf16 %v276_v1, %v274_v0  ;;  %v275_v5 = vld [vmem:[%s6887_s1 + $0x10] sm:$0xff]  ;;  %v278_v6 = vld [vmem:[%s6887_s1 + $0x28] sm:$0xff]  ;;  %v280_v7 = vld [vmem:[%s6887_s1 + $0x38] sm:$0xff] }
   0x3   :  { %v4513_v8 = vpack.c.bf16 %v275_v5, %v273_v2  ;;  %v4515_v9 = vpack.c.bf16 %v280_v7, %v278_v6  ;;  %v277_v10 = vld [vmem:[%s6887_s1 + $0x20] sm:$0xff]  ;;  %v279_v11 = vld [vmem:[%s6887_s1 + $0x30] sm:$0xff]  ;;  %v18_v15 = vld [vmem:[%s6889_s0 + $0x8] sm:$0xff] }
   0x4   :  { %4512 = vmatprep.subr.bf16.mxu0 %v4511_v4  ;;  %4647 = vmatprep.subr.bf16.mxu1 %v4511_v4  ;;  %v4517_v12 = vpack.c.bf16 %v279_v11, %v277_v10  ;;  %v17_v13 = vld [vmem:[%s6889_s0] sm:$0xff]  ;;  %v146_v16 = vld [vmem:[%s6889_s0 + $0x408] sm:$0xff]  ;;  %v19_v17 = vld [vmem:[%s6889_s0 + $0x10] sm:$0xff] }
   0x5   :  { %4514 = vmatpush1.bf16.msra.mxu0 %v4513_v8  ;;  %4649 = vmatpush1.bf16.msra.mxu1 %v4513_v8  ;;  %v145_v14 = vld [vmem:[%s6889_s0 + $0x400] sm:$0xff]  ;;  %v147_v18 = vld [vmem:[%s6889_s0 + $0x410] sm:$0xff]  ;;  %v20_v19 = vld [vmem:[%s6889_s0 + $0x18] sm:$0xff] }
   0x6   :  { %4516 = vmatprep.subr.bf16.mxu0 %v4515_v9  ;;  %4648 = vmatprep.subr.bf16.mxu1 %v4515_v9  ;;  %v148_v20 = vld [vmem:[%s6889_s0 + $0x418] sm:$0xff]  ;;  %v21_v21 = vld [vmem:[%s6889_s0 + $0x20] sm:$0xff]  ;;  %v22_v23 = vld [vmem:[%s6889_s0 + $0x28] sm:$0xff] }
   0x7   :  { %v149_v22 = vld [vmem:[%s6889_s0 + $0x420] sm:$0xff]  ;;  %v150_v24 = vld [vmem:[%s6889_s0 + $0x428] sm:$0xff]  ;;  %v23_v25 = vld [vmem:[%s6889_s0 + $0x30] sm:$0xff] }
   0x8   :  { %v151_v26 = vld [vmem:[%s6889_s0 + $0x430] sm:$0xff]  ;;  %v24_v27 = vld [vmem:[%s6889_s0 + $0x38] sm:$0xff]  ;;  %v25_v29 = vld [vmem:[%s6889_s0 + $0x40] sm:$0xff] }
   0x9   :  { %4518 = vmatpush1.bf16.msra.mxu0 %v4517_v12  ;;  %4650 = vmatpush1.bf16.msra.mxu1 %v4517_v12  ;;  %v152_v28 = vld [vmem:[%s6889_s0 + $0x438] sm:$0xff]  ;;  %v153_v30 = vld [vmem:[%s6889_s0 + $0x440] sm:$0xff]  ;;  %v26_v31 = vld [vmem:[%s6889_s0 + $0x48] sm:$0xff] }
   0xa   :  { %v154_v32 = vld [vmem:[%s6889_s0 + $0x448] sm:$0xff]  ;;  %v27_v33 = vld [vmem:[%s6889_s0 + $0x50] sm:$0xff]  ;;  %v28_v35 = vld [vmem:[%s6889_s0 + $0x58] sm:$0xff] }
   0xb   :  { %v155_v34 = vld [vmem:[%s6889_s0 + $0x450] sm:$0xff]  ;;  %v156_v36 = vld [vmem:[%s6889_s0 + $0x458] sm:$0xff]  ;;  %v29_v37 = vld [vmem:[%s6889_s0 + $0x60] sm:$0xff] }
   0xc   :  { %4165 = vmatmul.mubr.msk.f32.vlgmr.msra.gmra.mrb[0].mxu0 %vm293_vm0, %v17_v13  ;;  %4293 = vmatmul.mubr.msk.f32.vlgmr.msra.gmra.mrb[0].mxu1 %vm293_vm0, %v145_v14  ;;  %v157_v38 = vld [vmem:[%s6889_s0 + $0x460] sm:$0xff]  ;;  %v30_v39 = vld [vmem:[%s6889_s0 + $0x68] sm:$0xff]  ;;  %v31_v41 = vld [vmem:[%s6889_s0 + $0x70] sm:$0xff] }
   0xd   :  { %1132 = vmatprep.mubr.f32.mxu0 %v4766_v3  ;;  %1900 = vmatprep.mubr.f32.mxu1 %v4766_v3  ;;  %v158_v40 = vld [vmem:[%s6889_s0 + $0x468] sm:$0xff]  ;;  %v159_v42 = vld [vmem:[%s6889_s0 + $0x470] sm:$0xff]  ;;  %v32_v43 = vld [vmem:[%s6889_s0 + $0x78] sm:$0xff] }
   0xe   :  { %v160_v44 = vld [vmem:[%s6889_s0 + $0x478] sm:$0xff]  ;;  %v33_v45 = vld [vmem:[%s6889_s0 + $0x80] sm:$0xff]  ;;  %v34_v47 = vld [vmem:[%s6889_s0 + $0x88] sm:$0xff] }
   0xf   :  { %v161_v46 = vld [vmem:[%s6889_s0 + $0x480] sm:$0xff]  ;;  %v162_v48 = vld [vmem:[%s6889_s0 + $0x488] sm:$0xff]  ;;  %v35_v49 = vld [vmem:[%s6889_s0 + $0x90] sm:$0xff] }
  0x10   :  { %4166 = vmatmul.mubr.msk.f32.gmra.mrb[2].mxu0 %vm293_vm0, %v18_v15  ;;  %4294 = vmatmul.mubr.msk.f32.gmra.mrb[2].mxu1 %vm293_vm0, %v146_v16  ;;  %v163_v50 = vld [vmem:[%s6889_s0 + $0x490] sm:$0xff]  ;;  %v36_v51 = vld [vmem:[%s6889_s0 + $0x98] sm:$0xff]  ;;  %v37_v53 = vld [vmem:[%s6889_s0 + $0xa0] sm:$0xff] }
  0x11   :  { %1138 = vmatprep.mubr.f32.mxu0 %v4766_v3  ;;  %1906 = vmatprep.mubr.f32.mxu1 %v4766_v3  ;;  %v164_v52 = vld [vmem:[%s6889_s0 + $0x498] sm:$0xff]  ;;  %v165_v54 = vld [vmem:[%s6889_s0 + $0x4a0] sm:$0xff]  ;;  %v38_v55 = vld [vmem:[%s6889_s0 + $0xa8] sm:$0xff] }
  0x12   :  { %v166_v56 = vld [vmem:[%s6889_s0 + $0x4a8] sm:$0xff]  ;;  %v39_v57 = vld [vmem:[%s6889_s0 + $0xb0] sm:$0xff]  ;;  %v40_v59 = vld [vmem:[%s6889_s0 + $0xb8] sm:$0xff] }
  0x13   :  { %v167_v58 = vld [vmem:[%s6889_s0 + $0x4b0] sm:$0xff]  ;;  %v168_v60 = vld [vmem:[%s6889_s0 + $0x4b8] sm:$0xff]  ;;  %v41_v61 = vld [vmem:[%s6889_s0 + $0xc0] sm:$0xff] }
  0x14   :  { %4167 = vmatmul.mubr.msk.f32.gmra.mrb[4].mxu0 %vm293_vm0, %v19_v17  ;;  %4295 = vmatmul.mubr.msk.f32.gmra.mrb[4].mxu1 %vm293_vm0, %v147_v18  ;;  %v169_v62 = vld [vmem:[%s6889_s0 + $0x4c0] sm:$0xff]  ;;  %v42_v63 = vld [vmem:[%s6889_s0 + $0xc8] sm:$0xff]  ;;  %v43_v1 = vld [vmem:[%s6889_s0 + $0xd0] sm:$0xff] }
  0x15   :  { %1144 = vmatprep.mubr.f32.mxu0 %v4766_v3  ;;  %1912 = vmatprep.mubr.f32.mxu1 %v4766_v3  ;;  %v170_v0 = vld [vmem:[%s6889_s0 + $0x4c8] sm:$0xff]  ;;  %v171_v2 = vld [vmem:[%s6889_s0 + $0x4d0] sm:$0xff]  ;;  %v44_v4 = vld [vmem:[%s6889_s0 + $0xd8] sm:$0xff] }
  0x16   :  { %v172_v5 = vld [vmem:[%s6889_s0 + $0x4d8] sm:$0xff]  ;;  %v45_v6 = vld [vmem:[%s6889_s0 + $0xe0] sm:$0xff]  ;;  %v46_v8 = vld [vmem:[%s6889_s0 + $0xe8] sm:$0xff] }
  0x17   :  { %v173_v7 = vld [vmem:[%s6889_s0 + $0x4e0] sm:$0xff]  ;;  %v174_v9 = vld [vmem:[%s6889_s0 + $0x4e8] sm:$0xff]  ;;  %v47_v10 = vld [vmem:[%s6889_s0 + $0xf0] sm:$0xff] }
  0x18   :  { %4168 = vmatmul.mubr.msk.f32.gmra.mrb[6].mxu0 %vm293_vm0, %v20_v19  ;;  %4296 = vmatmul.mubr.msk.f32.gmra.mrb[6].mxu1 %vm293_vm0, %v148_v20  ;;  %v175_v11 = vld [vmem:[%s6889_s0 + $0x4f0] sm:$0xff]  ;;  %v48_v12 = vld [vmem:[%s6889_s0 + $0xf8] sm:$0xff]  ;;  %v49_v14 = vld [vmem:[%s6889_s0 + $0x100] sm:$0xff] }
  0x19   :  { %1150 = vmatprep.mubr.f32.mxu0 %v4766_v3  ;;  %1918 = vmatprep.mubr.f32.mxu1 %v4766_v3  ;;  %v176_v13 = vld [vmem:[%s6889_s0 + $0x4f8] sm:$0xff]  ;;  %v177_v15 = vld [vmem:[%s6889_s0 + $0x500] sm:$0xff]  ;;  %v50_v16 = vld [vmem:[%s6889_s0 + $0x108] sm:$0xff] }
  0x1a   :  { %v178_v17 = vld [vmem:[%s6889_s0 + $0x508] sm:$0xff]  ;;  %v51_v18 = vld [vmem:[%s6889_s0 + $0x110] sm:$0xff]  ;;  %v52_v20 = vld [vmem:[%s6889_s0 + $0x118] sm:$0xff] }
  0x1b   :  { %v179_v19 = vld [vmem:[%s6889_s0 + $0x510] sm:$0xff] }
  0x1c   :  { %4169 = vmatmul.mubr.msk.f32.gmra.mrb[8].mxu0 %vm293_vm0, %v21_v21  ;;  %4297 = vmatmul.mubr.msk.f32.gmra.mrb[8].mxu1 %vm293_vm0, %v149_v22  ;;  %v180_v21 = vld [vmem:[%s6889_s0 + $0x518] sm:$0xff]  ;;  %v53_v22 = vld [vmem:[%s6889_s0 + $0x120] sm:$0xff] }
  0x1d   :  { %1156 = vmatprep.mubr.f32.mxu0 %v4766_v3  ;;  %1924 = vmatprep.mubr.f32.mxu1 %v4766_v3 }
  0x20   :  { %4170 = vmatmul.mubr.msk.f32.gmra.mrb[10].mxu0 %vm293_vm0, %v22_v23  ;;  %4298 = vmatmul.mubr.msk.f32.gmra.mrb[10].mxu1 %vm293_vm0, %v150_v24  ;;  %v181_v23 = vld [vmem:[%s6889_s0 + $0x520] sm:$0xff]  ;;  %v54_v24 = vld [vmem:[%s6889_s0 + $0x128] sm:$0xff] }
  0x21   :  { %1162 = vmatprep.mubr.f32.mxu0 %v4766_v3  ;;  %1930 = vmatprep.mubr.f32.mxu1 %v4766_v3 }
  0x24   :  { %4171 = vmatmul.mubr.msk.f32.gmra.mrb[12].mxu0 %vm293_vm0, %v23_v25  ;;  %4299 = vmatmul.mubr.msk.f32.gmra.mrb[12].mxu1 %vm293_vm0, %v151_v26  ;;  %v182_v25 = vld [vmem:[%s6889_s0 + $0x528] sm:$0xff]  ;;  %v55_v26 = vld [vmem:[%s6889_s0 + $0x130] sm:$0xff] }
  0x25   :  { %1168 = vmatprep.mubr.f32.mxu0 %v4766_v3  ;;  %1936 = vmatprep.mubr.f32.mxu1 %v4766_v3 }
  0x28   :  { %4172 = vmatmul.mubr.msk.f32.gmra.mrb[14].mxu0 %vm293_vm0, %v24_v27  ;;  %4300 = vmatmul.mubr.msk.f32.gmra.mrb[14].mxu1 %vm293_vm0, %v152_v28  ;;  %v183_v27 = vld [vmem:[%s6889_s0 + $0x530] sm:$0xff]  ;;  %v56_v28 = vld [vmem:[%s6889_s0 + $0x138] sm:$0xff] }
  0x29   :  { %1174 = vmatprep.mubr.f32.mxu0 %v4766_v3  ;;  %1942 = vmatprep.mubr.f32.mxu1 %v4766_v3 }
  0x2c   :  { %4173 = vmatmul.mubr.msk.f32.gmra.mrb[16].mxu0 %vm293_vm0, %v25_v29  ;;  %4301 = vmatmul.mubr.msk.f32.gmra.mrb[16].mxu1 %vm293_vm0, %v153_v30  ;;  %v184_v29 = vld [vmem:[%s6889_s0 + $0x538] sm:$0xff]  ;;  %v57_v30 = vld [vmem:[%s6889_s0 + $0x140] sm:$0xff] }
  0x2d   :  { %1180 = vmatprep.mubr.f32.mxu0 %v4766_v3  ;;  %1948 = vmatprep.mubr.f32.mxu1 %v4766_v3 }
  0x30   :  { %4174 = vmatmul.mubr.msk.f32.gmra.mrb[18].mxu0 %vm293_vm0, %v26_v31  ;;  %4302 = vmatmul.mubr.msk.f32.gmra.mrb[18].mxu1 %vm293_vm0, %v154_v32  ;;  %v185_v31 = vld [vmem:[%s6889_s0 + $0x540] sm:$0xff]  ;;  %v58_v32 = vld [vmem:[%s6889_s0 + $0x148] sm:$0xff] }
  0x31   :  { %1186 = vmatprep.mubr.f32.mxu0 %v4766_v3  ;;  %1954 = vmatprep.mubr.f32.mxu1 %v4766_v3 }
  0x34   :  { %4175 = vmatmul.mubr.msk.f32.gmra.mrb[20].mxu0 %vm293_vm0, %v27_v33  ;;  %4303 = vmatmul.mubr.msk.f32.gmra.mrb[20].mxu1 %vm293_vm0, %v155_v34  ;;  %v186_v33 = vld [vmem:[%s6889_s0 + $0x548] sm:$0xff]  ;;  %v59_v34 = vld [vmem:[%s6889_s0 + $0x150] sm:$0xff] }
  0x35   :  { %1192 = vmatprep.mubr.f32.mxu0 %v4766_v3  ;;  %1960 = vmatprep.mubr.f32.mxu1 %v4766_v3 }
  0x38   :  { %4176 = vmatmul.mubr.msk.f32.gmra.mrb[22].mxu0 %vm293_vm0, %v28_v35  ;;  %4304 = vmatmul.mubr.msk.f32.gmra.mrb[22].mxu1 %vm293_vm0, %v156_v36  ;;  %v187_v35 = vld [vmem:[%s6889_s0 + $0x550] sm:$0xff]  ;;  %v60_v36 = vld [vmem:[%s6889_s0 + $0x158] sm:$0xff] }
  0x39   :  { %1198 = vmatprep.mubr.f32.mxu0 %v4766_v3  ;;  %1966 = vmatprep.mubr.f32.mxu1 %v4766_v3 }
  0x3c   :  { %4177 = vmatmul.mubr.msk.f32.gmra.mrb[24].mxu0 %vm293_vm0, %v29_v37  ;;  %4305 = vmatmul.mubr.msk.f32.gmra.mrb[24].mxu1 %vm293_vm0, %v157_v38  ;;  %v188_v37 = vld [vmem:[%s6889_s0 + $0x558] sm:$0xff]  ;;  %v61_v38 = vld [vmem:[%s6889_s0 + $0x160] sm:$0xff] }
  0x3d   :  { %1204 = vmatprep.mubr.f32.mxu0 %v4766_v3  ;;  %1972 = vmatprep.mubr.f32.mxu1 %v4766_v3 }
  0x40   :  { %4178 = vmatmul.mubr.msk.f32.gmra.mrb[26].mxu0 %vm293_vm0, %v30_v39  ;;  %4306 = vmatmul.mubr.msk.f32.gmra.mrb[26].mxu1 %vm293_vm0, %v158_v40  ;;  %v189_v39 = vld [vmem:[%s6889_s0 + $0x560] sm:$0xff]  ;;  %v62_v40 = vld [vmem:[%s6889_s0 + $0x168] sm:$0xff] }
  0x41   :  { %1210 = vmatprep.mubr.f32.mxu0 %v4766_v3  ;;  %1978 = vmatprep.mubr.f32.mxu1 %v4766_v3 }
  0x44   :  { %4179 = vmatmul.mubr.msk.f32.gmra.mrb[28].mxu0 %vm293_vm0, %v31_v41  ;;  %4307 = vmatmul.mubr.msk.f32.gmra.mrb[28].mxu1 %vm293_vm0, %v159_v42  ;;  %v190_v41 = vld [vmem:[%s6889_s0 + $0x568] sm:$0xff]  ;;  %v63_v42 = vld [vmem:[%s6889_s0 + $0x170] sm:$0xff] }
  0x45   :  { %1216 = vmatprep.mubr.f32.mxu0 %v4766_v3  ;;  %1984 = vmatprep.mubr.f32.mxu1 %v4766_v3 }
  0x48   :  { %4180 = vmatmul.mubr.msk.f32.gmra.mrb[30].mxu0 %vm293_vm0, %v32_v43  ;;  %4308 = vmatmul.mubr.msk.f32.gmra.mrb[30].mxu1 %vm293_vm0, %v160_v44  ;;  %v191_v43 = vld [vmem:[%s6889_s0 + $0x570] sm:$0xff]  ;;  %v64_v44 = vld [vmem:[%s6889_s0 + $0x178] sm:$0xff] }
  0x49   :  { %1222 = vmatprep.mubr.f32.mxu0 %v4766_v3  ;;  %1990 = vmatprep.mubr.f32.mxu1 %v4766_v3 }
  0x4c   :  { %4181 = vmatmul.mubr.msk.f32.gmra.mrb[32].mxu0 %vm293_vm0, %v33_v45  ;;  %4309 = vmatmul.mubr.msk.f32.gmra.mrb[32].mxu1 %vm293_vm0, %v161_v46  ;;  %v192_v45 = vld [vmem:[%s6889_s0 + $0x578] sm:$0xff]  ;;  %v65_v46 = vld [vmem:[%s6889_s0 + $0x180] sm:$0xff] }
  0x4d   :  { %1228 = vmatprep.mubr.f32.mxu0 %v4766_v3  ;;  %1996 = vmatprep.mubr.f32.mxu1 %v4766_v3 }
  0x50   :  { %4182 = vmatmul.mubr.msk.f32.gmra.mrb[34].mxu0 %vm293_vm0, %v34_v47  ;;  %4310 = vmatmul.mubr.msk.f32.gmra.mrb[34].mxu1 %vm293_vm0, %v162_v48  ;;  %v193_v47 = vld [vmem:[%s6889_s0 + $0x580] sm:$0xff]  ;;  %v66_v48 = vld [vmem:[%s6889_s0 + $0x188] sm:$0xff] }
  0x51   :  { %1234 = vmatprep.mubr.f32.mxu0 %v4766_v3  ;;  %2002 = vmatprep.mubr.f32.mxu1 %v4766_v3 }
  0x54   :  { %4183 = vmatmul.mubr.msk.f32.gmra.mrb[36].mxu0 %vm293_vm0, %v35_v49  ;;  %4311 = vmatmul.mubr.msk.f32.gmra.mrb[36].mxu1 %vm293_vm0, %v163_v50  ;;  %v194_v49 = vld [vmem:[%s6889_s0 + $0x588] sm:$0xff]  ;;  %v283_v50 = vlaneseq }
  0x55   :  { %1240 = vmatprep.mubr.f32.mxu0 %v4766_v3  ;;  %2008 = vmatprep.mubr.f32.mxu1 %v4766_v3 }
  0x58   :  { %4184 = vmatmul.mubr.msk.f32.gmra.mrb[38].mxu0 %vm293_vm0, %v36_v51  ;;  %4312 = vmatmul.mubr.msk.f32.gmra.mrb[38].mxu1 %vm293_vm0, %v164_v52  ;;  %v67_v51 = vld [vmem:[%s6889_s0 + $0x190] sm:$0xff] }
  0x59   :  { %1246 = vmatprep.mubr.f32.mxu0 %v4766_v3  ;;  %2014 = vmatprep.mubr.f32.mxu1 %v4766_v3  ;;  %v195_v52 = vld [vmem:[%s6889_s0 + $0x590] sm:$0xff] }
  0x5c   :  { %4185 = vmatmul.mubr.msk.f32.gmra.mrb[40].mxu0 %vm293_vm0, %v37_v53  ;;  %4313 = vmatmul.mubr.msk.f32.gmra.mrb[40].mxu1 %vm293_vm0, %v165_v54  ;;  %v284_v53 = vshrl.u32 %v283_v50, 7  ;;  %v68_v54 = vld [vmem:[%s6889_s0 + $0x198] sm:$0xff]  ;;  %v75_v50 = vld [vmem:[%s6889_s0 + $0x1d0] sm:$0xff] }
  0x5d   :  { %1252 = vmatprep.mubr.f32.mxu0 %v4766_v3  ;;  %2020 = vmatprep.mubr.f32.mxu1 %v4766_v3 }
  0x60   :  { %4186 = vmatmul.mubr.msk.f32.gmra.mrb[42].mxu0 %vm293_vm0, %v38_v55  ;;  %4314 = vmatmul.mubr.msk.f32.gmra.mrb[42].mxu1 %vm293_vm0, %v166_v56  ;;  %v196_v55 = vld [vmem:[%s6889_s0 + $0x598] sm:$0xff]  ;;  %v285_v56 = vsub.s32 0, %v284_v53 }
  0x61   :  { %1258 = vmatprep.mubr.f32.mxu0 %v4766_v3  ;;  %2026 = vmatprep.mubr.f32.mxu1 %v4766_v3 }
  0x64   :  { %4187 = vmatmul.mubr.msk.f32.gmra.mrb[44].mxu0 %vm293_vm0, %v39_v57  ;;  %4315 = vmatmul.mubr.msk.f32.gmra.mrb[44].mxu1 %vm293_vm0, %v167_v58  ;;  %v69_v57 = vld [vmem:[%s6889_s0 + $0x1a0] sm:$0xff] }
  0x65   :  { %1264 = vmatprep.mubr.f32.mxu0 %v4766_v3  ;;  %2032 = vmatprep.mubr.f32.mxu1 %v4766_v3  ;;  %v197_v58 = vld [vmem:[%s6889_s0 + $0x5a0] sm:$0xff] }
  0x68   :  { %4188 = vmatmul.mubr.msk.f32.gmra.mrb[46].mxu0 %vm293_vm0, %v40_v59  ;;  %4316 = vmatmul.mubr.msk.f32.gmra.mrb[46].mxu1 %vm293_vm0, %v168_v60  ;;  %v281_v59 = vld [vmem:[%s6890_s2] sm:$0x3]  ;;  %v289_v60 = vsub.s32 1, %v284_v53 }
  0x69   :  { %1270 = vmatprep.mubr.f32.mxu0 %v4766_v3  ;;  %2038 = vmatprep.mubr.f32.mxu1 %v4766_v3 }
  0x6c   :  { %4189 = vmatmul.mubr.msk.f32.gmra.mrb[48].mxu0 %vm293_vm0, %v41_v61  ;;  %4317 = vmatmul.mubr.msk.f32.gmra.mrb[48].mxu1 %vm293_vm0, %v169_v62  ;;  %v5351_v61 = vrot.slane %v281_v59, %v285_v56  ;;  %v5355_v62 = vrot.slane %v281_v59, %v289_v60  ;;  %v76_v60 = vld [vmem:[%s6889_s0 + $0x1d8] sm:$0xff] }
  0x6d   :  { %1276 = vmatprep.mubr.f32.mxu0 %v4766_v3  ;;  %2044 = vmatprep.mubr.f32.mxu1 %v4766_v3 }
  0x70   :  { %4190 = vmatmul.mubr.msk.f32.gmra.mrb[50].mxu0 %vm293_vm0, %v42_v63  ;;  %4318 = vmatmul.mubr.msk.f32.gmra.mrb[50].mxu1 %vm293_vm0, %v170_v0  ;;  %v70_v63 = vld [vmem:[%s6889_s0 + $0x1a8] sm:$0xff] }
  0x71   :  { %1282 = vmatprep.mubr.f32.mxu0 %v4766_v3  ;;  %2050 = vmatprep.mubr.f32.mxu1 %v4766_v3  ;;  %v198_v0 = vld [vmem:[%s6889_s0 + $0x5a8] sm:$0xff] }
  0x74   :  { %4191 = vmatmul.mubr.msk.f32.gmra.mrb[52].mxu0 %vm293_vm0, %v43_v1  ;;  %4319 = vmatmul.mubr.msk.f32.gmra.mrb[52].mxu1 %vm293_vm0, %v171_v2 }
  0x75   :  { %1288 = vmatprep.mubr.f32.mxu0 %v4766_v3  ;;  %2056 = vmatprep.mubr.f32.mxu1 %v4766_v3 }
  0x78   :  { %4192 = vmatmul.mubr.msk.f32.gmra.mrb[54].mxu0 %vm293_vm0, %v44_v4  ;;  %4320 = vmatmul.mubr.msk.f32.gmra.mrb[54].mxu1 %vm293_vm0, %v172_v5 }
  0x79   :  { %1294 = vmatprep.mubr.f32.mxu0 %v4766_v3  ;;  %2062 = vmatprep.mubr.f32.mxu1 %v4766_v3 }
  0x7c   :  { %4193 = vmatmul.mubr.msk.f32.gmra.mrb[56].mxu0 %vm293_vm0, %v45_v6  ;;  %4321 = vmatmul.mubr.msk.f32.gmra.mrb[56].mxu1 %vm293_vm0, %v173_v7 }
  0x7d   :  { %1300 = vmatprep.mubr.f32.mxu0 %v4766_v3  ;;  %2068 = vmatprep.mubr.f32.mxu1 %v4766_v3 }
  0x80   :  { %4194 = vmatmul.mubr.msk.f32.gmra.mrb[58].mxu0 %vm293_vm0, %v46_v8  ;;  %4322 = vmatmul.mubr.msk.f32.gmra.mrb[58].mxu1 %vm293_vm0, %v174_v9 }
  0x81   :  { %1306 = vmatprep.mubr.f32.mxu0 %v4766_v3  ;;  %2074 = vmatprep.mubr.f32.mxu1 %v4766_v3 }
  0x84   :  { %4195 = vmatmul.mubr.msk.f32.gmra.mrb[60].mxu0 %vm293_vm0, %v47_v10  ;;  %4323 = vmatmul.mubr.msk.f32.gmra.mrb[60].mxu1 %vm293_vm0, %v175_v11  ;;  %v71_v10 = vld [vmem:[%s6889_s0 + $0x1b0] sm:$0xff] }
  0x85   :  { %1312 = vmatprep.mubr.f32.mxu0 %v4766_v3  ;;  %2080 = vmatprep.mubr.f32.mxu1 %v4766_v3  ;;  %v199_v11 = vld [vmem:[%s6889_s0 + $0x5b0] sm:$0xff] }
  0x88   :  { %4196 = vmatmul.mubr.msk.f32.gmra.mrb[62].mxu0 %vm293_vm0, %v48_v12  ;;  %4324 = vmatmul.mubr.msk.f32.gmra.mrb[62].mxu1 %vm293_vm0, %v176_v13 }
  0x89   :  { %1318 = vmatprep.mubr.f32.mxu0 %v4766_v3  ;;  %2086 = vmatprep.mubr.f32.mxu1 %v4766_v3 }
  0x8c   :  { %4197 = vmatmul.mubr.msk.f32.gmra.mrb[64].mxu0 %vm293_vm0, %v49_v14  ;;  %4325 = vmatmul.mubr.msk.f32.gmra.mrb[64].mxu1 %vm293_vm0, %v177_v15 }
  0x8d   :  { %1324 = vmatprep.mubr.f32.mxu0 %v4766_v3  ;;  %2092 = vmatprep.mubr.f32.mxu1 %v4766_v3 }
  0x90   :  { %4198 = vmatmul.mubr.msk.f32.gmra.mrb[66].mxu0 %vm293_vm0, %v50_v16  ;;  %4326 = vmatmul.mubr.msk.f32.gmra.mrb[66].mxu1 %vm293_vm0, %v178_v17 }
  0x91   :  { %1330 = vmatprep.mubr.f32.mxu0 %v4766_v3  ;;  %2098 = vmatprep.mubr.f32.mxu1 %v4766_v3 }
  0x94   :  { %4199 = vmatmul.mubr.msk.f32.gmra.mrb[68].mxu0 %vm293_vm0, %v51_v18  ;;  %4327 = vmatmul.mubr.msk.f32.gmra.mrb[68].mxu1 %vm293_vm0, %v179_v19 }
  0x95   :  { %1336 = vmatprep.mubr.f32.mxu0 %v4766_v3  ;;  %2104 = vmatprep.mubr.f32.mxu1 %v4766_v3 }
  0x98   :  { %4200 = vmatmul.mubr.msk.f32.gmra.mrb[70].mxu0 %vm293_vm0, %v52_v20  ;;  %4328 = vmatmul.mubr.msk.f32.gmra.mrb[70].mxu1 %vm293_vm0, %v180_v21  ;;  %v72_v20 = vld [vmem:[%s6889_s0 + $0x1b8] sm:$0xff] }
  0x99   :  { %1342 = vmatprep.mubr.f32.mxu0 %v4766_v3  ;;  %2110 = vmatprep.mubr.f32.mxu1 %v4766_v3  ;;  %v200_v21 = vld [vmem:[%s6889_s0 + $0x5b8] sm:$0xff] }
  0x9c   :  { %4201 = vmatmul.mubr.msk.f32.gmra.mrb[72].mxu0 %vm293_vm0, %v53_v22  ;;  %4329 = vmatmul.mubr.msk.f32.gmra.mrb[72].mxu1 %vm293_vm0, %v181_v23 }
  0x9d   :  { %1348 = vmatprep.mubr.f32.mxu0 %v4766_v3  ;;  %2116 = vmatprep.mubr.f32.mxu1 %v4766_v3 }
  0xa0   :  { %4202 = vmatmul.mubr.msk.f32.gmra.mrb[74].mxu0 %vm293_vm0, %v54_v24  ;;  %4330 = vmatmul.mubr.msk.f32.gmra.mrb[74].mxu1 %vm293_vm0, %v182_v25 }
  0xa1   :  { %1354 = vmatprep.mubr.f32.mxu0 %v4766_v3  ;;  %2122 = vmatprep.mubr.f32.mxu1 %v4766_v3 }
  0xa4   :  { %4203 = vmatmul.mubr.msk.f32.gmra.mrb[76].mxu0 %vm293_vm0, %v55_v26  ;;  %4331 = vmatmul.mubr.msk.f32.gmra.mrb[76].mxu1 %vm293_vm0, %v183_v27 }
  0xa5   :  { %1360 = vmatprep.mubr.f32.mxu0 %v4766_v3  ;;  %2128 = vmatprep.mubr.f32.mxu1 %v4766_v3 }
  0xa8   :  { %4204 = vmatmul.mubr.msk.f32.gmra.mrb[78].mxu0 %vm293_vm0, %v56_v28  ;;  %4332 = vmatmul.mubr.msk.f32.gmra.mrb[78].mxu1 %vm293_vm0, %v184_v29 }
  0xa9   :  { %1366 = vmatprep.mubr.f32.mxu0 %v4766_v3  ;;  %2134 = vmatprep.mubr.f32.mxu1 %v4766_v3 }
  0xac   :  { %4205 = vmatmul.mubr.msk.f32.gmra.mrb[80].mxu0 %vm293_vm0, %v57_v30  ;;  %4333 = vmatmul.mubr.msk.f32.gmra.mrb[80].mxu1 %vm293_vm0, %v185_v31  ;;  %v73_v30 = vld [vmem:[%s6889_s0 + $0x1c0] sm:$0xff] }
  0xad   :  { %1372 = vmatprep.mubr.f32.mxu0 %v4766_v3  ;;  %2140 = vmatprep.mubr.f32.mxu1 %v4766_v3  ;;  %v201_v31 = vld [vmem:[%s6889_s0 + $0x5c0] sm:$0xff] }
  0xb0   :  { %4206 = vmatmul.mubr.msk.f32.gmra.mrb[82].mxu0 %vm293_vm0, %v58_v32  ;;  %4334 = vmatmul.mubr.msk.f32.gmra.mrb[82].mxu1 %vm293_vm0, %v186_v33 }
  0xb1   :  { %1378 = vmatprep.mubr.f32.mxu0 %v4766_v3  ;;  %2146 = vmatprep.mubr.f32.mxu1 %v4766_v3 }
  0xb4   :  { %4207 = vmatmul.mubr.msk.f32.gmra.mrb[84].mxu0 %vm293_vm0, %v59_v34  ;;  %4335 = vmatmul.mubr.msk.f32.gmra.mrb[84].mxu1 %vm293_vm0, %v187_v35 }
  0xb5   :  { %1384 = vmatprep.mubr.f32.mxu0 %v4766_v3  ;;  %2152 = vmatprep.mubr.f32.mxu1 %v4766_v3 }
  0xb8   :  { %4208 = vmatmul.mubr.msk.f32.gmra.mrb[86].mxu0 %vm293_vm0, %v60_v36  ;;  %4336 = vmatmul.mubr.msk.f32.gmra.mrb[86].mxu1 %vm293_vm0, %v188_v37 }
  0xb9   :  { %1390 = vmatprep.mubr.f32.mxu0 %v4766_v3  ;;  %2158 = vmatprep.mubr.f32.mxu1 %v4766_v3 }
  0xbc   :  { %4209 = vmatmul.mubr.msk.f32.gmra.mrb[88].mxu0 %vm293_vm0, %v61_v38  ;;  %4337 = vmatmul.mubr.msk.f32.gmra.mrb[88].mxu1 %vm293_vm0, %v189_v39 }
  0xbd   :  { %1396 = vmatprep.mubr.f32.mxu0 %v4766_v3  ;;  %2164 = vmatprep.mubr.f32.mxu1 %v4766_v3 }
  0xc0   :  { %4210 = vmatmul.mubr.msk.f32.gmra.mrb[90].mxu0 %vm293_vm0, %v62_v40  ;;  %4338 = vmatmul.mubr.msk.f32.gmra.mrb[90].mxu1 %vm293_vm0, %v190_v41  ;;  %v74_v40 = vld [vmem:[%s6889_s0 + $0x1c8] sm:$0xff] }
  0xc1   :  { %1402 = vmatprep.mubr.f32.mxu0 %v4766_v3  ;;  %2170 = vmatprep.mubr.f32.mxu1 %v4766_v3  ;;  %v202_v41 = vld [vmem:[%s6889_s0 + $0x5c8] sm:$0xff] }
  0xc4   :  { %4211 = vmatmul.mubr.msk.f32.gmra.mrb[92].mxu0 %vm293_vm0, %v63_v42  ;;  %4339 = vmatmul.mubr.msk.f32.gmra.mrb[92].mxu1 %vm293_vm0, %v191_v43 }
  0xc5   :  { %1408 = vmatprep.mubr.f32.mxu0 %v4766_v3  ;;  %2176 = vmatprep.mubr.f32.mxu1 %v4766_v3 }
  0xc8   :  { %4212 = vmatmul.mubr.msk.f32.gmra.mrb[94].mxu0 %vm293_vm0, %v64_v44  ;;  %4340 = vmatmul.mubr.msk.f32.gmra.mrb[94].mxu1 %vm293_vm0, %v192_v45 }
  0xc9   :  { %1414 = vmatprep.mubr.f32.mxu0 %v4766_v3  ;;  %2182 = vmatprep.mubr.f32.mxu1 %v4766_v3 }
  0xcc   :  { %4213 = vmatmul.mubr.msk.f32.gmra.mrb[96].mxu0 %vm293_vm0, %v65_v46  ;;  %4341 = vmatmul.mubr.msk.f32.gmra.mrb[96].mxu1 %vm293_vm0, %v193_v47 }
  0xcd   :  { %1420 = vmatprep.mubr.f32.mxu0 %v4766_v3  ;;  %2188 = vmatprep.mubr.f32.mxu1 %v4766_v3 }
  0xd0   :  { %4214 = vmatmul.mubr.msk.f32.gmra.mrb[98].mxu0 %vm293_vm0, %v66_v48  ;;  %4342 = vmatmul.mubr.msk.f32.gmra.mrb[98].mxu1 %vm293_vm0, %v194_v49 }
  0xd1   :  { %1426 = vmatprep.mubr.f32.mxu0 %v4766_v3  ;;  %2194 = vmatprep.mubr.f32.mxu1 %v4766_v3 }
  0xd4   :  { %4215 = vmatmul.mubr.msk.f32.gmra.mrb[100].mxu0 %vm293_vm0, %v67_v51  ;;  %4343 = vmatmul.mubr.msk.f32.gmra.mrb[100].mxu1 %vm293_vm0, %v195_v52  ;;  %v203_v51 = vld [vmem:[%s6889_s0 + $0x5d0] sm:$0xff] }
  0xd5   :  { %1432 = vmatprep.mubr.f32.mxu0 %v4766_v3  ;;  %2200 = vmatprep.mubr.f32.mxu1 %v4766_v3 }
  0xd8   :  { %4216 = vmatmul.mubr.msk.f32.gmra.mrb[102].mxu0 %vm293_vm0, %v68_v54  ;;  %4344 = vmatmul.mubr.msk.f32.gmra.mrb[102].mxu1 %vm293_vm0, %v196_v55 }
  0xd9   :  { %1438 = vmatprep.mubr.f32.mxu0 %v4766_v3  ;;  %2206 = vmatprep.mubr.f32.mxu1 %v4766_v3 }
  0xdc   :  { %4217 = vmatmul.mubr.msk.f32.gmra.mrb[104].mxu0 %vm293_vm0, %v69_v57  ;;  %4345 = vmatmul.mubr.msk.f32.gmra.mrb[104].mxu1 %vm293_vm0, %v197_v58 }
  0xdd   :  { %1444 = vmatprep.mubr.f32.mxu0 %v4766_v3  ;;  %2212 = vmatprep.mubr.f32.mxu1 %v4766_v3 }
  0xdf   :  { %v1128_v1 = vpop.f32.mrb[0].mxu0  ;;  %v1896_v2 = vpop.f32.mrb[0].mxu1 }
  0xe0   :  { %v1129_v4 = vadd.f32 %v1128_v1, %v5351_v61  ;;  %v1897_v5 = vadd.f32 %v1896_v2, %v5351_v61  ;;  %v1130_v6 = vpop.f32.mrb[1].mxu0  ;;  %4218 = vmatmul.mubr.msk.f32.gmra.mrb[106].mxu0 %vm293_vm0, %v70_v63  ;;  %v1898_v7 = vpop.f32.mrb[1].mxu1  ;;  %4346 = vmatmul.mubr.msk.f32.gmra.mrb[106].mxu1 %vm293_vm0, %v198_v0  ;;  %v204_v63 = vld [vmem:[%s6889_s0 + $0x5d8] sm:$0xff] }
  0xe1   :  { %v1131_v8 = vadd.f32 %v1130_v6, %v5355_v62  ;;  %v1899_v9 = vadd.f32 %v1898_v7, %v5355_v62  ;;  %1450 = vmatprep.mubr.f32.mxu0 %v4766_v3  ;;  %2218 = vmatprep.mubr.f32.mxu1 %v4766_v3 }
  0xe2   :  { %2663 = vst [vmem:[#allocation2] sm:$0xff] %v1129_v4  ;;  %2919 = vst [vmem:[#allocation2 + $0x800] sm:$0xff] %v1897_v5 }
  0xe3   :  { %2664 = vst [vmem:[#allocation2 + $0x8] sm:$0xff] %v1131_v8  ;;  %2920 = vst [vmem:[#allocation2 + $0x808] sm:$0xff] %v1899_v9  ;;  %v1134_v12 = vpop.f32.mrb[2].mxu0  ;;  %v1902_v13 = vpop.f32.mrb[2].mxu1  ;;  %v77_v9 = vld [vmem:[%s6889_s0 + $0x1e0] sm:$0xff] }
  0xe4   :  { %v1135_v14 = vadd.f32 %v1134_v12, %v5351_v61  ;;  %v1903_v15 = vadd.f32 %v1902_v13, %v5351_v61  ;;  %v1136_v16 = vpop.f32.mrb[3].mxu0  ;;  %4219 = vmatmul.mubr.msk.f32.gmra.mrb[108].mxu0 %vm293_vm0, %v71_v10  ;;  %v1904_v17 = vpop.f32.mrb[3].mxu1  ;;  %4347 = vmatmul.mubr.msk.f32.gmra.mrb[108].mxu1 %vm293_vm0, %v199_v11  ;;  %v205_v10 = vld [vmem:[%s6889_s0 + $0x5e0] sm:$0xff] }
  0xe5   :  { %v1137_v18 = vadd.f32 %v1136_v16, %v5355_v62  ;;  %v1905_v19 = vadd.f32 %v1904_v17, %v5355_v62  ;;  %1456 = vmatprep.mubr.f32.mxu0 %v4766_v3  ;;  %2224 = vmatprep.mubr.f32.mxu1 %v4766_v3 }
  0xe6   :  { %2665 = vst [vmem:[#allocation2 + $0x10] sm:$0xff] %v1135_v14  ;;  %2921 = vst [vmem:[#allocation2 + $0x810] sm:$0xff] %v1903_v15 }
  0xe7   :  { %2666 = vst [vmem:[#allocation2 + $0x18] sm:$0xff] %v1137_v18  ;;  %2922 = vst [vmem:[#allocation2 + $0x818] sm:$0xff] %v1905_v19  ;;  %v1140_v22 = vpop.f32.mrb[4].mxu0  ;;  %v1908_v23 = vpop.f32.mrb[4].mxu1  ;;  %v78_v19 = vld [vmem:[%s6889_s0 + $0x1e8] sm:$0xff] }
  0xe8   :  { %v1141_v24 = vadd.f32 %v1140_v22, %v5351_v61  ;;  %v1909_v25 = vadd.f32 %v1908_v23, %v5351_v61  ;;  %v1142_v26 = vpop.f32.mrb[5].mxu0  ;;  %4220 = vmatmul.mubr.msk.f32.gmra.mrb[110].mxu0 %vm293_vm0, %v72_v20  ;;  %v1910_v27 = vpop.f32.mrb[5].mxu1  ;;  %4348 = vmatmul.mubr.msk.f32.gmra.mrb[110].mxu1 %vm293_vm0, %v200_v21  ;;  %v206_v20 = vld [vmem:[%s6889_s0 + $0x5e8] sm:$0xff] }
  0xe9   :  { %v1143_v28 = vadd.f32 %v1142_v26, %v5355_v62  ;;  %v1911_v29 = vadd.f32 %v1910_v27, %v5355_v62  ;;  %1462 = vmatprep.mubr.f32.mxu0 %v4766_v3  ;;  %2230 = vmatprep.mubr.f32.mxu1 %v4766_v3 }
  0xea   :  { %2667 = vst [vmem:[#allocation2 + $0x20] sm:$0xff] %v1141_v24  ;;  %2923 = vst [vmem:[#allocation2 + $0x820] sm:$0xff] %v1909_v25 }
  0xeb   :  { %2668 = vst [vmem:[#allocation2 + $0x28] sm:$0xff] %v1143_v28  ;;  %2924 = vst [vmem:[#allocation2 + $0x828] sm:$0xff] %v1911_v29  ;;  %v1146_v32 = vpop.f32.mrb[6].mxu0  ;;  %v1914_v33 = vpop.f32.mrb[6].mxu1  ;;  %v79_v29 = vld [vmem:[%s6889_s0 + $0x1f0] sm:$0xff] }
  0xec   :  { %v1147_v34 = vadd.f32 %v1146_v32, %v5351_v61  ;;  %v1915_v35 = vadd.f32 %v1914_v33, %v5351_v61  ;;  %v1148_v36 = vpop.f32.mrb[7].mxu0  ;;  %4221 = vmatmul.mubr.msk.f32.gmra.mrb[112].mxu0 %vm293_vm0, %v73_v30  ;;  %v1916_v37 = vpop.f32.mrb[7].mxu1  ;;  %4349 = vmatmul.mubr.msk.f32.gmra.mrb[112].mxu1 %vm293_vm0, %v201_v31  ;;  %v207_v30 = vld [vmem:[%s6889_s0 + $0x5f0] sm:$0xff] }
  0xed   :  { %v1149_v38 = vadd.f32 %v1148_v36, %v5355_v62  ;;  %v1917_v39 = vadd.f32 %v1916_v37, %v5355_v62  ;;  %1468 = vmatprep.mubr.f32.mxu0 %v4766_v3  ;;  %2236 = vmatprep.mubr.f32.mxu1 %v4766_v3 }
  0xee   :  { %2669 = vst [vmem:[#allocation2 + $0x30] sm:$0xff] %v1147_v34  ;;  %2925 = vst [vmem:[#allocation2 + $0x830] sm:$0xff] %v1915_v35 }
  0xef   :  { %2670 = vst [vmem:[#allocation2 + $0x38] sm:$0xff] %v1149_v38  ;;  %2926 = vst [vmem:[#allocation2 + $0x838] sm:$0xff] %v1917_v39  ;;  %v1152_v42 = vpop.f32.mrb[8].mxu0  ;;  %v1920_v43 = vpop.f32.mrb[8].mxu1  ;;  %v80_v39 = vld [vmem:[%s6889_s0 + $0x1f8] sm:$0xff] }
  0xf0   :  { %v1153_v44 = vadd.f32 %v1152_v42, %v5351_v61  ;;  %v1921_v45 = vadd.f32 %v1920_v43, %v5351_v61  ;;  %v1154_v46 = vpop.f32.mrb[9].mxu0  ;;  %4222 = vmatmul.mubr.msk.f32.gmra.mrb[114].mxu0 %vm293_vm0, %v74_v40  ;;  %v1922_v47 = vpop.f32.mrb[9].mxu1  ;;  %4350 = vmatmul.mubr.msk.f32.gmra.mrb[114].mxu1 %vm293_vm0, %v202_v41  ;;  %v208_v40 = vld [vmem:[%s6889_s0 + $0x5f8] sm:$0xff] }
  0xf1   :  { %v1155_v48 = vadd.f32 %v1154_v46, %v5355_v62  ;;  %v1923_v49 = vadd.f32 %v1922_v47, %v5355_v62  ;;  %1474 = vmatprep.mubr.f32.mxu0 %v4766_v3  ;;  %2242 = vmatprep.mubr.f32.mxu1 %v4766_v3 }
  0xf2   :  { %2671 = vst [vmem:[#allocation2 + $0x40] sm:$0xff] %v1153_v44  ;;  %2927 = vst [vmem:[#allocation2 + $0x840] sm:$0xff] %v1921_v45 }
  0xf3   :  { %2672 = vst [vmem:[#allocation2 + $0x48] sm:$0xff] %v1155_v48  ;;  %2928 = vst [vmem:[#allocation2 + $0x848] sm:$0xff] %v1923_v49  ;;  %v1158_v52 = vpop.f32.mrb[10].mxu0  ;;  %v1926_v53 = vpop.f32.mrb[10].mxu1  ;;  %v81_v49 = vld [vmem:[%s6889_s0 + $0x200] sm:$0xff] }
  0xf4   :  { %v1159_v54 = vadd.f32 %v1158_v52, %v5351_v61  ;;  %v1927_v55 = vadd.f32 %v1926_v53, %v5351_v61  ;;  %v1160_v56 = vpop.f32.mrb[11].mxu0  ;;  %4223 = vmatmul.mubr.msk.f32.gmra.mrb[116].mxu0 %vm293_vm0, %v75_v50  ;;  %v1928_v57 = vpop.f32.mrb[11].mxu1  ;;  %4351 = vmatmul.mubr.msk.f32.gmra.mrb[116].mxu1 %vm293_vm0, %v203_v51  ;;  %v209_v50 = vld [vmem:[%s6889_s0 + $0x600] sm:$0xff] }
  0xf5   :  { %v1161_v58 = vadd.f32 %v1160_v56, %v5355_v62  ;;  %v1929_v59 = vadd.f32 %v1928_v57, %v5355_v62  ;;  %1480 = vmatprep.mubr.f32.mxu0 %v4766_v3  ;;  %2248 = vmatprep.mubr.f32.mxu1 %v4766_v3 }
  0xf6   :  { %2673 = vst [vmem:[#allocation2 + $0x50] sm:$0xff] %v1159_v54  ;;  %2929 = vst [vmem:[#allocation2 + $0x850] sm:$0xff] %v1927_v55 }
  0xf7   :  { %2674 = vst [vmem:[#allocation2 + $0x58] sm:$0xff] %v1161_v58  ;;  %2930 = vst [vmem:[#allocation2 + $0x858] sm:$0xff] %v1929_v59  ;;  %v1164_v0 = vpop.f32.mrb[12].mxu0  ;;  %v1932_v1 = vpop.f32.mrb[12].mxu1  ;;  %v82_v59 = vld [vmem:[%s6889_s0 + $0x208] sm:$0xff] }
  0xf8   :  { %v1165_v2 = vadd.f32 %v1164_v0, %v5351_v61  ;;  %v1933_v4 = vadd.f32 %v1932_v1, %v5351_v61  ;;  %v1166_v5 = vpop.f32.mrb[13].mxu0  ;;  %4224 = vmatmul.mubr.msk.f32.gmra.mrb[118].mxu0 %vm293_vm0, %v76_v60  ;;  %v1934_v6 = vpop.f32.mrb[13].mxu1  ;;  %4352 = vmatmul.mubr.msk.f32.gmra.mrb[118].mxu1 %vm293_vm0, %v204_v63  ;;  %v210_v60 = vld [vmem:[%s6889_s0 + $0x608] sm:$0xff] }
  0xf9   :  { %v1167_v7 = vadd.f32 %v1166_v5, %v5355_v62  ;;  %v1935_v8 = vadd.f32 %v1934_v6, %v5355_v62  ;;  %1486 = vmatprep.mubr.f32.mxu0 %v4766_v3  ;;  %2254 = vmatprep.mubr.f32.mxu1 %v4766_v3 }
  0xfa   :  { %2675 = vst [vmem:[#allocation2 + $0x60] sm:$0xff] %v1165_v2  ;;  %2931 = vst [vmem:[#allocation2 + $0x860] sm:$0xff] %v1933_v4 }
  0xfb   :  { %2676 = vst [vmem:[#allocation2 + $0x68] sm:$0xff] %v1167_v7  ;;  %2932 = vst [vmem:[#allocation2 + $0x868] sm:$0xff] %v1935_v8  ;;  %v1170_v11 = vpop.f32.mrb[14].mxu0  ;;  %v1938_v12 = vpop.f32.mrb[14].mxu1  ;;  %v83_v8 = vld [vmem:[%s6889_s0 + $0x210] sm:$0xff] }
  0xfc   :  { %v1171_v13 = vadd.f32 %v1170_v11, %v5351_v61  ;;  %v1939_v14 = vadd.f32 %v1938_v12, %v5351_v61  ;;  %v1172_v15 = vpop.f32.mrb[15].mxu0  ;;  %4225 = vmatmul.mubr.msk.f32.gmra.mrb[120].mxu0 %vm293_vm0, %v77_v9  ;;  %v1940_v16 = vpop.f32.mrb[15].mxu1  ;;  %4353 = vmatmul.mubr.msk.f32.gmra.mrb[120].mxu1 %vm293_vm0, %v205_v10  ;;  %v211_v9 = vld [vmem:[%s6889_s0 + $0x610] sm:$0xff] }
  0xfd   :  { %v1173_v17 = vadd.f32 %v1172_v15, %v5355_v62  ;;  %v1941_v18 = vadd.f32 %v1940_v16, %v5355_v62  ;;  %1492 = vmatprep.mubr.f32.mxu0 %v4766_v3  ;;  %2260 = vmatprep.mubr.f32.mxu1 %v4766_v3 }
  0xfe   :  { %2677 = vst [vmem:[#allocation2 + $0x70] sm:$0xff] %v1171_v13  ;;  %2933 = vst [vmem:[#allocation2 + $0x870] sm:$0xff] %v1939_v14 }
  0xff   :  { %2678 = vst [vmem:[#allocation2 + $0x78] sm:$0xff] %v1173_v17  ;;  %2934 = vst [vmem:[#allocation2 + $0x878] sm:$0xff] %v1941_v18  ;;  %v1176_v21 = vpop.f32.mrb[16].mxu0  ;;  %v1944_v22 = vpop.f32.mrb[16].mxu1  ;;  %v84_v18 = vld [vmem:[%s6889_s0 + $0x218] sm:$0xff] }
 0x100   :  { %v1177_v23 = vadd.f32 %v1176_v21, %v5351_v61  ;;  %v1945_v24 = vadd.f32 %v1944_v22, %v5351_v61  ;;  %v1178_v25 = vpop.f32.mrb[17].mxu0  ;;  %4226 = vmatmul.mubr.msk.f32.gmra.mrb[122].mxu0 %vm293_vm0, %v78_v19  ;;  %v1946_v26 = vpop.f32.mrb[17].mxu1  ;;  %4354 = vmatmul.mubr.msk.f32.gmra.mrb[122].mxu1 %vm293_vm0, %v206_v20  ;;  %v212_v19 = vld [vmem:[%s6889_s0 + $0x618] sm:$0xff] }
 0x101   :  { %v1179_v27 = vadd.f32 %v1178_v25, %v5355_v62  ;;  %v1947_v28 = vadd.f32 %v1946_v26, %v5355_v62  ;;  %1498 = vmatprep.mubr.f32.mxu0 %v4766_v3  ;;  %2266 = vmatprep.mubr.f32.mxu1 %v4766_v3 }
 0x102   :  { %2679 = vst [vmem:[#allocation2 + $0x80] sm:$0xff] %v1177_v23  ;;  %2935 = vst [vmem:[#allocation2 + $0x880] sm:$0xff] %v1945_v24 }
 0x103   :  { %2680 = vst [vmem:[#allocation2 + $0x88] sm:$0xff] %v1179_v27  ;;  %2936 = vst [vmem:[#allocation2 + $0x888] sm:$0xff] %v1947_v28  ;;  %v1182_v31 = vpop.f32.mrb[18].mxu0  ;;  %v1950_v32 = vpop.f32.mrb[18].mxu1  ;;  %v85_v28 = vld [vmem:[%s6889_s0 + $0x220] sm:$0xff] }
 0x104   :  { %v1183_v33 = vadd.f32 %v1182_v31, %v5351_v61  ;;  %v1951_v34 = vadd.f32 %v1950_v32, %v5351_v61  ;;  %v1184_v35 = vpop.f32.mrb[19].mxu0  ;;  %4227 = vmatmul.mubr.msk.f32.gmra.mrb[124].mxu0 %vm293_vm0, %v79_v29  ;;  %v1952_v36 = vpop.f32.mrb[19].mxu1  ;;  %4355 = vmatmul.mubr.msk.f32.gmra.mrb[124].mxu1 %vm293_vm0, %v207_v30  ;;  %v213_v29 = vld [vmem:[%s6889_s0 + $0x620] sm:$0xff] }
 0x105   :  { %v1185_v37 = vadd.f32 %v1184_v35, %v5355_v62  ;;  %v1953_v38 = vadd.f32 %v1952_v36, %v5355_v62  ;;  %1504 = vmatprep.mubr.f32.mxu0 %v4766_v3  ;;  %2272 = vmatprep.mubr.f32.mxu1 %v4766_v3 }
 0x106   :  { %2681 = vst [vmem:[#allocation2 + $0x90] sm:$0xff] %v1183_v33  ;;  %2937 = vst [vmem:[#allocation2 + $0x890] sm:$0xff] %v1951_v34 }
 0x107   :  { %2682 = vst [vmem:[#allocation2 + $0x98] sm:$0xff] %v1185_v37  ;;  %2938 = vst [vmem:[#allocation2 + $0x898] sm:$0xff] %v1953_v38  ;;  %v1188_v41 = vpop.f32.mrb[20].mxu0  ;;  %v1956_v42 = vpop.f32.mrb[20].mxu1  ;;  %v86_v38 = vld [vmem:[%s6889_s0 + $0x228] sm:$0xff] }
 0x108   :  { %v1189_v43 = vadd.f32 %v1188_v41, %v5351_v61  ;;  %v1957_v44 = vadd.f32 %v1956_v42, %v5351_v61  ;;  %v1190_v45 = vpop.f32.mrb[21].mxu0  ;;  %4228 = vmatmul.mubr.msk.f32.gmra.mrb[126].mxu0 %vm293_vm0, %v80_v39  ;;  %v1958_v46 = vpop.f32.mrb[21].mxu1  ;;  %4356 = vmatmul.mubr.msk.f32.gmra.mrb[126].mxu1 %vm293_vm0, %v208_v40  ;;  %v214_v39 = vld [vmem:[%s6889_s0 + $0x628] sm:$0xff] }
 0x109   :  { %v1191_v47 = vadd.f32 %v1190_v45, %v5355_v62  ;;  %v1959_v48 = vadd.f32 %v1958_v46, %v5355_v62  ;;  %1510 = vmatprep.mubr.f32.mxu0 %v4766_v3  ;;  %2278 = vmatprep.mubr.f32.mxu1 %v4766_v3 }
 0x10a   :  { %2683 = vst [vmem:[#allocation2 + $0xa0] sm:$0xff] %v1189_v43  ;;  %2939 = vst [vmem:[#allocation2 + $0x8a0] sm:$0xff] %v1957_v44 }
 0x10b   :  { %2684 = vst [vmem:[#allocation2 + $0xa8] sm:$0xff] %v1191_v47  ;;  %2940 = vst [vmem:[#allocation2 + $0x8a8] sm:$0xff] %v1959_v48  ;;  %v1194_v51 = vpop.f32.mrb[22].mxu0  ;;  %v1962_v52 = vpop.f32.mrb[22].mxu1  ;;  %v87_v48 = vld [vmem:[%s6889_s0 + $0x230] sm:$0xff] }
 0x10c   :  { %v1195_v53 = vadd.f32 %v1194_v51, %v5351_v61  ;;  %v1963_v54 = vadd.f32 %v1962_v52, %v5351_v61  ;;  %v1196_v55 = vpop.f32.mrb[23].mxu0  ;;  %4229 = vmatmul.mubr.msk.f32.gmra.mrb[128].mxu0 %vm293_vm0, %v81_v49  ;;  %v1964_v56 = vpop.f32.mrb[23].mxu1  ;;  %4357 = vmatmul.mubr.msk.f32.gmra.mrb[128].mxu1 %vm293_vm0, %v209_v50  ;;  %v215_v49 = vld [vmem:[%s6889_s0 + $0x630] sm:$0xff] }
 0x10d   :  { %v1197_v57 = vadd.f32 %v1196_v55, %v5355_v62  ;;  %v1965_v58 = vadd.f32 %v1964_v56, %v5355_v62  ;;  %1516 = vmatprep.mubr.f32.mxu0 %v4766_v3  ;;  %2284 = vmatprep.mubr.f32.mxu1 %v4766_v3 }
 0x10e   :  { %2685 = vst [vmem:[#allocation2 + $0xb0] sm:$0xff] %v1195_v53  ;;  %2941 = vst [vmem:[#allocation2 + $0x8b0] sm:$0xff] %v1963_v54 }
 0x10f   :  { %2686 = vst [vmem:[#allocation2 + $0xb8] sm:$0xff] %v1197_v57  ;;  %2942 = vst [vmem:[#allocation2 + $0x8b8] sm:$0xff] %v1965_v58  ;;  %v1200_v63 = vpop.f32.mrb[24].mxu0  ;;  %v1968_v0 = vpop.f32.mrb[24].mxu1  ;;  %v88_v58 = vld [vmem:[%s6889_s0 + $0x238] sm:$0xff] }
 0x110   :  { %v1201_v1 = vadd.f32 %v1200_v63, %v5351_v61  ;;  %v1969_v2 = vadd.f32 %v1968_v0, %v5351_v61  ;;  %v1202_v4 = vpop.f32.mrb[25].mxu0  ;;  %4230 = vmatmul.mubr.msk.f32.gmra.mrb[130].mxu0 %vm293_vm0, %v82_v59  ;;  %v1970_v5 = vpop.f32.mrb[25].mxu1  ;;  %4358 = vmatmul.mubr.msk.f32.gmra.mrb[130].mxu1 %vm293_vm0, %v210_v60  ;;  %v216_v59 = vld [vmem:[%s6889_s0 + $0x638] sm:$0xff] }
 0x111   :  { %v1203_v6 = vadd.f32 %v1202_v4, %v5355_v62  ;;  %v1971_v7 = vadd.f32 %v1970_v5, %v5355_v62  ;;  %1522 = vmatprep.mubr.f32.mxu0 %v4766_v3  ;;  %2290 = vmatprep.mubr.f32.mxu1 %v4766_v3 }
 0x112   :  { %2687 = vst [vmem:[#allocation2 + $0xc0] sm:$0xff] %v1201_v1  ;;  %2943 = vst [vmem:[#allocation2 + $0x8c0] sm:$0xff] %v1969_v2 }
 0x113   :  { %2688 = vst [vmem:[#allocation2 + $0xc8] sm:$0xff] %v1203_v6  ;;  %2944 = vst [vmem:[#allocation2 + $0x8c8] sm:$0xff] %v1971_v7  ;;  %v1206_v10 = vpop.f32.mrb[26].mxu0  ;;  %v1974_v11 = vpop.f32.mrb[26].mxu1  ;;  %v89_v7 = vld [vmem:[%s6889_s0 + $0x240] sm:$0xff] }
 0x114   :  { %v1207_v12 = vadd.f32 %v1206_v10, %v5351_v61  ;;  %v1975_v13 = vadd.f32 %v1974_v11, %v5351_v61  ;;  %v1208_v14 = vpop.f32.mrb[27].mxu0  ;;  %4231 = vmatmul.mubr.msk.f32.gmra.mrb[132].mxu0 %vm293_vm0, %v83_v8  ;;  %v1976_v15 = vpop.f32.mrb[27].mxu1  ;;  %4359 = vmatmul.mubr.msk.f32.gmra.mrb[132].mxu1 %vm293_vm0, %v211_v9  ;;  %v217_v8 = vld [vmem:[%s6889_s0 + $0x640] sm:$0xff] }
 0x115   :  { %v1209_v16 = vadd.f32 %v1208_v14, %v5355_v62  ;;  %v1977_v17 = vadd.f32 %v1976_v15, %v5355_v62  ;;  %1528 = vmatprep.mubr.f32.mxu0 %v4766_v3  ;;  %2296 = vmatprep.mubr.f32.mxu1 %v4766_v3 }
 0x116   :  { %2689 = vst [vmem:[#allocation2 + $0xd0] sm:$0xff] %v1207_v12  ;;  %2945 = vst [vmem:[#allocation2 + $0x8d0] sm:$0xff] %v1975_v13 }
 0x117   :  { %2690 = vst [vmem:[#allocation2 + $0xd8] sm:$0xff] %v1209_v16  ;;  %2946 = vst [vmem:[#allocation2 + $0x8d8] sm:$0xff] %v1977_v17  ;;  %v1212_v20 = vpop.f32.mrb[28].mxu0  ;;  %v1980_v21 = vpop.f32.mrb[28].mxu1  ;;  %v90_v17 = vld [vmem:[%s6889_s0 + $0x248] sm:$0xff] }
 0x118   :  { %v1213_v22 = vadd.f32 %v1212_v20, %v5351_v61  ;;  %v1981_v23 = vadd.f32 %v1980_v21, %v5351_v61  ;;  %v1214_v24 = vpop.f32.mrb[29].mxu0  ;;  %4232 = vmatmul.mubr.msk.f32.gmra.mrb[134].mxu0 %vm293_vm0, %v84_v18  ;;  %v1982_v25 = vpop.f32.mrb[29].mxu1  ;;  %4360 = vmatmul.mubr.msk.f32.gmra.mrb[134].mxu1 %vm293_vm0, %v212_v19  ;;  %v218_v18 = vld [vmem:[%s6889_s0 + $0x648] sm:$0xff] }
 0x119   :  { %v1215_v26 = vadd.f32 %v1214_v24, %v5355_v62  ;;  %v1983_v27 = vadd.f32 %v1982_v25, %v5355_v62  ;;  %1534 = vmatprep.mubr.f32.mxu0 %v4766_v3  ;;  %2302 = vmatprep.mubr.f32.mxu1 %v4766_v3 }
 0x11a   :  { %2691 = vst [vmem:[#allocation2 + $0xe0] sm:$0xff] %v1213_v22  ;;  %2947 = vst [vmem:[#allocation2 + $0x8e0] sm:$0xff] %v1981_v23 }
 0x11b   :  { %2692 = vst [vmem:[#allocation2 + $0xe8] sm:$0xff] %v1215_v26  ;;  %2948 = vst [vmem:[#allocation2 + $0x8e8] sm:$0xff] %v1983_v27  ;;  %v1218_v30 = vpop.f32.mrb[30].mxu0  ;;  %v1986_v31 = vpop.f32.mrb[30].mxu1  ;;  %v91_v27 = vld [vmem:[%s6889_s0 + $0x250] sm:$0xff] }
 0x11c   :  { %v1219_v32 = vadd.f32 %v1218_v30, %v5351_v61  ;;  %v1987_v33 = vadd.f32 %v1986_v31, %v5351_v61  ;;  %v1220_v34 = vpop.f32.mrb[31].mxu0  ;;  %4233 = vmatmul.mubr.msk.f32.gmra.mrb[136].mxu0 %vm293_vm0, %v85_v28  ;;  %v1988_v35 = vpop.f32.mrb[31].mxu1  ;;  %4361 = vmatmul.mubr.msk.f32.gmra.mrb[136].mxu1 %vm293_vm0, %v213_v29  ;;  %v219_v28 = vld [vmem:[%s6889_s0 + $0x650] sm:$0xff] }
 0x11d   :  { %v1221_v36 = vadd.f32 %v1220_v34, %v5355_v62  ;;  %v1989_v37 = vadd.f32 %v1988_v35, %v5355_v62  ;;  %1540 = vmatprep.mubr.f32.mxu0 %v4766_v3  ;;  %2308 = vmatprep.mubr.f32.mxu1 %v4766_v3 }
 0x11e   :  { %2693 = vst [vmem:[#allocation2 + $0xf0] sm:$0xff] %v1219_v32  ;;  %2949 = vst [vmem:[#allocation2 + $0x8f0] sm:$0xff] %v1987_v33 }
 0x11f   :  { %2694 = vst [vmem:[#allocation2 + $0xf8] sm:$0xff] %v1221_v36  ;;  %2950 = vst [vmem:[#allocation2 + $0x8f8] sm:$0xff] %v1989_v37  ;;  %v1224_v40 = vpop.f32.mrb[32].mxu0  ;;  %v1992_v41 = vpop.f32.mrb[32].mxu1  ;;  %v92_v37 = vld [vmem:[%s6889_s0 + $0x258] sm:$0xff] }
 0x120   :  { %v1225_v42 = vadd.f32 %v1224_v40, %v5351_v61  ;;  %v1993_v43 = vadd.f32 %v1992_v41, %v5351_v61  ;;  %v1226_v44 = vpop.f32.mrb[33].mxu0  ;;  %4234 = vmatmul.mubr.msk.f32.gmra.mrb[138].mxu0 %vm293_vm0, %v86_v38  ;;  %v1994_v45 = vpop.f32.mrb[33].mxu1  ;;  %4362 = vmatmul.mubr.msk.f32.gmra.mrb[138].mxu1 %vm293_vm0, %v214_v39  ;;  %v220_v38 = vld [vmem:[%s6889_s0 + $0x658] sm:$0xff] }
 0x121   :  { %v1227_v46 = vadd.f32 %v1226_v44, %v5355_v62  ;;  %v1995_v47 = vadd.f32 %v1994_v45, %v5355_v62  ;;  %1546 = vmatprep.mubr.f32.mxu0 %v4766_v3  ;;  %2314 = vmatprep.mubr.f32.mxu1 %v4766_v3 }
 0x122   :  { %2695 = vst [vmem:[#allocation2 + $0x100] sm:$0xff] %v1225_v42  ;;  %2951 = vst [vmem:[#allocation2 + $0x900] sm:$0xff] %v1993_v43 }
 0x123   :  { %2696 = vst [vmem:[#allocation2 + $0x108] sm:$0xff] %v1227_v46  ;;  %2952 = vst [vmem:[#allocation2 + $0x908] sm:$0xff] %v1995_v47  ;;  %v1230_v50 = vpop.f32.mrb[34].mxu0  ;;  %v1998_v51 = vpop.f32.mrb[34].mxu1  ;;  %v93_v47 = vld [vmem:[%s6889_s0 + $0x260] sm:$0xff] }
 0x124   :  { %v1231_v52 = vadd.f32 %v1230_v50, %v5351_v61  ;;  %v1999_v53 = vadd.f32 %v1998_v51, %v5351_v61  ;;  %v1232_v54 = vpop.f32.mrb[35].mxu0  ;;  %4235 = vmatmul.mubr.msk.f32.gmra.mrb[140].mxu0 %vm293_vm0, %v87_v48  ;;  %v2000_v55 = vpop.f32.mrb[35].mxu1  ;;  %4363 = vmatmul.mubr.msk.f32.gmra.mrb[140].mxu1 %vm293_vm0, %v215_v49  ;;  %v221_v48 = vld [vmem:[%s6889_s0 + $0x660] sm:$0xff] }
 0x125   :  { %v1233_v56 = vadd.f32 %v1232_v54, %v5355_v62  ;;  %v2001_v57 = vadd.f32 %v2000_v55, %v5355_v62  ;;  %1552 = vmatprep.mubr.f32.mxu0 %v4766_v3  ;;  %2320 = vmatprep.mubr.f32.mxu1 %v4766_v3 }
 0x126   :  { %2697 = vst [vmem:[#allocation2 + $0x110] sm:$0xff] %v1231_v52  ;;  %2953 = vst [vmem:[#allocation2 + $0x910] sm:$0xff] %v1999_v53 }
 0x127   :  { %2698 = vst [vmem:[#allocation2 + $0x118] sm:$0xff] %v1233_v56  ;;  %2954 = vst [vmem:[#allocation2 + $0x918] sm:$0xff] %v2001_v57  ;;  %v1236_v60 = vpop.f32.mrb[36].mxu0  ;;  %v2004_v63 = vpop.f32.mrb[36].mxu1  ;;  %v94_v57 = vld [vmem:[%s6889_s0 + $0x268] sm:$0xff] }
 0x128   :  { %v1237_v0 = vadd.f32 %v1236_v60, %v5351_v61  ;;  %v2005_v1 = vadd.f32 %v2004_v63, %v5351_v61  ;;  %v1238_v2 = vpop.f32.mrb[37].mxu0  ;;  %4236 = vmatmul.mubr.msk.f32.gmra.mrb[142].mxu0 %vm293_vm0, %v88_v58  ;;  %v2006_v4 = vpop.f32.mrb[37].mxu1  ;;  %4364 = vmatmul.mubr.msk.f32.gmra.mrb[142].mxu1 %vm293_vm0, %v216_v59  ;;  %v222_v58 = vld [vmem:[%s6889_s0 + $0x668] sm:$0xff] }
 0x129   :  { %v1239_v5 = vadd.f32 %v1238_v2, %v5355_v62  ;;  %v2007_v6 = vadd.f32 %v2006_v4, %v5355_v62  ;;  %1558 = vmatprep.mubr.f32.mxu0 %v4766_v3  ;;  %2326 = vmatprep.mubr.f32.mxu1 %v4766_v3 }
 0x12a   :  { %2699 = vst [vmem:[#allocation2 + $0x120] sm:$0xff] %v1237_v0  ;;  %2955 = vst [vmem:[#allocation2 + $0x920] sm:$0xff] %v2005_v1 }
 0x12b   :  { %2700 = vst [vmem:[#allocation2 + $0x128] sm:$0xff] %v1239_v5  ;;  %2956 = vst [vmem:[#allocation2 + $0x928] sm:$0xff] %v2007_v6  ;;  %v1242_v9 = vpop.f32.mrb[38].mxu0  ;;  %v2010_v10 = vpop.f32.mrb[38].mxu1  ;;  %v95_v6 = vld [vmem:[%s6889_s0 + $0x270] sm:$0xff] }
 0x12c   :  { %v1243_v11 = vadd.f32 %v1242_v9, %v5351_v61  ;;  %v2011_v12 = vadd.f32 %v2010_v10, %v5351_v61  ;;  %v1244_v13 = vpop.f32.mrb[39].mxu0  ;;  %4237 = vmatmul.mubr.msk.f32.gmra.mrb[144].mxu0 %vm293_vm0, %v89_v7  ;;  %v2012_v14 = vpop.f32.mrb[39].mxu1  ;;  %4365 = vmatmul.mubr.msk.f32.gmra.mrb[144].mxu1 %vm293_vm0, %v217_v8  ;;  %v223_v7 = vld [vmem:[%s6889_s0 + $0x670] sm:$0xff] }
 0x12d   :  { %v1245_v15 = vadd.f32 %v1244_v13, %v5355_v62  ;;  %v2013_v16 = vadd.f32 %v2012_v14, %v5355_v62  ;;  %1564 = vmatprep.mubr.f32.mxu0 %v4766_v3  ;;  %2332 = vmatprep.mubr.f32.mxu1 %v4766_v3 }
 0x12e   :  { %2701 = vst [vmem:[#allocation2 + $0x130] sm:$0xff] %v1243_v11  ;;  %2957 = vst [vmem:[#allocation2 + $0x930] sm:$0xff] %v2011_v12 }
 0x12f   :  { %2702 = vst [vmem:[#allocation2 + $0x138] sm:$0xff] %v1245_v15  ;;  %2958 = vst [vmem:[#allocation2 + $0x938] sm:$0xff] %v2013_v16  ;;  %v1248_v19 = vpop.f32.mrb[40].mxu0  ;;  %v2016_v20 = vpop.f32.mrb[40].mxu1  ;;  %v96_v16 = vld [vmem:[%s6889_s0 + $0x278] sm:$0xff] }
 0x130   :  { %v1249_v21 = vadd.f32 %v1248_v19, %v5351_v61  ;;  %v2017_v22 = vadd.f32 %v2016_v20, %v5351_v61  ;;  %v1250_v23 = vpop.f32.mrb[41].mxu0  ;;  %4238 = vmatmul.mubr.msk.f32.gmra.mrb[146].mxu0 %vm293_vm0, %v90_v17  ;;  %v2018_v24 = vpop.f32.mrb[41].mxu1  ;;  %4366 = vmatmul.mubr.msk.f32.gmra.mrb[146].mxu1 %vm293_vm0, %v218_v18  ;;  %v224_v17 = vld [vmem:[%s6889_s0 + $0x678] sm:$0xff] }
 0x131   :  { %v1251_v25 = vadd.f32 %v1250_v23, %v5355_v62  ;;  %v2019_v26 = vadd.f32 %v2018_v24, %v5355_v62  ;;  %1570 = vmatprep.mubr.f32.mxu0 %v4766_v3  ;;  %2338 = vmatprep.mubr.f32.mxu1 %v4766_v3 }
 0x132   :  { %2703 = vst [vmem:[#allocation2 + $0x140] sm:$0xff] %v1249_v21  ;;  %2959 = vst [vmem:[#allocation2 + $0x940] sm:$0xff] %v2017_v22 }
 0x133   :  { %2704 = vst [vmem:[#allocation2 + $0x148] sm:$0xff] %v1251_v25  ;;  %2960 = vst [vmem:[#allocation2 + $0x948] sm:$0xff] %v2019_v26  ;;  %v1254_v29 = vpop.f32.mrb[42].mxu0  ;;  %v2022_v30 = vpop.f32.mrb[42].mxu1  ;;  %v97_v26 = vld [vmem:[%s6889_s0 + $0x280] sm:$0xff] }
 0x134   :  { %v1255_v31 = vadd.f32 %v1254_v29, %v5351_v61  ;;  %v2023_v32 = vadd.f32 %v2022_v30, %v5351_v61  ;;  %v1256_v33 = vpop.f32.mrb[43].mxu0  ;;  %4239 = vmatmul.mubr.msk.f32.gmra.mrb[148].mxu0 %vm293_vm0, %v91_v27  ;;  %v2024_v34 = vpop.f32.mrb[43].mxu1  ;;  %4367 = vmatmul.mubr.msk.f32.gmra.mrb[148].mxu1 %vm293_vm0, %v219_v28  ;;  %v225_v27 = vld [vmem:[%s6889_s0 + $0x680] sm:$0xff] }
 0x135   :  { %v1257_v35 = vadd.f32 %v1256_v33, %v5355_v62  ;;  %v2025_v36 = vadd.f32 %v2024_v34, %v5355_v62  ;;  %1576 = vmatprep.mubr.f32.mxu0 %v4766_v3  ;;  %2344 = vmatprep.mubr.f32.mxu1 %v4766_v3 }
 0x136   :  { %2705 = vst [vmem:[#allocation2 + $0x150] sm:$0xff] %v1255_v31  ;;  %2961 = vst [vmem:[#allocation2 + $0x950] sm:$0xff] %v2023_v32 }
 0x137   :  { %2706 = vst [vmem:[#allocation2 + $0x158] sm:$0xff] %v1257_v35  ;;  %2962 = vst [vmem:[#allocation2 + $0x958] sm:$0xff] %v2025_v36  ;;  %v1260_v39 = vpop.f32.mrb[44].mxu0  ;;  %v2028_v40 = vpop.f32.mrb[44].mxu1  ;;  %v98_v36 = vld [vmem:[%s6889_s0 + $0x288] sm:$0xff] }
 0x138   :  { %v1261_v41 = vadd.f32 %v1260_v39, %v5351_v61  ;;  %v2029_v42 = vadd.f32 %v2028_v40, %v5351_v61  ;;  %v1262_v43 = vpop.f32.mrb[45].mxu0  ;;  %4240 = vmatmul.mubr.msk.f32.gmra.mrb[150].mxu0 %vm293_vm0, %v92_v37  ;;  %v2030_v44 = vpop.f32.mrb[45].mxu1  ;;  %4368 = vmatmul.mubr.msk.f32.gmra.mrb[150].mxu1 %vm293_vm0, %v220_v38  ;;  %v226_v37 = vld [vmem:[%s6889_s0 + $0x688] sm:$0xff] }
 0x139   :  { %v1263_v45 = vadd.f32 %v1262_v43, %v5355_v62  ;;  %v2031_v46 = vadd.f32 %v2030_v44, %v5355_v62  ;;  %1582 = vmatprep.mubr.f32.mxu0 %v4766_v3  ;;  %2350 = vmatprep.mubr.f32.mxu1 %v4766_v3 }
 0x13a   :  { %2707 = vst [vmem:[#allocation2 + $0x160] sm:$0xff] %v1261_v41  ;;  %2963 = vst [vmem:[#allocation2 + $0x960] sm:$0xff] %v2029_v42 }
 0x13b   :  { %2708 = vst [vmem:[#allocation2 + $0x168] sm:$0xff] %v1263_v45  ;;  %2964 = vst [vmem:[#allocation2 + $0x968] sm:$0xff] %v2031_v46  ;;  %v1266_v49 = vpop.f32.mrb[46].mxu0  ;;  %v2034_v50 = vpop.f32.mrb[46].mxu1  ;;  %v99_v46 = vld [vmem:[%s6889_s0 + $0x290] sm:$0xff] }
 0x13c   :  { %v1267_v51 = vadd.f32 %v1266_v49, %v5351_v61  ;;  %v2035_v52 = vadd.f32 %v2034_v50, %v5351_v61  ;;  %v1268_v53 = vpop.f32.mrb[47].mxu0  ;;  %4241 = vmatmul.mubr.msk.f32.gmra.mrb[152].mxu0 %vm293_vm0, %v93_v47  ;;  %v2036_v54 = vpop.f32.mrb[47].mxu1  ;;  %4369 = vmatmul.mubr.msk.f32.gmra.mrb[152].mxu1 %vm293_vm0, %v221_v48  ;;  %v227_v47 = vld [vmem:[%s6889_s0 + $0x690] sm:$0xff] }
 0x13d   :  { %v1269_v55 = vadd.f32 %v1268_v53, %v5355_v62  ;;  %v2037_v56 = vadd.f32 %v2036_v54, %v5355_v62  ;;  %1588 = vmatprep.mubr.f32.mxu0 %v4766_v3  ;;  %2356 = vmatprep.mubr.f32.mxu1 %v4766_v3 }
 0x13e   :  { %2709 = vst [vmem:[#allocation2 + $0x170] sm:$0xff] %v1267_v51  ;;  %2965 = vst [vmem:[#allocation2 + $0x970] sm:$0xff] %v2035_v52 }
 0x13f   :  { %2710 = vst [vmem:[#allocation2 + $0x178] sm:$0xff] %v1269_v55  ;;  %2966 = vst [vmem:[#allocation2 + $0x978] sm:$0xff] %v2037_v56  ;;  %v1272_v59 = vpop.f32.mrb[48].mxu0  ;;  %v2040_v60 = vpop.f32.mrb[48].mxu1  ;;  %v100_v56 = vld [vmem:[%s6889_s0 + $0x298] sm:$0xff] }
 0x140   :  { %v1273_v63 = vadd.f32 %v1272_v59, %v5351_v61  ;;  %v2041_v0 = vadd.f32 %v2040_v60, %v5351_v61  ;;  %v1274_v1 = vpop.f32.mrb[49].mxu0  ;;  %4242 = vmatmul.mubr.msk.f32.gmra.mrb[154].mxu0 %vm293_vm0, %v94_v57  ;;  %v2042_v2 = vpop.f32.mrb[49].mxu1  ;;  %4370 = vmatmul.mubr.msk.f32.gmra.mrb[154].mxu1 %vm293_vm0, %v222_v58  ;;  %v228_v57 = vld [vmem:[%s6889_s0 + $0x698] sm:$0xff] }
 0x141   :  { %v1275_v4 = vadd.f32 %v1274_v1, %v5355_v62  ;;  %v2043_v5 = vadd.f32 %v2042_v2, %v5355_v62  ;;  %1594 = vmatprep.mubr.f32.mxu0 %v4766_v3  ;;  %2362 = vmatprep.mubr.f32.mxu1 %v4766_v3 }
 0x142   :  { %2711 = vst [vmem:[#allocation2 + $0x180] sm:$0xff] %v1273_v63  ;;  %2967 = vst [vmem:[#allocation2 + $0x980] sm:$0xff] %v2041_v0 }
 0x143   :  { %2712 = vst [vmem:[#allocation2 + $0x188] sm:$0xff] %v1275_v4  ;;  %2968 = vst [vmem:[#allocation2 + $0x988] sm:$0xff] %v2043_v5  ;;  %v1278_v8 = vpop.f32.mrb[50].mxu0  ;;  %v2046_v9 = vpop.f32.mrb[50].mxu1  ;;  %v101_v5 = vld [vmem:[%s6889_s0 + $0x2a0] sm:$0xff] }
 0x144   :  { %v1279_v10 = vadd.f32 %v1278_v8, %v5351_v61  ;;  %v2047_v11 = vadd.f32 %v2046_v9, %v5351_v61  ;;  %v1280_v12 = vpop.f32.mrb[51].mxu0  ;;  %4243 = vmatmul.mubr.msk.f32.gmra.mrb[156].mxu0 %vm293_vm0, %v95_v6  ;;  %v2048_v13 = vpop.f32.mrb[51].mxu1  ;;  %4371 = vmatmul.mubr.msk.f32.gmra.mrb[156].mxu1 %vm293_vm0, %v223_v7  ;;  %v229_v6 = vld [vmem:[%s6889_s0 + $0x6a0] sm:$0xff] }
 0x145   :  { %v1281_v14 = vadd.f32 %v1280_v12, %v5355_v62  ;;  %v2049_v15 = vadd.f32 %v2048_v13, %v5355_v62  ;;  %1600 = vmatprep.mubr.f32.mxu0 %v4766_v3  ;;  %2368 = vmatprep.mubr.f32.mxu1 %v4766_v3 }
 0x146   :  { %2713 = vst [vmem:[#allocation2 + $0x190] sm:$0xff] %v1279_v10  ;;  %2969 = vst [vmem:[#allocation2 + $0x990] sm:$0xff] %v2047_v11 }
 0x147   :  { %2714 = vst [vmem:[#allocation2 + $0x198] sm:$0xff] %v1281_v14  ;;  %2970 = vst [vmem:[#allocation2 + $0x998] sm:$0xff] %v2049_v15  ;;  %v1284_v18 = vpop.f32.mrb[52].mxu0  ;;  %v2052_v19 = vpop.f32.mrb[52].mxu1  ;;  %v102_v15 = vld [vmem:[%s6889_s0 + $0x2a8] sm:$0xff] }
 0x148   :  { %v1285_v20 = vadd.f32 %v1284_v18, %v5351_v61  ;;  %v2053_v21 = vadd.f32 %v2052_v19, %v5351_v61  ;;  %v1286_v22 = vpop.f32.mrb[53].mxu0  ;;  %4244 = vmatmul.mubr.msk.f32.gmra.mrb[158].mxu0 %vm293_vm0, %v96_v16  ;;  %v2054_v23 = vpop.f32.mrb[53].mxu1  ;;  %4372 = vmatmul.mubr.msk.f32.gmra.mrb[158].mxu1 %vm293_vm0, %v224_v17  ;;  %v230_v16 = vld [vmem:[%s6889_s0 + $0x6a8] sm:$0xff] }
 0x149   :  { %v1287_v24 = vadd.f32 %v1286_v22, %v5355_v62  ;;  %v2055_v25 = vadd.f32 %v2054_v23, %v5355_v62  ;;  %1606 = vmatprep.mubr.f32.mxu0 %v4766_v3  ;;  %2374 = vmatprep.mubr.f32.mxu1 %v4766_v3 }
 0x14a   :  { %2715 = vst [vmem:[#allocation2 + $0x1a0] sm:$0xff] %v1285_v20  ;;  %2971 = vst [vmem:[#allocation2 + $0x9a0] sm:$0xff] %v2053_v21 }
 0x14b   :  { %2716 = vst [vmem:[#allocation2 + $0x1a8] sm:$0xff] %v1287_v24  ;;  %2972 = vst [vmem:[#allocation2 + $0x9a8] sm:$0xff] %v2055_v25  ;;  %v1290_v28 = vpop.f32.mrb[54].mxu0  ;;  %v2058_v29 = vpop.f32.mrb[54].mxu1  ;;  %v103_v25 = vld [vmem:[%s6889_s0 + $0x2b0] sm:$0xff] }
 0x14c   :  { %v1291_v30 = vadd.f32 %v1290_v28, %v5351_v61  ;;  %v2059_v31 = vadd.f32 %v2058_v29, %v5351_v61  ;;  %v1292_v32 = vpop.f32.mrb[55].mxu0  ;;  %4245 = vmatmul.mubr.msk.f32.gmra.mrb[160].mxu0 %vm293_vm0, %v97_v26  ;;  %v2060_v33 = vpop.f32.mrb[55].mxu1  ;;  %4373 = vmatmul.mubr.msk.f32.gmra.mrb[160].mxu1 %vm293_vm0, %v225_v27  ;;  %v231_v26 = vld [vmem:[%s6889_s0 + $0x6b0] sm:$0xff] }
 0x14d   :  { %v1293_v34 = vadd.f32 %v1292_v32, %v5355_v62  ;;  %v2061_v35 = vadd.f32 %v2060_v33, %v5355_v62  ;;  %1612 = vmatprep.mubr.f32.mxu0 %v4766_v3  ;;  %2380 = vmatprep.mubr.f32.mxu1 %v4766_v3 }
 0x14e   :  { %2717 = vst [vmem:[#allocation2 + $0x1b0] sm:$0xff] %v1291_v30  ;;  %2973 = vst [vmem:[#allocation2 + $0x9b0] sm:$0xff] %v2059_v31 }
 0x14f   :  { %2718 = vst [vmem:[#allocation2 + $0x1b8] sm:$0xff] %v1293_v34  ;;  %2974 = vst [vmem:[#allocation2 + $0x9b8] sm:$0xff] %v2061_v35  ;;  %v1296_v38 = vpop.f32.mrb[56].mxu0  ;;  %v2064_v39 = vpop.f32.mrb[56].mxu1  ;;  %v104_v35 = vld [vmem:[%s6889_s0 + $0x2b8] sm:$0xff] }
 0x150   :  { %v1297_v40 = vadd.f32 %v1296_v38, %v5351_v61  ;;  %v2065_v41 = vadd.f32 %v2064_v39, %v5351_v61  ;;  %v1298_v42 = vpop.f32.mrb[57].mxu0  ;;  %4246 = vmatmul.mubr.msk.f32.gmra.mrb[162].mxu0 %vm293_vm0, %v98_v36  ;;  %v2066_v43 = vpop.f32.mrb[57].mxu1  ;;  %4374 = vmatmul.mubr.msk.f32.gmra.mrb[162].mxu1 %vm293_vm0, %v226_v37  ;;  %v232_v36 = vld [vmem:[%s6889_s0 + $0x6b8] sm:$0xff] }
 0x151   :  { %v1299_v44 = vadd.f32 %v1298_v42, %v5355_v62  ;;  %v2067_v45 = vadd.f32 %v2066_v43, %v5355_v62  ;;  %1618 = vmatprep.mubr.f32.mxu0 %v4766_v3  ;;  %2386 = vmatprep.mubr.f32.mxu1 %v4766_v3 }
 0x152   :  { %2719 = vst [vmem:[#allocation2 + $0x1c0] sm:$0xff] %v1297_v40  ;;  %2975 = vst [vmem:[#allocation2 + $0x9c0] sm:$0xff] %v2065_v41 }
 0x153   :  { %2720 = vst [vmem:[#allocation2 + $0x1c8] sm:$0xff] %v1299_v44  ;;  %2976 = vst [vmem:[#allocation2 + $0x9c8] sm:$0xff] %v2067_v45  ;;  %v1302_v48 = vpop.f32.mrb[58].mxu0  ;;  %v2070_v49 = vpop.f32.mrb[58].mxu1  ;;  %v105_v45 = vld [vmem:[%s6889_s0 + $0x2c0] sm:$0xff] }
 0x154   :  { %v1303_v50 = vadd.f32 %v1302_v48, %v5351_v61  ;;  %v2071_v51 = vadd.f32 %v2070_v49, %v5351_v61  ;;  %v1304_v52 = vpop.f32.mrb[59].mxu0  ;;  %4247 = vmatmul.mubr.msk.f32.gmra.mrb[164].mxu0 %vm293_vm0, %v99_v46  ;;  %v2072_v53 = vpop.f32.mrb[59].mxu1  ;;  %4375 = vmatmul.mubr.msk.f32.gmra.mrb[164].mxu1 %vm293_vm0, %v227_v47  ;;  %v233_v46 = vld [vmem:[%s6889_s0 + $0x6c0] sm:$0xff] }
 0x155   :  { %v1305_v54 = vadd.f32 %v1304_v52, %v5355_v62  ;;  %v2073_v55 = vadd.f32 %v2072_v53, %v5355_v62  ;;  %1624 = vmatprep.mubr.f32.mxu0 %v4766_v3  ;;  %2392 = vmatprep.mubr.f32.mxu1 %v4766_v3 }
 0x156   :  { %2721 = vst [vmem:[#allocation2 + $0x1d0] sm:$0xff] %v1303_v50  ;;  %2977 = vst [vmem:[#allocation2 + $0x9d0] sm:$0xff] %v2071_v51 }
 0x157   :  { %2722 = vst [vmem:[#allocation2 + $0x1d8] sm:$0xff] %v1305_v54  ;;  %2978 = vst [vmem:[#allocation2 + $0x9d8] sm:$0xff] %v2073_v55  ;;  %v1308_v58 = vpop.f32.mrb[60].mxu0  ;;  %v2076_v59 = vpop.f32.mrb[60].mxu1  ;;  %v106_v55 = vld [vmem:[%s6889_s0 + $0x2c8] sm:$0xff] }
 0x158   :  { %v1309_v60 = vadd.f32 %v1308_v58, %v5351_v61  ;;  %v2077_v63 = vadd.f32 %v2076_v59, %v5351_v61  ;;  %v1310_v0 = vpop.f32.mrb[61].mxu0  ;;  %4248 = vmatmul.mubr.msk.f32.gmra.mrb[166].mxu0 %vm293_vm0, %v100_v56  ;;  %v2078_v1 = vpop.f32.mrb[61].mxu1  ;;  %4376 = vmatmul.mubr.msk.f32.gmra.mrb[166].mxu1 %vm293_vm0, %v228_v57  ;;  %v234_v56 = vld [vmem:[%s6889_s0 + $0x6c8] sm:$0xff] }
 0x159   :  { %v1311_v2 = vadd.f32 %v1310_v0, %v5355_v62  ;;  %v2079_v4 = vadd.f32 %v2078_v1, %v5355_v62  ;;  %1630 = vmatprep.mubr.f32.mxu0 %v4766_v3  ;;  %2398 = vmatprep.mubr.f32.mxu1 %v4766_v3 }
 0x15a   :  { %2723 = vst [vmem:[#allocation2 + $0x1e0] sm:$0xff] %v1309_v60  ;;  %2979 = vst [vmem:[#allocation2 + $0x9e0] sm:$0xff] %v2077_v63 }
 0x15b   :  { %2724 = vst [vmem:[#allocation2 + $0x1e8] sm:$0xff] %v1311_v2  ;;  %2980 = vst [vmem:[#allocation2 + $0x9e8] sm:$0xff] %v2079_v4  ;;  %v1314_v7 = vpop.f32.mrb[62].mxu0  ;;  %v2082_v8 = vpop.f32.mrb[62].mxu1  ;;  %v107_v4 = vld [vmem:[%s6889_s0 + $0x2d0] sm:$0xff] }
 0x15c   :  { %v1315_v9 = vadd.f32 %v1314_v7, %v5351_v61  ;;  %v2083_v10 = vadd.f32 %v2082_v8, %v5351_v61  ;;  %v1316_v11 = vpop.f32.mrb[63].mxu0  ;;  %4249 = vmatmul.mubr.msk.f32.gmra.mrb[168].mxu0 %vm293_vm0, %v101_v5  ;;  %v2084_v12 = vpop.f32.mrb[63].mxu1  ;;  %4377 = vmatmul.mubr.msk.f32.gmra.mrb[168].mxu1 %vm293_vm0, %v229_v6  ;;  %v235_v5 = vld [vmem:[%s6889_s0 + $0x6d0] sm:$0xff] }
 0x15d   :  { %v1317_v13 = vadd.f32 %v1316_v11, %v5355_v62  ;;  %v2085_v14 = vadd.f32 %v2084_v12, %v5355_v62  ;;  %1636 = vmatprep.mubr.f32.mxu0 %v4766_v3  ;;  %2404 = vmatprep.mubr.f32.mxu1 %v4766_v3 }
 0x15e   :  { %2725 = vst [vmem:[#allocation2 + $0x1f0] sm:$0xff] %v1315_v9  ;;  %2981 = vst [vmem:[#allocation2 + $0x9f0] sm:$0xff] %v2083_v10 }
 0x15f   :  { %2726 = vst [vmem:[#allocation2 + $0x1f8] sm:$0xff] %v1317_v13  ;;  %2982 = vst [vmem:[#allocation2 + $0x9f8] sm:$0xff] %v2085_v14  ;;  %v1320_v17 = vpop.f32.mrb[64].mxu0  ;;  %v2088_v18 = vpop.f32.mrb[64].mxu1  ;;  %v108_v14 = vld [vmem:[%s6889_s0 + $0x2d8] sm:$0xff] }
 0x160   :  { %v1321_v19 = vadd.f32 %v1320_v17, %v5351_v61  ;;  %v2089_v20 = vadd.f32 %v2088_v18, %v5351_v61  ;;  %v1322_v21 = vpop.f32.mrb[65].mxu0  ;;  %4250 = vmatmul.mubr.msk.f32.gmra.mrb[170].mxu0 %vm293_vm0, %v102_v15  ;;  %v2090_v22 = vpop.f32.mrb[65].mxu1  ;;  %4378 = vmatmul.mubr.msk.f32.gmra.mrb[170].mxu1 %vm293_vm0, %v230_v16  ;;  %v236_v15 = vld [vmem:[%s6889_s0 + $0x6d8] sm:$0xff] }
 0x161   :  { %v1323_v23 = vadd.f32 %v1322_v21, %v5355_v62  ;;  %v2091_v24 = vadd.f32 %v2090_v22, %v5355_v62  ;;  %1642 = vmatprep.mubr.f32.mxu0 %v4766_v3  ;;  %2410 = vmatprep.mubr.f32.mxu1 %v4766_v3 }
 0x162   :  { %2727 = vst [vmem:[#allocation2 + $0x200] sm:$0xff] %v1321_v19  ;;  %2983 = vst [vmem:[#allocation2 + $0xa00] sm:$0xff] %v2089_v20 }
 0x163   :  { %2728 = vst [vmem:[#allocation2 + $0x208] sm:$0xff] %v1323_v23  ;;  %2984 = vst [vmem:[#allocation2 + $0xa08] sm:$0xff] %v2091_v24  ;;  %v1326_v27 = vpop.f32.mrb[66].mxu0  ;;  %v2094_v28 = vpop.f32.mrb[66].mxu1  ;;  %v109_v24 = vld [vmem:[%s6889_s0 + $0x2e0] sm:$0xff] }
 0x164   :  { %v1327_v29 = vadd.f32 %v1326_v27, %v5351_v61  ;;  %v2095_v30 = vadd.f32 %v2094_v28, %v5351_v61  ;;  %v1328_v31 = vpop.f32.mrb[67].mxu0  ;;  %4251 = vmatmul.mubr.msk.f32.gmra.mrb[172].mxu0 %vm293_vm0, %v103_v25  ;;  %v2096_v32 = vpop.f32.mrb[67].mxu1  ;;  %4379 = vmatmul.mubr.msk.f32.gmra.mrb[172].mxu1 %vm293_vm0, %v231_v26  ;;  %v237_v25 = vld [vmem:[%s6889_s0 + $0x6e0] sm:$0xff] }
 0x165   :  { %v1329_v33 = vadd.f32 %v1328_v31, %v5355_v62  ;;  %v2097_v34 = vadd.f32 %v2096_v32, %v5355_v62  ;;  %1648 = vmatprep.mubr.f32.mxu0 %v4766_v3  ;;  %2416 = vmatprep.mubr.f32.mxu1 %v4766_v3 }
 0x166   :  { %2729 = vst [vmem:[#allocation2 + $0x210] sm:$0xff] %v1327_v29  ;;  %2985 = vst [vmem:[#allocation2 + $0xa10] sm:$0xff] %v2095_v30 }
 0x167   :  { %2730 = vst [vmem:[#allocation2 + $0x218] sm:$0xff] %v1329_v33  ;;  %2986 = vst [vmem:[#allocation2 + $0xa18] sm:$0xff] %v2097_v34  ;;  %v1332_v37 = vpop.f32.mrb[68].mxu0  ;;  %v2100_v38 = vpop.f32.mrb[68].mxu1  ;;  %v110_v34 = vld [vmem:[%s6889_s0 + $0x2e8] sm:$0xff] }
 0x168   :  { %v1333_v39 = vadd.f32 %v1332_v37, %v5351_v61  ;;  %v2101_v40 = vadd.f32 %v2100_v38, %v5351_v61  ;;  %v1334_v41 = vpop.f32.mrb[69].mxu0  ;;  %4252 = vmatmul.mubr.msk.f32.gmra.mrb[174].mxu0 %vm293_vm0, %v104_v35  ;;  %v2102_v42 = vpop.f32.mrb[69].mxu1  ;;  %4380 = vmatmul.mubr.msk.f32.gmra.mrb[174].mxu1 %vm293_vm0, %v232_v36  ;;  %v238_v35 = vld [vmem:[%s6889_s0 + $0x6e8] sm:$0xff] }
 0x169   :  { %v1335_v43 = vadd.f32 %v1334_v41, %v5355_v62  ;;  %v2103_v44 = vadd.f32 %v2102_v42, %v5355_v62  ;;  %1654 = vmatprep.mubr.f32.mxu0 %v4766_v3  ;;  %2422 = vmatprep.mubr.f32.mxu1 %v4766_v3 }
 0x16a   :  { %2731 = vst [vmem:[#allocation2 + $0x220] sm:$0xff] %v1333_v39  ;;  %2987 = vst [vmem:[#allocation2 + $0xa20] sm:$0xff] %v2101_v40 }
 0x16b   :  { %2732 = vst [vmem:[#allocation2 + $0x228] sm:$0xff] %v1335_v43  ;;  %2988 = vst [vmem:[#allocation2 + $0xa28] sm:$0xff] %v2103_v44  ;;  %v1338_v47 = vpop.f32.mrb[70].mxu0  ;;  %v2106_v48 = vpop.f32.mrb[70].mxu1  ;;  %v111_v44 = vld [vmem:[%s6889_s0 + $0x2f0] sm:$0xff] }
 0x16c   :  { %v1339_v49 = vadd.f32 %v1338_v47, %v5351_v61  ;;  %v2107_v50 = vadd.f32 %v2106_v48, %v5351_v61  ;;  %v1340_v51 = vpop.f32.mrb[71].mxu0  ;;  %4253 = vmatmul.mubr.msk.f32.gmra.mrb[176].mxu0 %vm293_vm0, %v105_v45  ;;  %v2108_v52 = vpop.f32.mrb[71].mxu1  ;;  %4381 = vmatmul.mubr.msk.f32.gmra.mrb[176].mxu1 %vm293_vm0, %v233_v46  ;;  %v239_v45 = vld [vmem:[%s6889_s0 + $0x6f0] sm:$0xff] }
 0x16d   :  { %v1341_v53 = vadd.f32 %v1340_v51, %v5355_v62  ;;  %v2109_v54 = vadd.f32 %v2108_v52, %v5355_v62  ;;  %1660 = vmatprep.mubr.f32.mxu0 %v4766_v3  ;;  %2428 = vmatprep.mubr.f32.mxu1 %v4766_v3 }
 0x16e   :  { %2733 = vst [vmem:[#allocation2 + $0x230] sm:$0xff] %v1339_v49  ;;  %2989 = vst [vmem:[#allocation2 + $0xa30] sm:$0xff] %v2107_v50 }
 0x16f   :  { %2734 = vst [vmem:[#allocation2 + $0x238] sm:$0xff] %v1341_v53  ;;  %2990 = vst [vmem:[#allocation2 + $0xa38] sm:$0xff] %v2109_v54  ;;  %v1344_v57 = vpop.f32.mrb[72].mxu0  ;;  %v2112_v58 = vpop.f32.mrb[72].mxu1  ;;  %v112_v54 = vld [vmem:[%s6889_s0 + $0x2f8] sm:$0xff] }
 0x170   :  { %v1345_v59 = vadd.f32 %v1344_v57, %v5351_v61  ;;  %v2113_v60 = vadd.f32 %v2112_v58, %v5351_v61  ;;  %v1346_v63 = vpop.f32.mrb[73].mxu0  ;;  %4254 = vmatmul.mubr.msk.f32.gmra.mrb[178].mxu0 %vm293_vm0, %v106_v55  ;;  %v2114_v0 = vpop.f32.mrb[73].mxu1  ;;  %4382 = vmatmul.mubr.msk.f32.gmra.mrb[178].mxu1 %vm293_vm0, %v234_v56  ;;  %v240_v55 = vld [vmem:[%s6889_s0 + $0x6f8] sm:$0xff] }
 0x171   :  { %v1347_v1 = vadd.f32 %v1346_v63, %v5355_v62  ;;  %v2115_v2 = vadd.f32 %v2114_v0, %v5355_v62  ;;  %1666 = vmatprep.mubr.f32.mxu0 %v4766_v3  ;;  %2434 = vmatprep.mubr.f32.mxu1 %v4766_v3 }
 0x172   :  { %2735 = vst [vmem:[#allocation2 + $0x240] sm:$0xff] %v1345_v59  ;;  %2991 = vst [vmem:[#allocation2 + $0xa40] sm:$0xff] %v2113_v60 }
 0x173   :  { %2736 = vst [vmem:[#allocation2 + $0x248] sm:$0xff] %v1347_v1  ;;  %2992 = vst [vmem:[#allocation2 + $0xa48] sm:$0xff] %v2115_v2  ;;  %v1350_v6 = vpop.f32.mrb[74].mxu0  ;;  %v2118_v7 = vpop.f32.mrb[74].mxu1  ;;  %v113_v2 = vld [vmem:[%s6889_s0 + $0x300] sm:$0xff] }
 0x174   :  { %v1351_v8 = vadd.f32 %v1350_v6, %v5351_v61  ;;  %v2119_v9 = vadd.f32 %v2118_v7, %v5351_v61  ;;  %v1352_v10 = vpop.f32.mrb[75].mxu0  ;;  %4255 = vmatmul.mubr.msk.f32.gmra.mrb[180].mxu0 %vm293_vm0, %v107_v4  ;;  %v2120_v11 = vpop.f32.mrb[75].mxu1  ;;  %4383 = vmatmul.mubr.msk.f32.gmra.mrb[180].mxu1 %vm293_vm0, %v235_v5  ;;  %v241_v4 = vld [vmem:[%s6889_s0 + $0x700] sm:$0xff] }
 0x175   :  { %v1353_v12 = vadd.f32 %v1352_v10, %v5355_v62  ;;  %v2121_v13 = vadd.f32 %v2120_v11, %v5355_v62  ;;  %1672 = vmatprep.mubr.f32.mxu0 %v4766_v3  ;;  %2440 = vmatprep.mubr.f32.mxu1 %v4766_v3 }
 0x176   :  { %2737 = vst [vmem:[#allocation2 + $0x250] sm:$0xff] %v1351_v8  ;;  %2993 = vst [vmem:[#allocation2 + $0xa50] sm:$0xff] %v2119_v9 }
 0x177   :  { %2738 = vst [vmem:[#allocation2 + $0x258] sm:$0xff] %v1353_v12  ;;  %2994 = vst [vmem:[#allocation2 + $0xa58] sm:$0xff] %v2121_v13  ;;  %v1356_v16 = vpop.f32.mrb[76].mxu0  ;;  %v2124_v17 = vpop.f32.mrb[76].mxu1  ;;  %v114_v13 = vld [vmem:[%s6889_s0 + $0x308] sm:$0xff] }
 0x178   :  { %v1357_v18 = vadd.f32 %v1356_v16, %v5351_v61  ;;  %v2125_v19 = vadd.f32 %v2124_v17, %v5351_v61  ;;  %v1358_v20 = vpop.f32.mrb[77].mxu0  ;;  %4256 = vmatmul.mubr.msk.f32.gmra.mrb[182].mxu0 %vm293_vm0, %v108_v14  ;;  %v2126_v21 = vpop.f32.mrb[77].mxu1  ;;  %4384 = vmatmul.mubr.msk.f32.gmra.mrb[182].mxu1 %vm293_vm0, %v236_v15  ;;  %v242_v14 = vld [vmem:[%s6889_s0 + $0x708] sm:$0xff] }
 0x179   :  { %v1359_v22 = vadd.f32 %v1358_v20, %v5355_v62  ;;  %v2127_v23 = vadd.f32 %v2126_v21, %v5355_v62  ;;  %1678 = vmatprep.mubr.f32.mxu0 %v4766_v3  ;;  %2446 = vmatprep.mubr.f32.mxu1 %v4766_v3 }
 0x17a   :  { %2739 = vst [vmem:[#allocation2 + $0x260] sm:$0xff] %v1357_v18  ;;  %2995 = vst [vmem:[#allocation2 + $0xa60] sm:$0xff] %v2125_v19 }
 0x17b   :  { %2740 = vst [vmem:[#allocation2 + $0x268] sm:$0xff] %v1359_v22  ;;  %2996 = vst [vmem:[#allocation2 + $0xa68] sm:$0xff] %v2127_v23  ;;  %v1362_v26 = vpop.f32.mrb[78].mxu0  ;;  %v2130_v27 = vpop.f32.mrb[78].mxu1  ;;  %v115_v23 = vld [vmem:[%s6889_s0 + $0x310] sm:$0xff] }
 0x17c   :  { %v1363_v28 = vadd.f32 %v1362_v26, %v5351_v61  ;;  %v2131_v29 = vadd.f32 %v2130_v27, %v5351_v61  ;;  %v1364_v30 = vpop.f32.mrb[79].mxu0  ;;  %4257 = vmatmul.mubr.msk.f32.gmra.mrb[184].mxu0 %vm293_vm0, %v109_v24  ;;  %v2132_v31 = vpop.f32.mrb[79].mxu1  ;;  %4385 = vmatmul.mubr.msk.f32.gmra.mrb[184].mxu1 %vm293_vm0, %v237_v25  ;;  %v243_v24 = vld [vmem:[%s6889_s0 + $0x710] sm:$0xff] }
 0x17d   :  { %v1365_v32 = vadd.f32 %v1364_v30, %v5355_v62  ;;  %v2133_v33 = vadd.f32 %v2132_v31, %v5355_v62  ;;  %1684 = vmatprep.mubr.f32.mxu0 %v4766_v3  ;;  %2452 = vmatprep.mubr.f32.mxu1 %v4766_v3 }
 0x17e   :  { %2741 = vst [vmem:[#allocation2 + $0x270] sm:$0xff] %v1363_v28  ;;  %2997 = vst [vmem:[#allocation2 + $0xa70] sm:$0xff] %v2131_v29 }
 0x17f   :  { %2742 = vst [vmem:[#allocation2 + $0x278] sm:$0xff] %v1365_v32  ;;  %2998 = vst [vmem:[#allocation2 + $0xa78] sm:$0xff] %v2133_v33  ;;  %v1368_v36 = vpop.f32.mrb[80].mxu0  ;;  %v2136_v37 = vpop.f32.mrb[80].mxu1  ;;  %v116_v33 = vld [vmem:[%s6889_s0 + $0x318] sm:$0xff] }
 0x180   :  { %v1369_v38 = vadd.f32 %v1368_v36, %v5351_v61  ;;  %v2137_v39 = vadd.f32 %v2136_v37, %v5351_v61  ;;  %v1370_v40 = vpop.f32.mrb[81].mxu0  ;;  %4258 = vmatmul.mubr.msk.f32.gmra.mrb[186].mxu0 %vm293_vm0, %v110_v34  ;;  %v2138_v41 = vpop.f32.mrb[81].mxu1  ;;  %4386 = vmatmul.mubr.msk.f32.gmra.mrb[186].mxu1 %vm293_vm0, %v238_v35  ;;  %v244_v34 = vld [vmem:[%s6889_s0 + $0x718] sm:$0xff] }
 0x181   :  { %v1371_v42 = vadd.f32 %v1370_v40, %v5355_v62  ;;  %v2139_v43 = vadd.f32 %v2138_v41, %v5355_v62  ;;  %1690 = vmatprep.mubr.f32.mxu0 %v4766_v3  ;;  %2458 = vmatprep.mubr.f32.mxu1 %v4766_v3 }
 0x182   :  { %2743 = vst [vmem:[#allocation2 + $0x280] sm:$0xff] %v1369_v38  ;;  %2999 = vst [vmem:[#allocation2 + $0xa80] sm:$0xff] %v2137_v39 }
 0x183   :  { %2744 = vst [vmem:[#allocation2 + $0x288] sm:$0xff] %v1371_v42  ;;  %3000 = vst [vmem:[#allocation2 + $0xa88] sm:$0xff] %v2139_v43  ;;  %v1374_v46 = vpop.f32.mrb[82].mxu0  ;;  %v2142_v47 = vpop.f32.mrb[82].mxu1  ;;  %v117_v43 = vld [vmem:[%s6889_s0 + $0x320] sm:$0xff] }
 0x184   :  { %v1375_v48 = vadd.f32 %v1374_v46, %v5351_v61  ;;  %v2143_v49 = vadd.f32 %v2142_v47, %v5351_v61  ;;  %v1376_v50 = vpop.f32.mrb[83].mxu0  ;;  %4259 = vmatmul.mubr.msk.f32.gmra.mrb[188].mxu0 %vm293_vm0, %v111_v44  ;;  %v2144_v51 = vpop.f32.mrb[83].mxu1  ;;  %4387 = vmatmul.mubr.msk.f32.gmra.mrb[188].mxu1 %vm293_vm0, %v239_v45  ;;  %v245_v44 = vld [vmem:[%s6889_s0 + $0x720] sm:$0xff] }
 0x185   :  { %v1377_v52 = vadd.f32 %v1376_v50, %v5355_v62  ;;  %v2145_v53 = vadd.f32 %v2144_v51, %v5355_v62  ;;  %1696 = vmatprep.mubr.f32.mxu0 %v4766_v3  ;;  %2464 = vmatprep.mubr.f32.mxu1 %v4766_v3 }
 0x186   :  { %2745 = vst [vmem:[#allocation2 + $0x290] sm:$0xff] %v1375_v48  ;;  %3001 = vst [vmem:[#allocation2 + $0xa90] sm:$0xff] %v2143_v49 }
 0x187   :  { %2746 = vst [vmem:[#allocation2 + $0x298] sm:$0xff] %v1377_v52  ;;  %3002 = vst [vmem:[#allocation2 + $0xa98] sm:$0xff] %v2145_v53  ;;  %v1380_v56 = vpop.f32.mrb[84].mxu0  ;;  %v2148_v57 = vpop.f32.mrb[84].mxu1  ;;  %v118_v53 = vld [vmem:[%s6889_s0 + $0x328] sm:$0xff] }
 0x188   :  { %v1381_v58 = vadd.f32 %v1380_v56, %v5351_v61  ;;  %v2149_v59 = vadd.f32 %v2148_v57, %v5351_v61  ;;  %v1382_v60 = vpop.f32.mrb[85].mxu0  ;;  %4260 = vmatmul.mubr.msk.f32.gmra.mrb[190].mxu0 %vm293_vm0, %v112_v54  ;;  %v2150_v63 = vpop.f32.mrb[85].mxu1  ;;  %4388 = vmatmul.mubr.msk.f32.gmra.mrb[190].mxu1 %vm293_vm0, %v240_v55  ;;  %v246_v54 = vld [vmem:[%s6889_s0 + $0x728] sm:$0xff] }
 0x189   :  { %v1383_v0 = vadd.f32 %v1382_v60, %v5355_v62  ;;  %v2151_v1 = vadd.f32 %v2150_v63, %v5355_v62  ;;  %1702 = vmatprep.mubr.f32.mxu0 %v4766_v3  ;;  %2470 = vmatprep.mubr.f32.mxu1 %v4766_v3 }
 0x18a   :  { %2747 = vst [vmem:[#allocation2 + $0x2a0] sm:$0xff] %v1381_v58  ;;  %3003 = vst [vmem:[#allocation2 + $0xaa0] sm:$0xff] %v2149_v59 }
 0x18b   :  { %2748 = vst [vmem:[#allocation2 + $0x2a8] sm:$0xff] %v1383_v0  ;;  %3004 = vst [vmem:[#allocation2 + $0xaa8] sm:$0xff] %v2151_v1  ;;  %v1386_v5 = vpop.f32.mrb[86].mxu0  ;;  %v2154_v6 = vpop.f32.mrb[86].mxu1  ;;  %v119_v1 = vld [vmem:[%s6889_s0 + $0x330] sm:$0xff] }
 0x18c   :  { %v1387_v7 = vadd.f32 %v1386_v5, %v5351_v61  ;;  %v2155_v8 = vadd.f32 %v2154_v6, %v5351_v61  ;;  %v1388_v9 = vpop.f32.mrb[87].mxu0  ;;  %4261 = vmatmul.mubr.msk.f32.gmra.mrb[192].mxu0 %vm293_vm0, %v113_v2  ;;  %v2156_v10 = vpop.f32.mrb[87].mxu1  ;;  %4389 = vmatmul.mubr.msk.f32.gmra.mrb[192].mxu1 %vm293_vm0, %v241_v4  ;;  %v247_v2 = vld [vmem:[%s6889_s0 + $0x730] sm:$0xff] }
 0x18d   :  { %v1389_v11 = vadd.f32 %v1388_v9, %v5355_v62  ;;  %v2157_v12 = vadd.f32 %v2156_v10, %v5355_v62  ;;  %1708 = vmatprep.mubr.f32.mxu0 %v4766_v3  ;;  %2476 = vmatprep.mubr.f32.mxu1 %v4766_v3 }
 0x18e   :  { %2749 = vst [vmem:[#allocation2 + $0x2b0] sm:$0xff] %v1387_v7  ;;  %3005 = vst [vmem:[#allocation2 + $0xab0] sm:$0xff] %v2155_v8 }
 0x18f   :  { %2750 = vst [vmem:[#allocation2 + $0x2b8] sm:$0xff] %v1389_v11  ;;  %3006 = vst [vmem:[#allocation2 + $0xab8] sm:$0xff] %v2157_v12  ;;  %v1392_v15 = vpop.f32.mrb[88].mxu0  ;;  %v2160_v16 = vpop.f32.mrb[88].mxu1  ;;  %v120_v12 = vld [vmem:[%s6889_s0 + $0x338] sm:$0xff] }
 0x190   :  { %v1393_v17 = vadd.f32 %v1392_v15, %v5351_v61  ;;  %v2161_v18 = vadd.f32 %v2160_v16, %v5351_v61  ;;  %v1394_v19 = vpop.f32.mrb[89].mxu0  ;;  %4262 = vmatmul.mubr.msk.f32.gmra.mrb[194].mxu0 %vm293_vm0, %v114_v13  ;;  %v2162_v20 = vpop.f32.mrb[89].mxu1  ;;  %4390 = vmatmul.mubr.msk.f32.gmra.mrb[194].mxu1 %vm293_vm0, %v242_v14  ;;  %v248_v13 = vld [vmem:[%s6889_s0 + $0x738] sm:$0xff] }
 0x191   :  { %v1395_v21 = vadd.f32 %v1394_v19, %v5355_v62  ;;  %v2163_v22 = vadd.f32 %v2162_v20, %v5355_v62  ;;  %1714 = vmatprep.mubr.f32.mxu0 %v4766_v3  ;;  %2482 = vmatprep.mubr.f32.mxu1 %v4766_v3 }
 0x192   :  { %2751 = vst [vmem:[#allocation2 + $0x2c0] sm:$0xff] %v1393_v17  ;;  %3007 = vst [vmem:[#allocation2 + $0xac0] sm:$0xff] %v2161_v18 }
 0x193   :  { %2752 = vst [vmem:[#allocation2 + $0x2c8] sm:$0xff] %v1395_v21  ;;  %3008 = vst [vmem:[#allocation2 + $0xac8] sm:$0xff] %v2163_v22  ;;  %v1398_v25 = vpop.f32.mrb[90].mxu0  ;;  %v2166_v26 = vpop.f32.mrb[90].mxu1  ;;  %v121_v22 = vld [vmem:[%s6889_s0 + $0x340] sm:$0xff] }
 0x194   :  { %v1399_v27 = vadd.f32 %v1398_v25, %v5351_v61  ;;  %v2167_v28 = vadd.f32 %v2166_v26, %v5351_v61  ;;  %v1400_v29 = vpop.f32.mrb[91].mxu0  ;;  %4263 = vmatmul.mubr.msk.f32.gmra.mrb[196].mxu0 %vm293_vm0, %v115_v23  ;;  %v2168_v30 = vpop.f32.mrb[91].mxu1  ;;  %4391 = vmatmul.mubr.msk.f32.gmra.mrb[196].mxu1 %vm293_vm0, %v243_v24  ;;  %v249_v23 = vld [vmem:[%s6889_s0 + $0x740] sm:$0xff] }
 0x195   :  { %v1401_v31 = vadd.f32 %v1400_v29, %v5355_v62  ;;  %v2169_v32 = vadd.f32 %v2168_v30, %v5355_v62  ;;  %1720 = vmatprep.mubr.f32.mxu0 %v4766_v3  ;;  %2488 = vmatprep.mubr.f32.mxu1 %v4766_v3 }
 0x196   :  { %2753 = vst [vmem:[#allocation2 + $0x2d0] sm:$0xff] %v1399_v27  ;;  %3009 = vst [vmem:[#allocation2 + $0xad0] sm:$0xff] %v2167_v28 }
 0x197   :  { %2754 = vst [vmem:[#allocation2 + $0x2d8] sm:$0xff] %v1401_v31  ;;  %3010 = vst [vmem:[#allocation2 + $0xad8] sm:$0xff] %v2169_v32  ;;  %v1404_v35 = vpop.f32.mrb[92].mxu0  ;;  %v2172_v36 = vpop.f32.mrb[92].mxu1  ;;  %v122_v32 = vld [vmem:[%s6889_s0 + $0x348] sm:$0xff] }
 0x198   :  { %v1405_v37 = vadd.f32 %v1404_v35, %v5351_v61  ;;  %v2173_v38 = vadd.f32 %v2172_v36, %v5351_v61  ;;  %v1406_v39 = vpop.f32.mrb[93].mxu0  ;;  %4264 = vmatmul.mubr.msk.f32.gmra.mrb[198].mxu0 %vm293_vm0, %v116_v33  ;;  %v2174_v40 = vpop.f32.mrb[93].mxu1  ;;  %4392 = vmatmul.mubr.msk.f32.gmra.mrb[198].mxu1 %vm293_vm0, %v244_v34  ;;  %v250_v33 = vld [vmem:[%s6889_s0 + $0x748] sm:$0xff] }
 0x199   :  { %v1407_v41 = vadd.f32 %v1406_v39, %v5355_v62  ;;  %v2175_v42 = vadd.f32 %v2174_v40, %v5355_v62  ;;  %1726 = vmatprep.mubr.f32.mxu0 %v4766_v3  ;;  %2494 = vmatprep.mubr.f32.mxu1 %v4766_v3 }
 0x19a   :  { %2755 = vst [vmem:[#allocation2 + $0x2e0] sm:$0xff] %v1405_v37  ;;  %3011 = vst [vmem:[#allocation2 + $0xae0] sm:$0xff] %v2173_v38 }
 0x19b   :  { %2756 = vst [vmem:[#allocation2 + $0x2e8] sm:$0xff] %v1407_v41  ;;  %3012 = vst [vmem:[#allocation2 + $0xae8] sm:$0xff] %v2175_v42  ;;  %v1410_v45 = vpop.f32.mrb[94].mxu0  ;;  %v2178_v46 = vpop.f32.mrb[94].mxu1  ;;  %v123_v42 = vld [vmem:[%s6889_s0 + $0x350] sm:$0xff] }
 0x19c   :  { %v1411_v47 = vadd.f32 %v1410_v45, %v5351_v61  ;;  %v2179_v48 = vadd.f32 %v2178_v46, %v5351_v61  ;;  %v1412_v49 = vpop.f32.mrb[95].mxu0  ;;  %4265 = vmatmul.mubr.msk.f32.gmra.mrb[200].mxu0 %vm293_vm0, %v117_v43  ;;  %v2180_v50 = vpop.f32.mrb[95].mxu1  ;;  %4393 = vmatmul.mubr.msk.f32.gmra.mrb[200].mxu1 %vm293_vm0, %v245_v44  ;;  %v251_v43 = vld [vmem:[%s6889_s0 + $0x750] sm:$0xff] }
 0x19d   :  { %v1413_v51 = vadd.f32 %v1412_v49, %v5355_v62  ;;  %v2181_v52 = vadd.f32 %v2180_v50, %v5355_v62  ;;  %1732 = vmatprep.mubr.f32.mxu0 %v4766_v3  ;;  %2500 = vmatprep.mubr.f32.mxu1 %v4766_v3 }
 0x19e   :  { %2757 = vst [vmem:[#allocation2 + $0x2f0] sm:$0xff] %v1411_v47  ;;  %3013 = vst [vmem:[#allocation2 + $0xaf0] sm:$0xff] %v2179_v48 }
 0x19f   :  { %2758 = vst [vmem:[#allocation2 + $0x2f8] sm:$0xff] %v1413_v51  ;;  %3014 = vst [vmem:[#allocation2 + $0xaf8] sm:$0xff] %v2181_v52  ;;  %v1416_v55 = vpop.f32.mrb[96].mxu0  ;;  %v2184_v56 = vpop.f32.mrb[96].mxu1  ;;  %v124_v52 = vld [vmem:[%s6889_s0 + $0x358] sm:$0xff] }
 0x1a0   :  { %v1417_v57 = vadd.f32 %v1416_v55, %v5351_v61  ;;  %v2185_v58 = vadd.f32 %v2184_v56, %v5351_v61  ;;  %v1418_v59 = vpop.f32.mrb[97].mxu0  ;;  %4266 = vmatmul.mubr.msk.f32.gmra.mrb[202].mxu0 %vm293_vm0, %v118_v53  ;;  %v2186_v60 = vpop.f32.mrb[97].mxu1  ;;  %4394 = vmatmul.mubr.msk.f32.gmra.mrb[202].mxu1 %vm293_vm0, %v246_v54  ;;  %v252_v53 = vld [vmem:[%s6889_s0 + $0x758] sm:$0xff] }
 0x1a1   :  { %v1419_v63 = vadd.f32 %v1418_v59, %v5355_v62  ;;  %v2187_v0 = vadd.f32 %v2186_v60, %v5355_v62  ;;  %1738 = vmatprep.mubr.f32.mxu0 %v4766_v3  ;;  %2506 = vmatprep.mubr.f32.mxu1 %v4766_v3 }
 0x1a2   :  { %2759 = vst [vmem:[#allocation2 + $0x300] sm:$0xff] %v1417_v57  ;;  %3015 = vst [vmem:[#allocation2 + $0xb00] sm:$0xff] %v2185_v58 }
 0x1a3   :  { %2760 = vst [vmem:[#allocation2 + $0x308] sm:$0xff] %v1419_v63  ;;  %3016 = vst [vmem:[#allocation2 + $0xb08] sm:$0xff] %v2187_v0  ;;  %v1422_v4 = vpop.f32.mrb[98].mxu0  ;;  %v2190_v5 = vpop.f32.mrb[98].mxu1  ;;  %v125_v0 = vld [vmem:[%s6889_s0 + $0x360] sm:$0xff] }
 0x1a4   :  { %v1423_v6 = vadd.f32 %v1422_v4, %v5351_v61  ;;  %v2191_v7 = vadd.f32 %v2190_v5, %v5351_v61  ;;  %v1424_v8 = vpop.f32.mrb[99].mxu0  ;;  %4267 = vmatmul.mubr.msk.f32.gmra.mrb[204].mxu0 %vm293_vm0, %v119_v1  ;;  %v2192_v9 = vpop.f32.mrb[99].mxu1  ;;  %4395 = vmatmul.mubr.msk.f32.gmra.mrb[204].mxu1 %vm293_vm0, %v247_v2  ;;  %v253_v1 = vld [vmem:[%s6889_s0 + $0x760] sm:$0xff] }
 0x1a5   :  { %v1425_v10 = vadd.f32 %v1424_v8, %v5355_v62  ;;  %v2193_v11 = vadd.f32 %v2192_v9, %v5355_v62  ;;  %1744 = vmatprep.mubr.f32.mxu0 %v4766_v3  ;;  %2512 = vmatprep.mubr.f32.mxu1 %v4766_v3 }
 0x1a6   :  { %2761 = vst [vmem:[#allocation2 + $0x310] sm:$0xff] %v1423_v6  ;;  %3017 = vst [vmem:[#allocation2 + $0xb10] sm:$0xff] %v2191_v7 }
 0x1a7   :  { %2762 = vst [vmem:[#allocation2 + $0x318] sm:$0xff] %v1425_v10  ;;  %3018 = vst [vmem:[#allocation2 + $0xb18] sm:$0xff] %v2193_v11  ;;  %v1428_v14 = vpop.f32.mrb[100].mxu0  ;;  %v2196_v15 = vpop.f32.mrb[100].mxu1  ;;  %v126_v11 = vld [vmem:[%s6889_s0 + $0x368] sm:$0xff] }
 0x1a8   :  { %v1429_v16 = vadd.f32 %v1428_v14, %v5351_v61  ;;  %v2197_v17 = vadd.f32 %v2196_v15, %v5351_v61  ;;  %v1430_v18 = vpop.f32.mrb[101].mxu0  ;;  %4268 = vmatmul.mubr.msk.f32.gmra.mrb[206].mxu0 %vm293_vm0, %v120_v12  ;;  %v2198_v19 = vpop.f32.mrb[101].mxu1  ;;  %4396 = vmatmul.mubr.msk.f32.gmra.mrb[206].mxu1 %vm293_vm0, %v248_v13  ;;  %v254_v12 = vld [vmem:[%s6889_s0 + $0x768] sm:$0xff] }
 0x1a9   :  { %v1431_v20 = vadd.f32 %v1430_v18, %v5355_v62  ;;  %v2199_v21 = vadd.f32 %v2198_v19, %v5355_v62  ;;  %1750 = vmatprep.mubr.f32.mxu0 %v4766_v3  ;;  %2518 = vmatprep.mubr.f32.mxu1 %v4766_v3 }
 0x1aa   :  { %2763 = vst [vmem:[#allocation2 + $0x320] sm:$0xff] %v1429_v16  ;;  %3019 = vst [vmem:[#allocation2 + $0xb20] sm:$0xff] %v2197_v17 }
 0x1ab   :  { %2764 = vst [vmem:[#allocation2 + $0x328] sm:$0xff] %v1431_v20  ;;  %3020 = vst [vmem:[#allocation2 + $0xb28] sm:$0xff] %v2199_v21  ;;  %v1434_v24 = vpop.f32.mrb[102].mxu0  ;;  %v2202_v25 = vpop.f32.mrb[102].mxu1  ;;  %v127_v21 = vld [vmem:[%s6889_s0 + $0x370] sm:$0xff] }
 0x1ac   :  { %v1435_v26 = vadd.f32 %v1434_v24, %v5351_v61  ;;  %v2203_v27 = vadd.f32 %v2202_v25, %v5351_v61  ;;  %v1436_v28 = vpop.f32.mrb[103].mxu0  ;;  %4269 = vmatmul.mubr.msk.f32.gmra.mrb[208].mxu0 %vm293_vm0, %v121_v22  ;;  %v2204_v29 = vpop.f32.mrb[103].mxu1  ;;  %4397 = vmatmul.mubr.msk.f32.gmra.mrb[208].mxu1 %vm293_vm0, %v249_v23  ;;  %v255_v22 = vld [vmem:[%s6889_s0 + $0x770] sm:$0xff] }
 0x1ad   :  { %v1437_v30 = vadd.f32 %v1436_v28, %v5355_v62  ;;  %v2205_v31 = vadd.f32 %v2204_v29, %v5355_v62  ;;  %1756 = vmatprep.mubr.f32.mxu0 %v4766_v3  ;;  %2524 = vmatprep.mubr.f32.mxu1 %v4766_v3 }
 0x1ae   :  { %2765 = vst [vmem:[#allocation2 + $0x330] sm:$0xff] %v1435_v26  ;;  %3021 = vst [vmem:[#allocation2 + $0xb30] sm:$0xff] %v2203_v27 }
 0x1af   :  { %2766 = vst [vmem:[#allocation2 + $0x338] sm:$0xff] %v1437_v30  ;;  %3022 = vst [vmem:[#allocation2 + $0xb38] sm:$0xff] %v2205_v31  ;;  %v1440_v34 = vpop.f32.mrb[104].mxu0  ;;  %v2208_v35 = vpop.f32.mrb[104].mxu1  ;;  %v128_v31 = vld [vmem:[%s6889_s0 + $0x378] sm:$0xff] }
 0x1b0   :  { %v1441_v36 = vadd.f32 %v1440_v34, %v5351_v61  ;;  %v2209_v37 = vadd.f32 %v2208_v35, %v5351_v61  ;;  %v1442_v38 = vpop.f32.mrb[105].mxu0  ;;  %4270 = vmatmul.mubr.msk.f32.gmra.mrb[210].mxu0 %vm293_vm0, %v122_v32  ;;  %v2210_v39 = vpop.f32.mrb[105].mxu1  ;;  %4398 = vmatmul.mubr.msk.f32.gmra.mrb[210].mxu1 %vm293_vm0, %v250_v33  ;;  %v256_v32 = vld [vmem:[%s6889_s0 + $0x778] sm:$0xff] }
 0x1b1   :  { %v1443_v40 = vadd.f32 %v1442_v38, %v5355_v62  ;;  %v2211_v41 = vadd.f32 %v2210_v39, %v5355_v62  ;;  %1762 = vmatprep.mubr.f32.mxu0 %v4766_v3  ;;  %2530 = vmatprep.mubr.f32.mxu1 %v4766_v3 }
 0x1b2   :  { %2767 = vst [vmem:[#allocation2 + $0x340] sm:$0xff] %v1441_v36  ;;  %3023 = vst [vmem:[#allocation2 + $0xb40] sm:$0xff] %v2209_v37 }
 0x1b3   :  { %2768 = vst [vmem:[#allocation2 + $0x348] sm:$0xff] %v1443_v40  ;;  %3024 = vst [vmem:[#allocation2 + $0xb48] sm:$0xff] %v2211_v41  ;;  %v1446_v44 = vpop.f32.mrb[106].mxu0  ;;  %v2214_v45 = vpop.f32.mrb[106].mxu1  ;;  %v129_v41 = vld [vmem:[%s6889_s0 + $0x380] sm:$0xff] }
 0x1b4   :  { %v1447_v46 = vadd.f32 %v1446_v44, %v5351_v61  ;;  %v2215_v47 = vadd.f32 %v2214_v45, %v5351_v61  ;;  %v1448_v48 = vpop.f32.mrb[107].mxu0  ;;  %4271 = vmatmul.mubr.msk.f32.gmra.mrb[212].mxu0 %vm293_vm0, %v123_v42  ;;  %v2216_v49 = vpop.f32.mrb[107].mxu1  ;;  %4399 = vmatmul.mubr.msk.f32.gmra.mrb[212].mxu1 %vm293_vm0, %v251_v43  ;;  %v257_v42 = vld [vmem:[%s6889_s0 + $0x780] sm:$0xff] }
 0x1b5   :  { %v1449_v50 = vadd.f32 %v1448_v48, %v5355_v62  ;;  %v2217_v51 = vadd.f32 %v2216_v49, %v5355_v62  ;;  %1768 = vmatprep.mubr.f32.mxu0 %v4766_v3  ;;  %2536 = vmatprep.mubr.f32.mxu1 %v4766_v3 }
 0x1b6   :  { %2769 = vst [vmem:[#allocation2 + $0x350] sm:$0xff] %v1447_v46  ;;  %3025 = vst [vmem:[#allocation2 + $0xb50] sm:$0xff] %v2215_v47 }
 0x1b7   :  { %2770 = vst [vmem:[#allocation2 + $0x358] sm:$0xff] %v1449_v50  ;;  %3026 = vst [vmem:[#allocation2 + $0xb58] sm:$0xff] %v2217_v51  ;;  %v1452_v54 = vpop.f32.mrb[108].mxu0  ;;  %v2220_v55 = vpop.f32.mrb[108].mxu1  ;;  %v130_v51 = vld [vmem:[%s6889_s0 + $0x388] sm:$0xff] }
 0x1b8   :  { %v1453_v56 = vadd.f32 %v1452_v54, %v5351_v61  ;;  %v2221_v57 = vadd.f32 %v2220_v55, %v5351_v61  ;;  %v1454_v58 = vpop.f32.mrb[109].mxu0  ;;  %4272 = vmatmul.mubr.msk.f32.gmra.mrb[214].mxu0 %vm293_vm0, %v124_v52  ;;  %v2222_v59 = vpop.f32.mrb[109].mxu1  ;;  %4400 = vmatmul.mubr.msk.f32.gmra.mrb[214].mxu1 %vm293_vm0, %v252_v53  ;;  %v258_v52 = vld [vmem:[%s6889_s0 + $0x788] sm:$0xff] }
 0x1b9   :  { %v1455_v60 = vadd.f32 %v1454_v58, %v5355_v62  ;;  %v2223_v63 = vadd.f32 %v2222_v59, %v5355_v62  ;;  %1774 = vmatprep.mubr.f32.mxu0 %v4766_v3  ;;  %2542 = vmatprep.mubr.f32.mxu1 %v4766_v3 }
 0x1ba   :  { %2771 = vst [vmem:[#allocation2 + $0x360] sm:$0xff] %v1453_v56  ;;  %3027 = vst [vmem:[#allocation2 + $0xb60] sm:$0xff] %v2221_v57 }
 0x1bb   :  { %2772 = vst [vmem:[#allocation2 + $0x368] sm:$0xff] %v1455_v60  ;;  %3028 = vst [vmem:[#allocation2 + $0xb68] sm:$0xff] %v2223_v63  ;;  %v1458_v2 = vpop.f32.mrb[110].mxu0  ;;  %v2226_v4 = vpop.f32.mrb[110].mxu1  ;;  %v131_v63 = vld [vmem:[%s6889_s0 + $0x390] sm:$0xff] }
 0x1bc   :  { %v1459_v5 = vadd.f32 %v1458_v2, %v5351_v61  ;;  %v2227_v6 = vadd.f32 %v2226_v4, %v5351_v61  ;;  %v1460_v7 = vpop.f32.mrb[111].mxu0  ;;  %4273 = vmatmul.mubr.msk.f32.gmra.mrb[216].mxu0 %vm293_vm0, %v125_v0  ;;  %v2228_v8 = vpop.f32.mrb[111].mxu1  ;;  %4401 = vmatmul.mubr.msk.f32.gmra.mrb[216].mxu1 %vm293_vm0, %v253_v1  ;;  %v259_v0 = vld [vmem:[%s6889_s0 + $0x790] sm:$0xff] }
 0x1bd   :  { %v1461_v9 = vadd.f32 %v1460_v7, %v5355_v62  ;;  %v2229_v10 = vadd.f32 %v2228_v8, %v5355_v62  ;;  %1780 = vmatprep.mubr.f32.mxu0 %v4766_v3  ;;  %2548 = vmatprep.mubr.f32.mxu1 %v4766_v3 }
 0x1be   :  { %2773 = vst [vmem:[#allocation2 + $0x370] sm:$0xff] %v1459_v5  ;;  %3029 = vst [vmem:[#allocation2 + $0xb70] sm:$0xff] %v2227_v6 }
 0x1bf   :  { %2774 = vst [vmem:[#allocation2 + $0x378] sm:$0xff] %v1461_v9  ;;  %3030 = vst [vmem:[#allocation2 + $0xb78] sm:$0xff] %v2229_v10  ;;  %v1464_v13 = vpop.f32.mrb[112].mxu0  ;;  %v2232_v14 = vpop.f32.mrb[112].mxu1  ;;  %v132_v10 = vld [vmem:[%s6889_s0 + $0x398] sm:$0xff] }
 0x1c0   :  { %v1465_v15 = vadd.f32 %v1464_v13, %v5351_v61  ;;  %v2233_v16 = vadd.f32 %v2232_v14, %v5351_v61  ;;  %v1466_v17 = vpop.f32.mrb[113].mxu0  ;;  %4274 = vmatmul.mubr.msk.f32.gmra.mrb[218].mxu0 %vm293_vm0, %v126_v11  ;;  %v2234_v18 = vpop.f32.mrb[113].mxu1  ;;  %4402 = vmatmul.mubr.msk.f32.gmra.mrb[218].mxu1 %vm293_vm0, %v254_v12  ;;  %v260_v11 = vld [vmem:[%s6889_s0 + $0x798] sm:$0xff] }
 0x1c1   :  { %v1467_v19 = vadd.f32 %v1466_v17, %v5355_v62  ;;  %v2235_v20 = vadd.f32 %v2234_v18, %v5355_v62  ;;  %1786 = vmatprep.mubr.f32.mxu0 %v4766_v3  ;;  %2554 = vmatprep.mubr.f32.mxu1 %v4766_v3 }
 0x1c2   :  { %2775 = vst [vmem:[#allocation2 + $0x380] sm:$0xff] %v1465_v15  ;;  %3031 = vst [vmem:[#allocation2 + $0xb80] sm:$0xff] %v2233_v16 }
 0x1c3   :  { %2776 = vst [vmem:[#allocation2 + $0x388] sm:$0xff] %v1467_v19  ;;  %3032 = vst [vmem:[#allocation2 + $0xb88] sm:$0xff] %v2235_v20  ;;  %v1470_v23 = vpop.f32.mrb[114].mxu0  ;;  %v2238_v24 = vpop.f32.mrb[114].mxu1  ;;  %v133_v20 = vld [vmem:[%s6889_s0 + $0x3a0] sm:$0xff] }
 0x1c4   :  { %v1471_v25 = vadd.f32 %v1470_v23, %v5351_v61  ;;  %v2239_v26 = vadd.f32 %v2238_v24, %v5351_v61  ;;  %v1472_v27 = vpop.f32.mrb[115].mxu0  ;;  %4275 = vmatmul.mubr.msk.f32.gmra.mrb[220].mxu0 %vm293_vm0, %v127_v21  ;;  %v2240_v28 = vpop.f32.mrb[115].mxu1  ;;  %4403 = vmatmul.mubr.msk.f32.gmra.mrb[220].mxu1 %vm293_vm0, %v255_v22  ;;  %v261_v21 = vld [vmem:[%s6889_s0 + $0x7a0] sm:$0xff] }
 0x1c5   :  { %v1473_v29 = vadd.f32 %v1472_v27, %v5355_v62  ;;  %v2241_v30 = vadd.f32 %v2240_v28, %v5355_v62  ;;  %1792 = vmatprep.mubr.f32.mxu0 %v4766_v3  ;;  %2560 = vmatprep.mubr.f32.mxu1 %v4766_v3 }
 0x1c6   :  { %2777 = vst [vmem:[#allocation2 + $0x390] sm:$0xff] %v1471_v25  ;;  %3033 = vst [vmem:[#allocation2 + $0xb90] sm:$0xff] %v2239_v26 }
 0x1c7   :  { %2778 = vst [vmem:[#allocation2 + $0x398] sm:$0xff] %v1473_v29  ;;  %3034 = vst [vmem:[#allocation2 + $0xb98] sm:$0xff] %v2241_v30  ;;  %v1476_v33 = vpop.f32.mrb[116].mxu0  ;;  %v2244_v34 = vpop.f32.mrb[116].mxu1  ;;  %v134_v30 = vld [vmem:[%s6889_s0 + $0x3a8] sm:$0xff] }
 0x1c8   :  { %v1477_v35 = vadd.f32 %v1476_v33, %v5351_v61  ;;  %v2245_v36 = vadd.f32 %v2244_v34, %v5351_v61  ;;  %v1478_v37 = vpop.f32.mrb[117].mxu0  ;;  %4276 = vmatmul.mubr.msk.f32.gmra.mrb[222].mxu0 %vm293_vm0, %v128_v31  ;;  %v2246_v38 = vpop.f32.mrb[117].mxu1  ;;  %4404 = vmatmul.mubr.msk.f32.gmra.mrb[222].mxu1 %vm293_vm0, %v256_v32  ;;  %v262_v31 = vld [vmem:[%s6889_s0 + $0x7a8] sm:$0xff] }
 0x1c9   :  { %v1479_v39 = vadd.f32 %v1478_v37, %v5355_v62  ;;  %v2247_v40 = vadd.f32 %v2246_v38, %v5355_v62  ;;  %1798 = vmatprep.mubr.f32.mxu0 %v4766_v3  ;;  %2566 = vmatprep.mubr.f32.mxu1 %v4766_v3 }
 0x1ca   :  { %2779 = vst [vmem:[#allocation2 + $0x3a0] sm:$0xff] %v1477_v35  ;;  %3035 = vst [vmem:[#allocation2 + $0xba0] sm:$0xff] %v2245_v36 }
 0x1cb   :  { %2780 = vst [vmem:[#allocation2 + $0x3a8] sm:$0xff] %v1479_v39  ;;  %3036 = vst [vmem:[#allocation2 + $0xba8] sm:$0xff] %v2247_v40  ;;  %v1482_v43 = vpop.f32.mrb[118].mxu0  ;;  %v2250_v44 = vpop.f32.mrb[118].mxu1  ;;  %v135_v40 = vld [vmem:[%s6889_s0 + $0x3b0] sm:$0xff] }
 0x1cc   :  { %v1483_v45 = vadd.f32 %v1482_v43, %v5351_v61  ;;  %v2251_v46 = vadd.f32 %v2250_v44, %v5351_v61  ;;  %v1484_v47 = vpop.f32.mrb[119].mxu0  ;;  %4277 = vmatmul.mubr.msk.f32.gmra.mrb[224].mxu0 %vm293_vm0, %v129_v41  ;;  %v2252_v48 = vpop.f32.mrb[119].mxu1  ;;  %4405 = vmatmul.mubr.msk.f32.gmra.mrb[224].mxu1 %vm293_vm0, %v257_v42  ;;  %v263_v41 = vld [vmem:[%s6889_s0 + $0x7b0] sm:$0xff] }
 0x1cd   :  { %v1485_v49 = vadd.f32 %v1484_v47, %v5355_v62  ;;  %v2253_v50 = vadd.f32 %v2252_v48, %v5355_v62  ;;  %1804 = vmatprep.mubr.f32.mxu0 %v4766_v3  ;;  %2572 = vmatprep.mubr.f32.mxu1 %v4766_v3 }
 0x1ce   :  { %2781 = vst [vmem:[#allocation2 + $0x3b0] sm:$0xff] %v1483_v45  ;;  %3037 = vst [vmem:[#allocation2 + $0xbb0] sm:$0xff] %v2251_v46 }
 0x1cf   :  { %2782 = vst [vmem:[#allocation2 + $0x3b8] sm:$0xff] %v1485_v49  ;;  %3038 = vst [vmem:[#allocation2 + $0xbb8] sm:$0xff] %v2253_v50  ;;  %v1488_v53 = vpop.f32.mrb[120].mxu0  ;;  %v2256_v54 = vpop.f32.mrb[120].mxu1  ;;  %v136_v50 = vld [vmem:[%s6889_s0 + $0x3b8] sm:$0xff] }
 0x1d0   :  { %v1489_v55 = vadd.f32 %v1488_v53, %v5351_v61  ;;  %v2257_v56 = vadd.f32 %v2256_v54, %v5351_v61  ;;  %v1490_v57 = vpop.f32.mrb[121].mxu0  ;;  %4278 = vmatmul.mubr.msk.f32.gmra.mrb[226].mxu0 %vm293_vm0, %v130_v51  ;;  %v2258_v58 = vpop.f32.mrb[121].mxu1  ;;  %4406 = vmatmul.mubr.msk.f32.gmra.mrb[226].mxu1 %vm293_vm0, %v258_v52  ;;  %v264_v51 = vld [vmem:[%s6889_s0 + $0x7b8] sm:$0xff] }
 0x1d1   :  { %v1491_v59 = vadd.f32 %v1490_v57, %v5355_v62  ;;  %v2259_v60 = vadd.f32 %v2258_v58, %v5355_v62  ;;  %1810 = vmatprep.mubr.f32.mxu0 %v4766_v3  ;;  %2578 = vmatprep.mubr.f32.mxu1 %v4766_v3 }
 0x1d2   :  { %2783 = vst [vmem:[#allocation2 + $0x3c0] sm:$0xff] %v1489_v55  ;;  %3039 = vst [vmem:[#allocation2 + $0xbc0] sm:$0xff] %v2257_v56 }
 0x1d3   :  { %2784 = vst [vmem:[#allocation2 + $0x3c8] sm:$0xff] %v1491_v59  ;;  %3040 = vst [vmem:[#allocation2 + $0xbc8] sm:$0xff] %v2259_v60  ;;  %v1494_v1 = vpop.f32.mrb[122].mxu0  ;;  %v2262_v2 = vpop.f32.mrb[122].mxu1  ;;  %v137_v60 = vld [vmem:[%s6889_s0 + $0x3c0] sm:$0xff] }
 0x1d4   :  { %v1495_v4 = vadd.f32 %v1494_v1, %v5351_v61  ;;  %v2263_v5 = vadd.f32 %v2262_v2, %v5351_v61  ;;  %v1496_v6 = vpop.f32.mrb[123].mxu0  ;;  %4279 = vmatmul.mubr.msk.f32.gmra.mrb[228].mxu0 %vm293_vm0, %v131_v63  ;;  %v2264_v7 = vpop.f32.mrb[123].mxu1  ;;  %4407 = vmatmul.mubr.msk.f32.gmra.mrb[228].mxu1 %vm293_vm0, %v259_v0  ;;  %v265_v63 = vld [vmem:[%s6889_s0 + $0x7c0] sm:$0xff] }
 0x1d5   :  { %v1497_v8 = vadd.f32 %v1496_v6, %v5355_v62  ;;  %v2265_v9 = vadd.f32 %v2264_v7, %v5355_v62  ;;  %1816 = vmatprep.mubr.f32.mxu0 %v4766_v3  ;;  %2584 = vmatprep.mubr.f32.mxu1 %v4766_v3 }
 0x1d6   :  { %2785 = vst [vmem:[#allocation2 + $0x3d0] sm:$0xff] %v1495_v4  ;;  %3041 = vst [vmem:[#allocation2 + $0xbd0] sm:$0xff] %v2263_v5 }
 0x1d7   :  { %2786 = vst [vmem:[#allocation2 + $0x3d8] sm:$0xff] %v1497_v8  ;;  %3042 = vst [vmem:[#allocation2 + $0xbd8] sm:$0xff] %v2265_v9  ;;  %v1500_v12 = vpop.f32.mrb[124].mxu0  ;;  %v2268_v13 = vpop.f32.mrb[124].mxu1  ;;  %v138_v9 = vld [vmem:[%s6889_s0 + $0x3c8] sm:$0xff] }
 0x1d8   :  { %v1501_v14 = vadd.f32 %v1500_v12, %v5351_v61  ;;  %v2269_v15 = vadd.f32 %v2268_v13, %v5351_v61  ;;  %v1502_v16 = vpop.f32.mrb[125].mxu0  ;;  %4280 = vmatmul.mubr.msk.f32.gmra.mrb[230].mxu0 %vm293_vm0, %v132_v10  ;;  %v2270_v17 = vpop.f32.mrb[125].mxu1  ;;  %4408 = vmatmul.mubr.msk.f32.gmra.mrb[230].mxu1 %vm293_vm0, %v260_v11  ;;  %v266_v10 = vld [vmem:[%s6889_s0 + $0x7c8] sm:$0xff] }
 0x1d9   :  { %v1503_v18 = vadd.f32 %v1502_v16, %v5355_v62  ;;  %v2271_v19 = vadd.f32 %v2270_v17, %v5355_v62  ;;  %1822 = vmatprep.mubr.f32.mxu0 %v4766_v3  ;;  %2590 = vmatprep.mubr.f32.mxu1 %v4766_v3 }
 0x1da   :  { %2787 = vst [vmem:[#allocation2 + $0x3e0] sm:$0xff] %v1501_v14  ;;  %3043 = vst [vmem:[#allocation2 + $0xbe0] sm:$0xff] %v2269_v15 }
 0x1db   :  { %2788 = vst [vmem:[#allocation2 + $0x3e8] sm:$0xff] %v1503_v18  ;;  %3044 = vst [vmem:[#allocation2 + $0xbe8] sm:$0xff] %v2271_v19  ;;  %v1506_v22 = vpop.f32.mrb[126].mxu0  ;;  %v2274_v23 = vpop.f32.mrb[126].mxu1  ;;  %v139_v19 = vld [vmem:[%s6889_s0 + $0x3d0] sm:$0xff] }
 0x1dc   :  { %v1507_v24 = vadd.f32 %v1506_v22, %v5351_v61  ;;  %v2275_v25 = vadd.f32 %v2274_v23, %v5351_v61  ;;  %v1508_v26 = vpop.f32.mrb[127].mxu0  ;;  %4281 = vmatmul.mubr.msk.f32.gmra.mrb[232].mxu0 %vm293_vm0, %v133_v20  ;;  %v2276_v27 = vpop.f32.mrb[127].mxu1  ;;  %4409 = vmatmul.mubr.msk.f32.gmra.mrb[232].mxu1 %vm293_vm0, %v261_v21  ;;  %v267_v20 = vld [vmem:[%s6889_s0 + $0x7d0] sm:$0xff] }
 0x1dd   :  { %v1509_v28 = vadd.f32 %v1508_v26, %v5355_v62  ;;  %v2277_v29 = vadd.f32 %v2276_v27, %v5355_v62  ;;  %1828 = vmatprep.mubr.f32.mxu0 %v4766_v3  ;;  %2596 = vmatprep.mubr.f32.mxu1 %v4766_v3 }
 0x1de   :  { %2789 = vst [vmem:[#allocation2 + $0x3f0] sm:$0xff] %v1507_v24  ;;  %3045 = vst [vmem:[#allocation2 + $0xbf0] sm:$0xff] %v2275_v25 }
 0x1df   :  { %2790 = vst [vmem:[#allocation2 + $0x3f8] sm:$0xff] %v1509_v28  ;;  %3046 = vst [vmem:[#allocation2 + $0xbf8] sm:$0xff] %v2277_v29  ;;  %v1512_v32 = vpop.f32.mrb[128].mxu0  ;;  %v2280_v33 = vpop.f32.mrb[128].mxu1  ;;  %v140_v29 = vld [vmem:[%s6889_s0 + $0x3d8] sm:$0xff] }
 0x1e0   :  { %v1513_v34 = vadd.f32 %v1512_v32, %v5351_v61  ;;  %v2281_v35 = vadd.f32 %v2280_v33, %v5351_v61  ;;  %v1514_v36 = vpop.f32.mrb[129].mxu0  ;;  %4282 = vmatmul.mubr.msk.f32.gmra.mrb[234].mxu0 %vm293_vm0, %v134_v30  ;;  %v2282_v37 = vpop.f32.mrb[129].mxu1  ;;  %4410 = vmatmul.mubr.msk.f32.gmra.mrb[234].mxu1 %vm293_vm0, %v262_v31  ;;  %v268_v30 = vld [vmem:[%s6889_s0 + $0x7d8] sm:$0xff] }
 0x1e1   :  { %v1515_v38 = vadd.f32 %v1514_v36, %v5355_v62  ;;  %v2283_v39 = vadd.f32 %v2282_v37, %v5355_v62  ;;  %1834 = vmatprep.mubr.f32.mxu0 %v4766_v3  ;;  %2602 = vmatprep.mubr.f32.mxu1 %v4766_v3 }
 0x1e2   :  { %2791 = vst [vmem:[#allocation2 + $0x400] sm:$0xff] %v1513_v34  ;;  %3047 = vst [vmem:[#allocation2 + $0xc00] sm:$0xff] %v2281_v35 }
 0x1e3   :  { %2792 = vst [vmem:[#allocation2 + $0x408] sm:$0xff] %v1515_v38  ;;  %3048 = vst [vmem:[#allocation2 + $0xc08] sm:$0xff] %v2283_v39  ;;  %v1518_v42 = vpop.f32.mrb[130].mxu0  ;;  %v2286_v43 = vpop.f32.mrb[130].mxu1  ;;  %v141_v39 = vld [vmem:[%s6889_s0 + $0x3e0] sm:$0xff] }
 0x1e4   :  { %v1519_v44 = vadd.f32 %v1518_v42, %v5351_v61  ;;  %v2287_v45 = vadd.f32 %v2286_v43, %v5351_v61  ;;  %v1520_v46 = vpop.f32.mrb[131].mxu0  ;;  %4283 = vmatmul.mubr.msk.f32.gmra.mrb[236].mxu0 %vm293_vm0, %v135_v40  ;;  %v2288_v47 = vpop.f32.mrb[131].mxu1  ;;  %4411 = vmatmul.mubr.msk.f32.gmra.mrb[236].mxu1 %vm293_vm0, %v263_v41  ;;  %v269_v40 = vld [vmem:[%s6889_s0 + $0x7e0] sm:$0xff] }
 0x1e5   :  { %v1521_v48 = vadd.f32 %v1520_v46, %v5355_v62  ;;  %v2289_v49 = vadd.f32 %v2288_v47, %v5355_v62  ;;  %1840 = vmatprep.mubr.f32.mxu0 %v4766_v3  ;;  %2608 = vmatprep.mubr.f32.mxu1 %v4766_v3 }
 0x1e6   :  { %2793 = vst [vmem:[#allocation2 + $0x410] sm:$0xff] %v1519_v44  ;;  %3049 = vst [vmem:[#allocation2 + $0xc10] sm:$0xff] %v2287_v45 }
 0x1e7   :  { %2794 = vst [vmem:[#allocation2 + $0x418] sm:$0xff] %v1521_v48  ;;  %3050 = vst [vmem:[#allocation2 + $0xc18] sm:$0xff] %v2289_v49  ;;  %v1524_v52 = vpop.f32.mrb[132].mxu0  ;;  %v2292_v53 = vpop.f32.mrb[132].mxu1  ;;  %v142_v49 = vld [vmem:[%s6889_s0 + $0x3e8] sm:$0xff] }
 0x1e8   :  { %v1525_v54 = vadd.f32 %v1524_v52, %v5351_v61  ;;  %v2293_v55 = vadd.f32 %v2292_v53, %v5351_v61  ;;  %v1526_v56 = vpop.f32.mrb[133].mxu0  ;;  %4284 = vmatmul.mubr.msk.f32.gmra.mrb[238].mxu0 %vm293_vm0, %v136_v50  ;;  %v2294_v57 = vpop.f32.mrb[133].mxu1  ;;  %4412 = vmatmul.mubr.msk.f32.gmra.mrb[238].mxu1 %vm293_vm0, %v264_v51  ;;  %v270_v50 = vld [vmem:[%s6889_s0 + $0x7e8] sm:$0xff] }
 0x1e9   :  { %v1527_v58 = vadd.f32 %v1526_v56, %v5355_v62  ;;  %v2295_v59 = vadd.f32 %v2294_v57, %v5355_v62  ;;  %1846 = vmatprep.mubr.f32.mxu0 %v4766_v3  ;;  %2614 = vmatprep.mubr.f32.mxu1 %v4766_v3 }
 0x1ea   :  { %2795 = vst [vmem:[#allocation2 + $0x420] sm:$0xff] %v1525_v54  ;;  %3051 = vst [vmem:[#allocation2 + $0xc20] sm:$0xff] %v2293_v55 }
 0x1eb   :  { %2796 = vst [vmem:[#allocation2 + $0x428] sm:$0xff] %v1527_v58  ;;  %3052 = vst [vmem:[#allocation2 + $0xc28] sm:$0xff] %v2295_v59  ;;  %v1530_v0 = vpop.f32.mrb[134].mxu0  ;;  %v2298_v1 = vpop.f32.mrb[134].mxu1  ;;  %v143_v59 = vld [vmem:[%s6889_s0 + $0x3f0] sm:$0xff] }
 0x1ec   :  { %v1531_v2 = vadd.f32 %v1530_v0, %v5351_v61  ;;  %v2299_v4 = vadd.f32 %v2298_v1, %v5351_v61  ;;  %v1532_v5 = vpop.f32.mrb[135].mxu0  ;;  %4285 = vmatmul.mubr.msk.f32.gmra.mrb[240].mxu0 %vm293_vm0, %v137_v60  ;;  %v2300_v6 = vpop.f32.mrb[135].mxu1  ;;  %4413 = vmatmul.mubr.msk.f32.gmra.mrb[240].mxu1 %vm293_vm0, %v265_v63  ;;  %v271_v60 = vld [vmem:[%s6889_s0 + $0x7f0] sm:$0xff] }
 0x1ed   :  { %v1533_v7 = vadd.f32 %v1532_v5, %v5355_v62  ;;  %v2301_v8 = vadd.f32 %v2300_v6, %v5355_v62  ;;  %1852 = vmatprep.mubr.f32.mxu0 %v4766_v3  ;;  %2620 = vmatprep.mubr.f32.mxu1 %v4766_v3 }
 0x1ee   :  { %2797 = vst [vmem:[#allocation2 + $0x430] sm:$0xff] %v1531_v2  ;;  %3053 = vst [vmem:[#allocation2 + $0xc30] sm:$0xff] %v2299_v4 }
 0x1ef   :  { %2798 = vst [vmem:[#allocation2 + $0x438] sm:$0xff] %v1533_v7  ;;  %3054 = vst [vmem:[#allocation2 + $0xc38] sm:$0xff] %v2301_v8  ;;  %v1536_v11 = vpop.f32.mrb[136].mxu0  ;;  %v2304_v12 = vpop.f32.mrb[136].mxu1  ;;  %v144_v8 = vld [vmem:[%s6889_s0 + $0x3f8] sm:$0xff] }
 0x1f0   :  { %v1537_v13 = vadd.f32 %v1536_v11, %v5351_v61  ;;  %v2305_v14 = vadd.f32 %v2304_v12, %v5351_v61  ;;  %v1538_v15 = vpop.f32.mrb[137].mxu0  ;;  %4286 = vmatmul.mubr.msk.f32.gmra.mrb[242].mxu0 %vm293_vm0, %v138_v9  ;;  %v2306_v16 = vpop.f32.mrb[137].mxu1  ;;  %4414 = vmatmul.mubr.msk.f32.gmra.mrb[242].mxu1 %vm293_vm0, %v266_v10  ;;  %v272_v9 = vld [vmem:[%s6889_s0 + $0x7f8] sm:$0xff] }
 0x1f1   :  { %v1539_v17 = vadd.f32 %v1538_v15, %v5355_v62  ;;  %v2307_v18 = vadd.f32 %v2306_v16, %v5355_v62  ;;  %1858 = vmatprep.mubr.f32.mxu0 %v4766_v3  ;;  %2626 = vmatprep.mubr.f32.mxu1 %v4766_v3 }
 0x1f2   :  { %2799 = vst [vmem:[#allocation2 + $0x440] sm:$0xff] %v1537_v13  ;;  %3055 = vst [vmem:[#allocation2 + $0xc40] sm:$0xff] %v2305_v14 }
 0x1f3   :  { %2800 = vst [vmem:[#allocation2 + $0x448] sm:$0xff] %v1539_v17  ;;  %3056 = vst [vmem:[#allocation2 + $0xc48] sm:$0xff] %v2307_v18  ;;  %v1542_v21 = vpop.f32.mrb[138].mxu0  ;;  %v2310_v22 = vpop.f32.mrb[138].mxu1 }
 0x1f4   :  { %v1543_v23 = vadd.f32 %v1542_v21, %v5351_v61  ;;  %v2311_v24 = vadd.f32 %v2310_v22, %v5351_v61  ;;  %v1544_v25 = vpop.f32.mrb[139].mxu0  ;;  %4287 = vmatmul.mubr.msk.f32.gmra.mrb[244].mxu0 %vm293_vm0, %v139_v19  ;;  %v2312_v26 = vpop.f32.mrb[139].mxu1  ;;  %4415 = vmatmul.mubr.msk.f32.gmra.mrb[244].mxu1 %vm293_vm0, %v267_v20 }
 0x1f5   :  { %v1545_v27 = vadd.f32 %v1544_v25, %v5355_v62  ;;  %v2313_v28 = vadd.f32 %v2312_v26, %v5355_v62  ;;  %1864 = vmatprep.mubr.f32.mxu0 %v4766_v3  ;;  %2632 = vmatprep.mubr.f32.mxu1 %v4766_v3 }
 0x1f6   :  { %2801 = vst [vmem:[#allocation2 + $0x450] sm:$0xff] %v1543_v23  ;;  %3057 = vst [vmem:[#allocation2 + $0xc50] sm:$0xff] %v2311_v24 }
 0x1f7   :  { %2802 = vst [vmem:[#allocation2 + $0x458] sm:$0xff] %v1545_v27  ;;  %3058 = vst [vmem:[#allocation2 + $0xc58] sm:$0xff] %v2313_v28  ;;  %v1548_v31 = vpop.f32.mrb[140].mxu0  ;;  %v2316_v32 = vpop.f32.mrb[140].mxu1 }
 0x1f8   :  { %v1549_v33 = vadd.f32 %v1548_v31, %v5351_v61  ;;  %v2317_v34 = vadd.f32 %v2316_v32, %v5351_v61  ;;  %v1550_v35 = vpop.f32.mrb[141].mxu0  ;;  %4288 = vmatmul.mubr.msk.f32.gmra.mrb[246].mxu0 %vm293_vm0, %v140_v29  ;;  %v2318_v36 = vpop.f32.mrb[141].mxu1  ;;  %4416 = vmatmul.mubr.msk.f32.gmra.mrb[246].mxu1 %vm293_vm0, %v268_v30 }
 0x1f9   :  { %v1551_v37 = vadd.f32 %v1550_v35, %v5355_v62  ;;  %v2319_v38 = vadd.f32 %v2318_v36, %v5355_v62  ;;  %1870 = vmatprep.mubr.f32.mxu0 %v4766_v3  ;;  %2638 = vmatprep.mubr.f32.mxu1 %v4766_v3 }
 0x1fa   :  { %2803 = vst [vmem:[#allocation2 + $0x460] sm:$0xff] %v1549_v33  ;;  %3059 = vst [vmem:[#allocation2 + $0xc60] sm:$0xff] %v2317_v34 }
 0x1fb   :  { %2804 = vst [vmem:[#allocation2 + $0x468] sm:$0xff] %v1551_v37  ;;  %3060 = vst [vmem:[#allocation2 + $0xc68] sm:$0xff] %v2319_v38  ;;  %v1554_v41 = vpop.f32.mrb[142].mxu0  ;;  %v2322_v42 = vpop.f32.mrb[142].mxu1 }
 0x1fc   :  { %v1555_v43 = vadd.f32 %v1554_v41, %v5351_v61  ;;  %v2323_v44 = vadd.f32 %v2322_v42, %v5351_v61  ;;  %v1556_v45 = vpop.f32.mrb[143].mxu0  ;;  %4289 = vmatmul.mubr.msk.f32.gmra.mrb[248].mxu0 %vm293_vm0, %v141_v39  ;;  %v2324_v46 = vpop.f32.mrb[143].mxu1  ;;  %4417 = vmatmul.mubr.msk.f32.gmra.mrb[248].mxu1 %vm293_vm0, %v269_v40 }
 0x1fd   :  { %v1557_v47 = vadd.f32 %v1556_v45, %v5355_v62  ;;  %v2325_v48 = vadd.f32 %v2324_v46, %v5355_v62  ;;  %1876 = vmatprep.mubr.f32.mxu0 %v4766_v3  ;;  %2644 = vmatprep.mubr.f32.mxu1 %v4766_v3 }
 0x1fe   :  { %2805 = vst [vmem:[#allocation2 + $0x470] sm:$0xff] %v1555_v43  ;;  %3061 = vst [vmem:[#allocation2 + $0xc70] sm:$0xff] %v2323_v44 }
 0x1ff   :  { %2806 = vst [vmem:[#allocation2 + $0x478] sm:$0xff] %v1557_v47  ;;  %3062 = vst [vmem:[#allocation2 + $0xc78] sm:$0xff] %v2325_v48  ;;  %v1560_v51 = vpop.f32.mrb[144].mxu0  ;;  %v2328_v52 = vpop.f32.mrb[144].mxu1 }
 0x200   :  { %v1561_v53 = vadd.f32 %v1560_v51, %v5351_v61  ;;  %v2329_v54 = vadd.f32 %v2328_v52, %v5351_v61  ;;  %v1562_v55 = vpop.f32.mrb[145].mxu0  ;;  %4290 = vmatmul.mubr.msk.f32.gmra.mrb[250].mxu0 %vm293_vm0, %v142_v49  ;;  %v2330_v56 = vpop.f32.mrb[145].mxu1  ;;  %4418 = vmatmul.mubr.msk.f32.gmra.mrb[250].mxu1 %vm293_vm0, %v270_v50 }
 0x201   :  { %v1563_v57 = vadd.f32 %v1562_v55, %v5355_v62  ;;  %v2331_v58 = vadd.f32 %v2330_v56, %v5355_v62  ;;  %1882 = vmatprep.mubr.f32.mxu0 %v4766_v3  ;;  %2650 = vmatprep.mubr.f32.mxu1 %v4766_v3 }
 0x202   :  { %2807 = vst [vmem:[#allocation2 + $0x480] sm:$0xff] %v1561_v53  ;;  %3063 = vst [vmem:[#allocation2 + $0xc80] sm:$0xff] %v2329_v54 }
 0x203   :  { %2808 = vst [vmem:[#allocation2 + $0x488] sm:$0xff] %v1563_v57  ;;  %3064 = vst [vmem:[#allocation2 + $0xc88] sm:$0xff] %v2331_v58  ;;  %v1566_v63 = vpop.f32.mrb[146].mxu0  ;;  %v2334_v0 = vpop.f32.mrb[146].mxu1 }
 0x204   :  { %v1567_v1 = vadd.f32 %v1566_v63, %v5351_v61  ;;  %v2335_v2 = vadd.f32 %v2334_v0, %v5351_v61  ;;  %v1568_v4 = vpop.f32.mrb[147].mxu0  ;;  %4291 = vmatmul.mubr.msk.f32.gmra.mrb[252].mxu0 %vm293_vm0, %v143_v59  ;;  %v2336_v5 = vpop.f32.mrb[147].mxu1  ;;  %4419 = vmatmul.mubr.msk.f32.gmra.mrb[252].mxu1 %vm293_vm0, %v271_v60 }
 0x205   :  { %v1569_v6 = vadd.f32 %v1568_v4, %v5355_v62  ;;  %v2337_v7 = vadd.f32 %v2336_v5, %v5355_v62  ;;  %1888 = vmatprep.mubr.f32.mxu0 %v4766_v3  ;;  %2656 = vmatprep.mubr.f32.mxu1 %v4766_v3 }
 0x206   :  { %2809 = vst [vmem:[#allocation2 + $0x490] sm:$0xff] %v1567_v1  ;;  %3065 = vst [vmem:[#allocation2 + $0xc90] sm:$0xff] %v2335_v2 }
 0x207   :  { %2810 = vst [vmem:[#allocation2 + $0x498] sm:$0xff] %v1569_v6  ;;  %3066 = vst [vmem:[#allocation2 + $0xc98] sm:$0xff] %v2337_v7  ;;  %v1572_v10 = vpop.f32.mrb[148].mxu0  ;;  %v2340_v11 = vpop.f32.mrb[148].mxu1 }
 0x208   :  { %v1573_v12 = vadd.f32 %v1572_v10, %v5351_v61  ;;  %v2341_v13 = vadd.f32 %v2340_v11, %v5351_v61  ;;  %v1574_v14 = vpop.f32.mrb[149].mxu0  ;;  %4292 = vmatmul.mubr.msk.f32.gmra.mrb[254].mxu0 %vm293_vm0, %v144_v8  ;;  %v2342_v3 = vpop.f32.mrb[149].mxu1  ;;  %4420 = vmatmul.mubr.msk.f32.gmra.mrb[254].mxu1 %vm293_vm0, %v272_v9 }
 0x209   :  { %v1575_v15 = vadd.f32 %v1574_v14, %v5355_v62  ;;  %v2343_v16 = vadd.f32 %v2342_v3, %v5355_v62 }
 0x20a   :  { %2811 = vst [vmem:[#allocation2 + $0x4a0] sm:$0xff] %v1573_v12  ;;  %3067 = vst [vmem:[#allocation2 + $0xca0] sm:$0xff] %v2341_v13 }
 0x20b   :  { %2812 = vst [vmem:[#allocation2 + $0x4a8] sm:$0xff] %v1575_v15  ;;  %3068 = vst [vmem:[#allocation2 + $0xca8] sm:$0xff] %v2343_v16  ;;  %v1578_v17 = vpop.f32.mrb[150].mxu0  ;;  %v2346_v18 = vpop.f32.mrb[150].mxu1 }
 0x20c   :  { %v1579_v19 = vadd.f32 %v1578_v17, %v5351_v61  ;;  %v2347_v20 = vadd.f32 %v2346_v18, %v5351_v61  ;;  %v1580_v21 = vpop.f32.mrb[151].mxu0  ;;  %v2348_v22 = vpop.f32.mrb[151].mxu1 }
 0x20d   :  { %v1581_v23 = vadd.f32 %v1580_v21, %v5355_v62  ;;  %v2349_v24 = vadd.f32 %v2348_v22, %v5355_v62 }
 0x20e   :  { %2813 = vst [vmem:[#allocation2 + $0x4b0] sm:$0xff] %v1579_v19  ;;  %3069 = vst [vmem:[#allocation2 + $0xcb0] sm:$0xff] %v2347_v20 }
 0x20f   :  { %2814 = vst [vmem:[#allocation2 + $0x4b8] sm:$0xff] %v1581_v23  ;;  %3070 = vst [vmem:[#allocation2 + $0xcb8] sm:$0xff] %v2349_v24  ;;  %v1584_v25 = vpop.f32.mrb[152].mxu0  ;;  %v2352_v26 = vpop.f32.mrb[152].mxu1 }
 0x210   :  { %v1585_v27 = vadd.f32 %v1584_v25, %v5351_v61  ;;  %v2353_v28 = vadd.f32 %v2352_v26, %v5351_v61  ;;  %v1586_v29 = vpop.f32.mrb[153].mxu0  ;;  %v2354_v30 = vpop.f32.mrb[153].mxu1 }
 0x211   :  { %v1587_v31 = vadd.f32 %v1586_v29, %v5355_v62  ;;  %v2355_v32 = vadd.f32 %v2354_v30, %v5355_v62 }
 0x212   :  { %2815 = vst [vmem:[#allocation2 + $0x4c0] sm:$0xff] %v1585_v27  ;;  %3071 = vst [vmem:[#allocation2 + $0xcc0] sm:$0xff] %v2353_v28 }
 0x213   :  { %2816 = vst [vmem:[#allocation2 + $0x4c8] sm:$0xff] %v1587_v31  ;;  %3072 = vst [vmem:[#allocation2 + $0xcc8] sm:$0xff] %v2355_v32  ;;  %v1590_v33 = vpop.f32.mrb[154].mxu0  ;;  %v2358_v34 = vpop.f32.mrb[154].mxu1 }
 0x214   :  { %v1591_v35 = vadd.f32 %v1590_v33, %v5351_v61  ;;  %v2359_v36 = vadd.f32 %v2358_v34, %v5351_v61  ;;  %v1592_v37 = vpop.f32.mrb[155].mxu0  ;;  %v2360_v38 = vpop.f32.mrb[155].mxu1 }
 0x215   :  { %v1593_v39 = vadd.f32 %v1592_v37, %v5355_v62  ;;  %v2361_v40 = vadd.f32 %v2360_v38, %v5355_v62 }
 0x216   :  { %2817 = vst [vmem:[#allocation2 + $0x4d0] sm:$0xff] %v1591_v35  ;;  %3073 = vst [vmem:[#allocation2 + $0xcd0] sm:$0xff] %v2359_v36 }
 0x217   :  { %2818 = vst [vmem:[#allocation2 + $0x4d8] sm:$0xff] %v1593_v39  ;;  %3074 = vst [vmem:[#allocation2 + $0xcd8] sm:$0xff] %v2361_v40  ;;  %v1596_v41 = vpop.f32.mrb[156].mxu0  ;;  %v2364_v42 = vpop.f32.mrb[156].mxu1 }
 0x218   :  { %v1597_v43 = vadd.f32 %v1596_v41, %v5351_v61  ;;  %v2365_v44 = vadd.f32 %v2364_v42, %v5351_v61  ;;  %v1598_v45 = vpop.f32.mrb[157].mxu0  ;;  %v2366_v46 = vpop.f32.mrb[157].mxu1 }
 0x219   :  { %v1599_v47 = vadd.f32 %v1598_v45, %v5355_v62  ;;  %v2367_v48 = vadd.f32 %v2366_v46, %v5355_v62 }
 0x21a   :  { %2819 = vst [vmem:[#allocation2 + $0x4e0] sm:$0xff] %v1597_v43  ;;  %3075 = vst [vmem:[#allocation2 + $0xce0] sm:$0xff] %v2365_v44 }
 0x21b   :  { %2820 = vst [vmem:[#allocation2 + $0x4e8] sm:$0xff] %v1599_v47  ;;  %3076 = vst [vmem:[#allocation2 + $0xce8] sm:$0xff] %v2367_v48  ;;  %v1602_v49 = vpop.f32.mrb[158].mxu0  ;;  %v2370_v50 = vpop.f32.mrb[158].mxu1 }
 0x21c   :  { %v1603_v51 = vadd.f32 %v1602_v49, %v5351_v61  ;;  %v2371_v52 = vadd.f32 %v2370_v50, %v5351_v61  ;;  %v1604_v53 = vpop.f32.mrb[159].mxu0  ;;  %v2372_v54 = vpop.f32.mrb[159].mxu1 }
 0x21d   :  { %v1605_v55 = vadd.f32 %v1604_v53, %v5355_v62  ;;  %v2373_v56 = vadd.f32 %v2372_v54, %v5355_v62 }
 0x21e   :  { %2821 = vst [vmem:[#allocation2 + $0x4f0] sm:$0xff] %v1603_v51  ;;  %3077 = vst [vmem:[#allocation2 + $0xcf0] sm:$0xff] %v2371_v52 }
 0x21f   :  { %2822 = vst [vmem:[#allocation2 + $0x4f8] sm:$0xff] %v1605_v55  ;;  %3078 = vst [vmem:[#allocation2 + $0xcf8] sm:$0xff] %v2373_v56  ;;  %v1608_v57 = vpop.f32.mrb[160].mxu0  ;;  %v2376_v58 = vpop.f32.mrb[160].mxu1 }
 0x220   :  { %v1609_v59 = vadd.f32 %v1608_v57, %v5351_v61  ;;  %v2377_v60 = vadd.f32 %v2376_v58, %v5351_v61  ;;  %v1610_v63 = vpop.f32.mrb[161].mxu0  ;;  %v2378_v0 = vpop.f32.mrb[161].mxu1 }
 0x221   :  { %v1611_v1 = vadd.f32 %v1610_v63, %v5355_v62  ;;  %v2379_v2 = vadd.f32 %v2378_v0, %v5355_v62 }
 0x222   :  { %2823 = vst [vmem:[#allocation2 + $0x500] sm:$0xff] %v1609_v59  ;;  %3079 = vst [vmem:[#allocation2 + $0xd00] sm:$0xff] %v2377_v60 }
 0x223   :  { %2824 = vst [vmem:[#allocation2 + $0x508] sm:$0xff] %v1611_v1  ;;  %3080 = vst [vmem:[#allocation2 + $0xd08] sm:$0xff] %v2379_v2  ;;  %v1614_v4 = vpop.f32.mrb[162].mxu0  ;;  %v2382_v5 = vpop.f32.mrb[162].mxu1 }
 0x224   :  { %v1615_v6 = vadd.f32 %v1614_v4, %v5351_v61  ;;  %v2383_v7 = vadd.f32 %v2382_v5, %v5351_v61  ;;  %v1616_v8 = vpop.f32.mrb[163].mxu0  ;;  %v2384_v9 = vpop.f32.mrb[163].mxu1 }
 0x225   :  { %v1617_v10 = vadd.f32 %v1616_v8, %v5355_v62  ;;  %v2385_v11 = vadd.f32 %v2384_v9, %v5355_v62 }
 0x226   :  { %2825 = vst [vmem:[#allocation2 + $0x510] sm:$0xff] %v1615_v6  ;;  %3081 = vst [vmem:[#allocation2 + $0xd10] sm:$0xff] %v2383_v7 }
 0x227   :  { %2826 = vst [vmem:[#allocation2 + $0x518] sm:$0xff] %v1617_v10  ;;  %3082 = vst [vmem:[#allocation2 + $0xd18] sm:$0xff] %v2385_v11  ;;  %v1620_v12 = vpop.f32.mrb[164].mxu0  ;;  %v2388_v13 = vpop.f32.mrb[164].mxu1 }
 0x228   :  { %v1621_v14 = vadd.f32 %v1620_v12, %v5351_v61  ;;  %v2389_v3 = vadd.f32 %v2388_v13, %v5351_v61  ;;  %v1622_v15 = vpop.f32.mrb[165].mxu0  ;;  %v2390_v16 = vpop.f32.mrb[165].mxu1 }
 0x229   :  { %v1623_v17 = vadd.f32 %v1622_v15, %v5355_v62  ;;  %v2391_v18 = vadd.f32 %v2390_v16, %v5355_v62 }
 0x22a   :  { %2827 = vst [vmem:[#allocation2 + $0x520] sm:$0xff] %v1621_v14  ;;  %3083 = vst [vmem:[#allocation2 + $0xd20] sm:$0xff] %v2389_v3 }
 0x22b   :  { %2828 = vst [vmem:[#allocation2 + $0x528] sm:$0xff] %v1623_v17  ;;  %3084 = vst [vmem:[#allocation2 + $0xd28] sm:$0xff] %v2391_v18  ;;  %v1626_v19 = vpop.f32.mrb[166].mxu0  ;;  %v2394_v20 = vpop.f32.mrb[166].mxu1 }
 0x22c   :  { %v1627_v21 = vadd.f32 %v1626_v19, %v5351_v61  ;;  %v2395_v22 = vadd.f32 %v2394_v20, %v5351_v61  ;;  %v1628_v23 = vpop.f32.mrb[167].mxu0  ;;  %v2396_v24 = vpop.f32.mrb[167].mxu1 }
 0x22d   :  { %v1629_v25 = vadd.f32 %v1628_v23, %v5355_v62  ;;  %v2397_v26 = vadd.f32 %v2396_v24, %v5355_v62 }
 0x22e   :  { %2829 = vst [vmem:[#allocation2 + $0x530] sm:$0xff] %v1627_v21  ;;  %3085 = vst [vmem:[#allocation2 + $0xd30] sm:$0xff] %v2395_v22 }
 0x22f   :  { %2830 = vst [vmem:[#allocation2 + $0x538] sm:$0xff] %v1629_v25  ;;  %3086 = vst [vmem:[#allocation2 + $0xd38] sm:$0xff] %v2397_v26  ;;  %v1632_v27 = vpop.f32.mrb[168].mxu0  ;;  %v2400_v28 = vpop.f32.mrb[168].mxu1 }
 0x230   :  { %v1633_v29 = vadd.f32 %v1632_v27, %v5351_v61  ;;  %v2401_v30 = vadd.f32 %v2400_v28, %v5351_v61  ;;  %v1634_v31 = vpop.f32.mrb[169].mxu0  ;;  %v2402_v32 = vpop.f32.mrb[169].mxu1 }
 0x231   :  { %v1635_v33 = vadd.f32 %v1634_v31, %v5355_v62  ;;  %v2403_v34 = vadd.f32 %v2402_v32, %v5355_v62 }
 0x232   :  { %2831 = vst [vmem:[#allocation2 + $0x540] sm:$0xff] %v1633_v29  ;;  %3087 = vst [vmem:[#allocation2 + $0xd40] sm:$0xff] %v2401_v30 }
 0x233   :  { %2832 = vst [vmem:[#allocation2 + $0x548] sm:$0xff] %v1635_v33  ;;  %3088 = vst [vmem:[#allocation2 + $0xd48] sm:$0xff] %v2403_v34  ;;  %v1638_v35 = vpop.f32.mrb[170].mxu0  ;;  %v2406_v36 = vpop.f32.mrb[170].mxu1 }
 0x234   :  { %v1639_v37 = vadd.f32 %v1638_v35, %v5351_v61  ;;  %v2407_v38 = vadd.f32 %v2406_v36, %v5351_v61  ;;  %v1640_v39 = vpop.f32.mrb[171].mxu0  ;;  %v2408_v40 = vpop.f32.mrb[171].mxu1 }
 0x235   :  { %v1641_v41 = vadd.f32 %v1640_v39, %v5355_v62  ;;  %v2409_v42 = vadd.f32 %v2408_v40, %v5355_v62 }
 0x236   :  { %2833 = vst [vmem:[#allocation2 + $0x550] sm:$0xff] %v1639_v37  ;;  %3089 = vst [vmem:[#allocation2 + $0xd50] sm:$0xff] %v2407_v38 }
 0x237   :  { %2834 = vst [vmem:[#allocation2 + $0x558] sm:$0xff] %v1641_v41  ;;  %3090 = vst [vmem:[#allocation2 + $0xd58] sm:$0xff] %v2409_v42  ;;  %v1644_v43 = vpop.f32.mrb[172].mxu0  ;;  %v2412_v44 = vpop.f32.mrb[172].mxu1 }
 0x238   :  { %v1645_v45 = vadd.f32 %v1644_v43, %v5351_v61  ;;  %v2413_v46 = vadd.f32 %v2412_v44, %v5351_v61  ;;  %v1646_v47 = vpop.f32.mrb[173].mxu0  ;;  %v2414_v48 = vpop.f32.mrb[173].mxu1 }
 0x239   :  { %v1647_v49 = vadd.f32 %v1646_v47, %v5355_v62  ;;  %v2415_v50 = vadd.f32 %v2414_v48, %v5355_v62 }
 0x23a   :  { %2835 = vst [vmem:[#allocation2 + $0x560] sm:$0xff] %v1645_v45  ;;  %3091 = vst [vmem:[#allocation2 + $0xd60] sm:$0xff] %v2413_v46 }
 0x23b   :  { %2836 = vst [vmem:[#allocation2 + $0x568] sm:$0xff] %v1647_v49  ;;  %3092 = vst [vmem:[#allocation2 + $0xd68] sm:$0xff] %v2415_v50  ;;  %v1650_v51 = vpop.f32.mrb[174].mxu0  ;;  %v2418_v52 = vpop.f32.mrb[174].mxu1 }
 0x23c   :  { %v1651_v53 = vadd.f32 %v1650_v51, %v5351_v61  ;;  %v2419_v54 = vadd.f32 %v2418_v52, %v5351_v61  ;;  %v1652_v55 = vpop.f32.mrb[175].mxu0  ;;  %v2420_v56 = vpop.f32.mrb[175].mxu1 }
 0x23d   :  { %v1653_v57 = vadd.f32 %v1652_v55, %v5355_v62  ;;  %v2421_v58 = vadd.f32 %v2420_v56, %v5355_v62 }
 0x23e   :  { %2837 = vst [vmem:[#allocation2 + $0x570] sm:$0xff] %v1651_v53  ;;  %3093 = vst [vmem:[#allocation2 + $0xd70] sm:$0xff] %v2419_v54 }
 0x23f   :  { %2838 = vst [vmem:[#allocation2 + $0x578] sm:$0xff] %v1653_v57  ;;  %3094 = vst [vmem:[#allocation2 + $0xd78] sm:$0xff] %v2421_v58  ;;  %v1656_v59 = vpop.f32.mrb[176].mxu0  ;;  %v2424_v60 = vpop.f32.mrb[176].mxu1 }
 0x240   :  { %v1657_v63 = vadd.f32 %v1656_v59, %v5351_v61  ;;  %v2425_v0 = vadd.f32 %v2424_v60, %v5351_v61  ;;  %v1658_v1 = vpop.f32.mrb[177].mxu0  ;;  %v2426_v2 = vpop.f32.mrb[177].mxu1 }
 0x241   :  { %v1659_v4 = vadd.f32 %v1658_v1, %v5355_v62  ;;  %v2427_v5 = vadd.f32 %v2426_v2, %v5355_v62  ;;  %v6492_v1 = vld [vmem:[%s6891_s3] sm:$0xff]  ;;  %v6497_v2 = vld [vmem:[%s6891_s3 + $0x8] sm:$0xff] }
 0x242   :  { %2839 = vst [vmem:[#allocation2 + $0x580] sm:$0xff] %v1657_v63  ;;  %3095 = vst [vmem:[#allocation2 + $0xd80] sm:$0xff] %v2425_v0 }
 0x243   :  { %2840 = vst [vmem:[#allocation2 + $0x588] sm:$0xff] %v1659_v4  ;;  %3096 = vst [vmem:[#allocation2 + $0xd88] sm:$0xff] %v2427_v5  ;;  %v1662_v6 = vpop.f32.mrb[178].mxu0  ;;  %v2430_v7 = vpop.f32.mrb[178].mxu1  ;;  %v6502_v4 = vld [vmem:[%s6891_s3 + $0x10] sm:$0xff] }
 0x244   :  { %v1663_v8 = vadd.f32 %v1662_v6, %v5351_v61  ;;  %v2431_v9 = vadd.f32 %v2430_v7, %v5351_v61  ;;  %v1664_v10 = vpop.f32.mrb[179].mxu0  ;;  %v2432_v11 = vpop.f32.mrb[179].mxu1 }
 0x245   :  { %v1665_v12 = vadd.f32 %v1664_v10, %v5355_v62  ;;  %v2433_v13 = vadd.f32 %v2432_v11, %v5355_v62  ;;  %v6514_v10 = vld [vmem:[%s6891_s3 + $0x20] sm:$0xff]  ;;  %v6519_v11 = vld [vmem:[%s6891_s3 + $0x28] sm:$0xff] }
 0x246   :  { %2841 = vst [vmem:[#allocation2 + $0x590] sm:$0xff] %v1663_v8  ;;  %3097 = vst [vmem:[#allocation2 + $0xd90] sm:$0xff] %v2431_v9  ;;  %v6509_v9 = vld [vmem:[%s6891_s3 + $0x18] sm:$0xff] }
 0x247   :  { %2842 = vst [vmem:[#allocation2 + $0x598] sm:$0xff] %v1665_v12  ;;  %3098 = vst [vmem:[#allocation2 + $0xd98] sm:$0xff] %v2433_v13  ;;  %v1668_v14 = vpop.f32.mrb[180].mxu0  ;;  %v2436_v3 = vpop.f32.mrb[180].mxu1 }
 0x248   :  { %v1669_v15 = vadd.f32 %v1668_v14, %v5351_v61  ;;  %v2437_v16 = vadd.f32 %v2436_v3, %v5351_v61  ;;  %v1670_v17 = vpop.f32.mrb[181].mxu0  ;;  %v2438_v18 = vpop.f32.mrb[181].mxu1  ;;  %v6526_v14 = vld [vmem:[%s6891_s3 + $0x30] sm:$0xff]  ;;  %v6531_v3 = vld [vmem:[%s6891_s3 + $0x38] sm:$0xff] }
 0x249   :  { %v1671_v19 = vadd.f32 %v1670_v17, %v5355_v62  ;;  %v2439_v20 = vadd.f32 %v2438_v18, %v5355_v62  ;;  %v6546_v17 = vld [vmem:[%s6891_s3 + $0x50] sm:$0xff]  ;;  %v6551_v18 = vld [vmem:[%s6891_s3 + $0x58] sm:$0xff] }
 0x24a   :  { %2843 = vst [vmem:[#allocation2 + $0x5a0] sm:$0xff] %v1669_v15  ;;  %3099 = vst [vmem:[#allocation2 + $0xda0] sm:$0xff] %v2437_v16  ;;  %v6536_v15 = vld [vmem:[%s6891_s3 + $0x40] sm:$0xff]  ;;  %v6541_v16 = vld [vmem:[%s6891_s3 + $0x48] sm:$0xff] }
 0x24b   :  { %2844 = vst [vmem:[#allocation2 + $0x5a8] sm:$0xff] %v1671_v19  ;;  %3100 = vst [vmem:[#allocation2 + $0xda8] sm:$0xff] %v2439_v20  ;;  %v1674_v21 = vpop.f32.mrb[182].mxu0  ;;  %v2442_v22 = vpop.f32.mrb[182].mxu1 }
 0x24c   :  { %v1675_v23 = vadd.f32 %v1674_v21, %v5351_v61  ;;  %v2443_v24 = vadd.f32 %v2442_v22, %v5351_v61  ;;  %v1676_v25 = vpop.f32.mrb[183].mxu0  ;;  %v2444_v26 = vpop.f32.mrb[183].mxu1  ;;  %v6556_v21 = vld [vmem:[%s6891_s3 + $0x60] sm:$0xff]  ;;  %v6561_v22 = vld [vmem:[%s6891_s3 + $0x68] sm:$0xff] }
 0x24d   :  { %v1677_v27 = vadd.f32 %v1676_v25, %v5355_v62  ;;  %v2445_v28 = vadd.f32 %v2444_v26, %v5355_v62 }
 0x24e   :  { %2845 = vst [vmem:[#allocation2 + $0x5b0] sm:$0xff] %v1675_v23  ;;  %3101 = vst [vmem:[#allocation2 + $0xdb0] sm:$0xff] %v2443_v24  ;;  %v6566_v23 = vld [vmem:[%s6891_s3 + $0x70] sm:$0xff] }
 0x24f   :  { %2846 = vst [vmem:[#allocation2 + $0x5b8] sm:$0xff] %v1677_v27  ;;  %3102 = vst [vmem:[#allocation2 + $0xdb8] sm:$0xff] %v2445_v28  ;;  %v1680_v29 = vpop.f32.mrb[184].mxu0  ;;  %v2448_v30 = vpop.f32.mrb[184].mxu1  ;;  %v6573_v28 = vld [vmem:[%s6891_s3 + $0x78] sm:$0xff]  ;;  %s6701_s3 = smov 0  }
 0x250   :  { %v1681_v31 = vadd.f32 %v1680_v29, %v5351_v61  ;;  %v2449_v32 = vadd.f32 %v2448_v30, %v5351_v61  ;;  %v1682_v33 = vpop.f32.mrb[185].mxu0  ;;  %v2450_v34 = vpop.f32.mrb[185].mxu1 }
 0x251   :  { %v1683_v35 = vadd.f32 %v1682_v33, %v5355_v62  ;;  %v2451_v36 = vadd.f32 %v2450_v34, %v5355_v62 }
 0x252   :  { %2847 = vst [vmem:[#allocation2 + $0x5c0] sm:$0xff] %v1681_v31  ;;  %3103 = vst [vmem:[#allocation2 + $0xdc0] sm:$0xff] %v2449_v32 }
 0x253   :  { %2848 = vst [vmem:[#allocation2 + $0x5c8] sm:$0xff] %v1683_v35  ;;  %3104 = vst [vmem:[#allocation2 + $0xdc8] sm:$0xff] %v2451_v36  ;;  %v1686_v37 = vpop.f32.mrb[186].mxu0  ;;  %v2454_v38 = vpop.f32.mrb[186].mxu1 }
 0x254   :  { %v1687_v39 = vadd.f32 %v1686_v37, %v5351_v61  ;;  %v2455_v40 = vadd.f32 %v2454_v38, %v5351_v61  ;;  %v1688_v41 = vpop.f32.mrb[187].mxu0  ;;  %v2456_v42 = vpop.f32.mrb[187].mxu1 }
 0x255   :  { %v1689_v43 = vadd.f32 %v1688_v41, %v5355_v62  ;;  %v2457_v44 = vadd.f32 %v2456_v42, %v5355_v62 }
 0x256   :  { %2849 = vst [vmem:[#allocation2 + $0x5d0] sm:$0xff] %v1687_v39  ;;  %3105 = vst [vmem:[#allocation2 + $0xdd0] sm:$0xff] %v2455_v40 }
 0x257   :  { %2850 = vst [vmem:[#allocation2 + $0x5d8] sm:$0xff] %v1689_v43  ;;  %3106 = vst [vmem:[#allocation2 + $0xdd8] sm:$0xff] %v2457_v44  ;;  %v1692_v45 = vpop.f32.mrb[188].mxu0  ;;  %v2460_v46 = vpop.f32.mrb[188].mxu1 }
 0x258   :  { %v1693_v47 = vadd.f32 %v1692_v45, %v5351_v61  ;;  %v2461_v48 = vadd.f32 %v2460_v46, %v5351_v61  ;;  %v1694_v49 = vpop.f32.mrb[189].mxu0  ;;  %v2462_v50 = vpop.f32.mrb[189].mxu1 }
 0x259   :  { %v1695_v51 = vadd.f32 %v1694_v49, %v5355_v62  ;;  %v2463_v52 = vadd.f32 %v2462_v50, %v5355_v62 }
 0x25a   :  { %2851 = vst [vmem:[#allocation2 + $0x5e0] sm:$0xff] %v1693_v47  ;;  %3107 = vst [vmem:[#allocation2 + $0xde0] sm:$0xff] %v2461_v48 }
 0x25b   :  { %2852 = vst [vmem:[#allocation2 + $0x5e8] sm:$0xff] %v1695_v51  ;;  %3108 = vst [vmem:[#allocation2 + $0xde8] sm:$0xff] %v2463_v52  ;;  %v1698_v53 = vpop.f32.mrb[190].mxu0  ;;  %v2466_v54 = vpop.f32.mrb[190].mxu1 }
 0x25c   :  { %v1699_v55 = vadd.f32 %v1698_v53, %v5351_v61  ;;  %v2467_v56 = vadd.f32 %v2466_v54, %v5351_v61  ;;  %v1700_v57 = vpop.f32.mrb[191].mxu0  ;;  %v2468_v58 = vpop.f32.mrb[191].mxu1 }
 0x25d   :  { %v1701_v59 = vadd.f32 %v1700_v57, %v5355_v62  ;;  %v2469_v60 = vadd.f32 %v2468_v58, %v5355_v62 }
 0x25e   :  { %2853 = vst [vmem:[#allocation2 + $0x5f0] sm:$0xff] %v1699_v55  ;;  %3109 = vst [vmem:[#allocation2 + $0xdf0] sm:$0xff] %v2467_v56 }
 0x25f   :  { %2854 = vst [vmem:[#allocation2 + $0x5f8] sm:$0xff] %v1701_v59  ;;  %3110 = vst [vmem:[#allocation2 + $0xdf8] sm:$0xff] %v2469_v60  ;;  %v1704_v63 = vpop.f32.mrb[192].mxu0  ;;  %v2472_v0 = vpop.f32.mrb[192].mxu1 }
 0x260   :  { %v1705_v5 = vadd.f32 %v1704_v63, %v5351_v61  ;;  %v2473_v6 = vadd.f32 %v2472_v0, %v5351_v61  ;;  %v1706_v7 = vpop.f32.mrb[193].mxu0  ;;  %v2474_v8 = vpop.f32.mrb[193].mxu1 }
 0x261   :  { %v1707_v12 = vadd.f32 %v1706_v7, %v5355_v62  ;;  %v2475_v13 = vadd.f32 %v2474_v8, %v5355_v62 }
 0x262   :  { %2855 = vst [vmem:[#allocation2 + $0x600] sm:$0xff] %v1705_v5  ;;  %3111 = vst [vmem:[#allocation2 + $0xe00] sm:$0xff] %v2473_v6 }
 0x263   :  { %2856 = vst [vmem:[#allocation2 + $0x608] sm:$0xff] %v1707_v12  ;;  %3112 = vst [vmem:[#allocation2 + $0xe08] sm:$0xff] %v2475_v13  ;;  %v1710_v19 = vpop.f32.mrb[194].mxu0  ;;  %v2478_v20 = vpop.f32.mrb[194].mxu1 }
 0x264   :  { %v1711_v24 = vadd.f32 %v1710_v19, %v5351_v61  ;;  %v2479_v25 = vadd.f32 %v2478_v20, %v5351_v61  ;;  %v1712_v26 = vpop.f32.mrb[195].mxu0  ;;  %v2480_v27 = vpop.f32.mrb[195].mxu1 }
 0x265   :  { %v1713_v29 = vadd.f32 %v1712_v26, %v5355_v62  ;;  %v2481_v30 = vadd.f32 %v2480_v27, %v5355_v62 }
 0x266   :  { %2857 = vst [vmem:[#allocation2 + $0x610] sm:$0xff] %v1711_v24  ;;  %3113 = vst [vmem:[#allocation2 + $0xe10] sm:$0xff] %v2479_v25 }
 0x267   :  { %2858 = vst [vmem:[#allocation2 + $0x618] sm:$0xff] %v1713_v29  ;;  %3114 = vst [vmem:[#allocation2 + $0xe18] sm:$0xff] %v2481_v30  ;;  %v1716_v31 = vpop.f32.mrb[196].mxu0  ;;  %v2484_v32 = vpop.f32.mrb[196].mxu1 }
 0x268   :  { %v1717_v33 = vadd.f32 %v1716_v31, %v5351_v61  ;;  %v2485_v34 = vadd.f32 %v2484_v32, %v5351_v61  ;;  %v1718_v35 = vpop.f32.mrb[197].mxu0  ;;  %v2486_v36 = vpop.f32.mrb[197].mxu1 }
 0x269   :  { %v1719_v37 = vadd.f32 %v1718_v35, %v5355_v62  ;;  %v2487_v38 = vadd.f32 %v2486_v36, %v5355_v62 }
 0x26a   :  { %2859 = vst [vmem:[#allocation2 + $0x620] sm:$0xff] %v1717_v33  ;;  %3115 = vst [vmem:[#allocation2 + $0xe20] sm:$0xff] %v2485_v34 }
 0x26b   :  { %2860 = vst [vmem:[#allocation2 + $0x628] sm:$0xff] %v1719_v37  ;;  %3116 = vst [vmem:[#allocation2 + $0xe28] sm:$0xff] %v2487_v38  ;;  %v1722_v39 = vpop.f32.mrb[198].mxu0  ;;  %v2490_v40 = vpop.f32.mrb[198].mxu1 }
 0x26c   :  { %v1723_v41 = vadd.f32 %v1722_v39, %v5351_v61  ;;  %v2491_v42 = vadd.f32 %v2490_v40, %v5351_v61  ;;  %v1724_v43 = vpop.f32.mrb[199].mxu0  ;;  %v2492_v44 = vpop.f32.mrb[199].mxu1 }
 0x26d   :  { %v1725_v45 = vadd.f32 %v1724_v43, %v5355_v62  ;;  %v2493_v46 = vadd.f32 %v2492_v44, %v5355_v62 }
 0x26e   :  { %2861 = vst [vmem:[#allocation2 + $0x630] sm:$0xff] %v1723_v41  ;;  %3117 = vst [vmem:[#allocation2 + $0xe30] sm:$0xff] %v2491_v42 }
 0x26f   :  { %2862 = vst [vmem:[#allocation2 + $0x638] sm:$0xff] %v1725_v45  ;;  %3118 = vst [vmem:[#allocation2 + $0xe38] sm:$0xff] %v2493_v46  ;;  %v1728_v47 = vpop.f32.mrb[200].mxu0  ;;  %v2496_v48 = vpop.f32.mrb[200].mxu1 }
 0x270   :  { %v1729_v49 = vadd.f32 %v1728_v47, %v5351_v61  ;;  %v2497_v50 = vadd.f32 %v2496_v48, %v5351_v61  ;;  %v1730_v51 = vpop.f32.mrb[201].mxu0  ;;  %v2498_v52 = vpop.f32.mrb[201].mxu1 }
 0x271   :  { %v1731_v53 = vadd.f32 %v1730_v51, %v5355_v62  ;;  %v2499_v54 = vadd.f32 %v2498_v52, %v5355_v62 }
 0x272   :  { %2863 = vst [vmem:[#allocation2 + $0x640] sm:$0xff] %v1729_v49  ;;  %3119 = vst [vmem:[#allocation2 + $0xe40] sm:$0xff] %v2497_v50 }
 0x273   :  { %2864 = vst [vmem:[#allocation2 + $0x648] sm:$0xff] %v1731_v53  ;;  %3120 = vst [vmem:[#allocation2 + $0xe48] sm:$0xff] %v2499_v54  ;;  %v1734_v55 = vpop.f32.mrb[202].mxu0  ;;  %v2502_v56 = vpop.f32.mrb[202].mxu1 }
 0x274   :  { %v1735_v57 = vadd.f32 %v1734_v55, %v5351_v61  ;;  %v2503_v58 = vadd.f32 %v2502_v56, %v5351_v61  ;;  %v1736_v59 = vpop.f32.mrb[203].mxu0  ;;  %v2504_v60 = vpop.f32.mrb[203].mxu1 }
 0x275   :  { %v1737_v63 = vadd.f32 %v1736_v59, %v5355_v62  ;;  %v2505_v0 = vadd.f32 %v2504_v60, %v5355_v62 }
 0x276   :  { %2865 = vst [vmem:[#allocation2 + $0x650] sm:$0xff] %v1735_v57  ;;  %3121 = vst [vmem:[#allocation2 + $0xe50] sm:$0xff] %v2503_v58 }
 0x277   :  { %2866 = vst [vmem:[#allocation2 + $0x658] sm:$0xff] %v1737_v63  ;;  %3122 = vst [vmem:[#allocation2 + $0xe58] sm:$0xff] %v2505_v0  ;;  %v1740_v5 = vpop.f32.mrb[204].mxu0  ;;  %v2508_v6 = vpop.f32.mrb[204].mxu1 }
 0x278   :  { %v1741_v7 = vadd.f32 %v1740_v5, %v5351_v61  ;;  %v2509_v8 = vadd.f32 %v2508_v6, %v5351_v61  ;;  %v1742_v12 = vpop.f32.mrb[205].mxu0  ;;  %v2510_v13 = vpop.f32.mrb[205].mxu1 }
 0x279   :  { %v1743_v19 = vadd.f32 %v1742_v12, %v5355_v62  ;;  %v2511_v20 = vadd.f32 %v2510_v13, %v5355_v62 }
 0x27a   :  { %2867 = vst [vmem:[#allocation2 + $0x660] sm:$0xff] %v1741_v7  ;;  %3123 = vst [vmem:[#allocation2 + $0xe60] sm:$0xff] %v2509_v8 }
 0x27b   :  { %2868 = vst [vmem:[#allocation2 + $0x668] sm:$0xff] %v1743_v19  ;;  %3124 = vst [vmem:[#allocation2 + $0xe68] sm:$0xff] %v2511_v20  ;;  %v1746_v24 = vpop.f32.mrb[206].mxu0  ;;  %v2514_v25 = vpop.f32.mrb[206].mxu1 }
 0x27c   :  { %v1747_v26 = vadd.f32 %v1746_v24, %v5351_v61  ;;  %v2515_v27 = vadd.f32 %v2514_v25, %v5351_v61  ;;  %v1748_v29 = vpop.f32.mrb[207].mxu0  ;;  %v2516_v30 = vpop.f32.mrb[207].mxu1 }
 0x27d   :  { %v1749_v31 = vadd.f32 %v1748_v29, %v5355_v62  ;;  %v2517_v32 = vadd.f32 %v2516_v30, %v5355_v62 }
 0x27e   :  { %2869 = vst [vmem:[#allocation2 + $0x670] sm:$0xff] %v1747_v26  ;;  %3125 = vst [vmem:[#allocation2 + $0xe70] sm:$0xff] %v2515_v27 }
 0x27f   :  { %2870 = vst [vmem:[#allocation2 + $0x678] sm:$0xff] %v1749_v31  ;;  %3126 = vst [vmem:[#allocation2 + $0xe78] sm:$0xff] %v2517_v32  ;;  %v1752_v33 = vpop.f32.mrb[208].mxu0  ;;  %v2520_v34 = vpop.f32.mrb[208].mxu1 }
 0x280   :  { %v1753_v35 = vadd.f32 %v1752_v33, %v5351_v61  ;;  %v2521_v36 = vadd.f32 %v2520_v34, %v5351_v61  ;;  %v1754_v37 = vpop.f32.mrb[209].mxu0  ;;  %v2522_v38 = vpop.f32.mrb[209].mxu1 }
 0x281   :  { %v1755_v39 = vadd.f32 %v1754_v37, %v5355_v62  ;;  %v2523_v40 = vadd.f32 %v2522_v38, %v5355_v62 }
 0x282   :  { %2871 = vst [vmem:[#allocation2 + $0x680] sm:$0xff] %v1753_v35  ;;  %3127 = vst [vmem:[#allocation2 + $0xe80] sm:$0xff] %v2521_v36 }
 0x283   :  { %2872 = vst [vmem:[#allocation2 + $0x688] sm:$0xff] %v1755_v39  ;;  %3128 = vst [vmem:[#allocation2 + $0xe88] sm:$0xff] %v2523_v40  ;;  %v1758_v41 = vpop.f32.mrb[210].mxu0  ;;  %v2526_v42 = vpop.f32.mrb[210].mxu1 }
 0x284   :  { %v1759_v43 = vadd.f32 %v1758_v41, %v5351_v61  ;;  %v2527_v44 = vadd.f32 %v2526_v42, %v5351_v61  ;;  %v1760_v45 = vpop.f32.mrb[211].mxu0  ;;  %v2528_v46 = vpop.f32.mrb[211].mxu1 }
 0x285   :  { %v1761_v47 = vadd.f32 %v1760_v45, %v5355_v62  ;;  %v2529_v48 = vadd.f32 %v2528_v46, %v5355_v62 }
 0x286   :  { %2873 = vst [vmem:[#allocation2 + $0x690] sm:$0xff] %v1759_v43  ;;  %3129 = vst [vmem:[#allocation2 + $0xe90] sm:$0xff] %v2527_v44 }
 0x287   :  { %2874 = vst [vmem:[#allocation2 + $0x698] sm:$0xff] %v1761_v47  ;;  %3130 = vst [vmem:[#allocation2 + $0xe98] sm:$0xff] %v2529_v48  ;;  %v1764_v49 = vpop.f32.mrb[212].mxu0  ;;  %v2532_v50 = vpop.f32.mrb[212].mxu1 }
 0x288   :  { %v1765_v51 = vadd.f32 %v1764_v49, %v5351_v61  ;;  %v2533_v52 = vadd.f32 %v2532_v50, %v5351_v61  ;;  %v1766_v53 = vpop.f32.mrb[213].mxu0  ;;  %v2534_v54 = vpop.f32.mrb[213].mxu1 }
 0x289   :  { %v1767_v55 = vadd.f32 %v1766_v53, %v5355_v62  ;;  %v2535_v56 = vadd.f32 %v2534_v54, %v5355_v62 }
 0x28a   :  { %2875 = vst [vmem:[#allocation2 + $0x6a0] sm:$0xff] %v1765_v51  ;;  %3131 = vst [vmem:[#allocation2 + $0xea0] sm:$0xff] %v2533_v52 }
 0x28b   :  { %2876 = vst [vmem:[#allocation2 + $0x6a8] sm:$0xff] %v1767_v55  ;;  %3132 = vst [vmem:[#allocation2 + $0xea8] sm:$0xff] %v2535_v56  ;;  %v1770_v57 = vpop.f32.mrb[214].mxu0  ;;  %v2538_v58 = vpop.f32.mrb[214].mxu1 }
 0x28c   :  { %v1771_v59 = vadd.f32 %v1770_v57, %v5351_v61  ;;  %v2539_v60 = vadd.f32 %v2538_v58, %v5351_v61  ;;  %v1772_v63 = vpop.f32.mrb[215].mxu0  ;;  %v2540_v0 = vpop.f32.mrb[215].mxu1 }
 0x28d   :  { %v1773_v5 = vadd.f32 %v1772_v63, %v5355_v62  ;;  %v2541_v6 = vadd.f32 %v2540_v0, %v5355_v62 }
 0x28e   :  { %2877 = vst [vmem:[#allocation2 + $0x6b0] sm:$0xff] %v1771_v59  ;;  %3133 = vst [vmem:[#allocation2 + $0xeb0] sm:$0xff] %v2539_v60 }
 0x28f   :  { %2878 = vst [vmem:[#allocation2 + $0x6b8] sm:$0xff] %v1773_v5  ;;  %3134 = vst [vmem:[#allocation2 + $0xeb8] sm:$0xff] %v2541_v6  ;;  %v1776_v7 = vpop.f32.mrb[216].mxu0  ;;  %v2544_v8 = vpop.f32.mrb[216].mxu1 }
 0x290   :  { %v1777_v12 = vadd.f32 %v1776_v7, %v5351_v61  ;;  %v2545_v13 = vadd.f32 %v2544_v8, %v5351_v61  ;;  %v1778_v19 = vpop.f32.mrb[217].mxu0  ;;  %v2546_v20 = vpop.f32.mrb[217].mxu1 }
 0x291   :  { %v1779_v24 = vadd.f32 %v1778_v19, %v5355_v62  ;;  %v2547_v25 = vadd.f32 %v2546_v20, %v5355_v62 }
 0x292   :  { %2879 = vst [vmem:[#allocation2 + $0x6c0] sm:$0xff] %v1777_v12  ;;  %3135 = vst [vmem:[#allocation2 + $0xec0] sm:$0xff] %v2545_v13 }
 0x293   :  { %2880 = vst [vmem:[#allocation2 + $0x6c8] sm:$0xff] %v1779_v24  ;;  %3136 = vst [vmem:[#allocation2 + $0xec8] sm:$0xff] %v2547_v25  ;;  %v1782_v26 = vpop.f32.mrb[218].mxu0  ;;  %v2550_v27 = vpop.f32.mrb[218].mxu1 }
 0x294   :  { %v1783_v29 = vadd.f32 %v1782_v26, %v5351_v61  ;;  %v2551_v30 = vadd.f32 %v2550_v27, %v5351_v61  ;;  %v1784_v31 = vpop.f32.mrb[219].mxu0  ;;  %v2552_v32 = vpop.f32.mrb[219].mxu1 }
 0x295   :  { %v1785_v33 = vadd.f32 %v1784_v31, %v5355_v62  ;;  %v2553_v34 = vadd.f32 %v2552_v32, %v5355_v62 }
 0x296   :  { %2881 = vst [vmem:[#allocation2 + $0x6d0] sm:$0xff] %v1783_v29  ;;  %3137 = vst [vmem:[#allocation2 + $0xed0] sm:$0xff] %v2551_v30 }
 0x297   :  { %2882 = vst [vmem:[#allocation2 + $0x6d8] sm:$0xff] %v1785_v33  ;;  %3138 = vst [vmem:[#allocation2 + $0xed8] sm:$0xff] %v2553_v34  ;;  %v1788_v35 = vpop.f32.mrb[220].mxu0  ;;  %v2556_v36 = vpop.f32.mrb[220].mxu1 }
 0x298   :  { %v1789_v37 = vadd.f32 %v1788_v35, %v5351_v61  ;;  %v2557_v38 = vadd.f32 %v2556_v36, %v5351_v61  ;;  %v1790_v39 = vpop.f32.mrb[221].mxu0  ;;  %v2558_v40 = vpop.f32.mrb[221].mxu1 }
 0x299   :  { %v1791_v41 = vadd.f32 %v1790_v39, %v5355_v62  ;;  %v2559_v42 = vadd.f32 %v2558_v40, %v5355_v62 }
 0x29a   :  { %2883 = vst [vmem:[#allocation2 + $0x6e0] sm:$0xff] %v1789_v37  ;;  %3139 = vst [vmem:[#allocation2 + $0xee0] sm:$0xff] %v2557_v38 }
 0x29b   :  { %2884 = vst [vmem:[#allocation2 + $0x6e8] sm:$0xff] %v1791_v41  ;;  %3140 = vst [vmem:[#allocation2 + $0xee8] sm:$0xff] %v2559_v42  ;;  %v1794_v43 = vpop.f32.mrb[222].mxu0  ;;  %v2562_v44 = vpop.f32.mrb[222].mxu1 }
 0x29c   :  { %v1795_v45 = vadd.f32 %v1794_v43, %v5351_v61  ;;  %v2563_v46 = vadd.f32 %v2562_v44, %v5351_v61  ;;  %v1796_v47 = vpop.f32.mrb[223].mxu0  ;;  %v2564_v48 = vpop.f32.mrb[223].mxu1 }
 0x29d   :  { %v1797_v49 = vadd.f32 %v1796_v47, %v5355_v62  ;;  %v2565_v50 = vadd.f32 %v2564_v48, %v5355_v62 }
 0x29e   :  { %2885 = vst [vmem:[#allocation2 + $0x6f0] sm:$0xff] %v1795_v45  ;;  %3141 = vst [vmem:[#allocation2 + $0xef0] sm:$0xff] %v2563_v46 }
 0x29f   :  { %2886 = vst [vmem:[#allocation2 + $0x6f8] sm:$0xff] %v1797_v49  ;;  %3142 = vst [vmem:[#allocation2 + $0xef8] sm:$0xff] %v2565_v50  ;;  %v1800_v51 = vpop.f32.mrb[224].mxu0  ;;  %v2568_v52 = vpop.f32.mrb[224].mxu1 }
 0x2a0   :  { %v1801_v53 = vadd.f32 %v1800_v51, %v5351_v61  ;;  %v2569_v54 = vadd.f32 %v2568_v52, %v5351_v61  ;;  %v1802_v55 = vpop.f32.mrb[225].mxu0  ;;  %v2570_v56 = vpop.f32.mrb[225].mxu1 }
 0x2a1   :  { %v1803_v57 = vadd.f32 %v1802_v55, %v5355_v62  ;;  %v2571_v58 = vadd.f32 %v2570_v56, %v5355_v62 }
 0x2a2   :  { %2887 = vst [vmem:[#allocation2 + $0x700] sm:$0xff] %v1801_v53  ;;  %3143 = vst [vmem:[#allocation2 + $0xf00] sm:$0xff] %v2569_v54 }
 0x2a3   :  { %2888 = vst [vmem:[#allocation2 + $0x708] sm:$0xff] %v1803_v57  ;;  %3144 = vst [vmem:[#allocation2 + $0xf08] sm:$0xff] %v2571_v58  ;;  %v1806_v59 = vpop.f32.mrb[226].mxu0  ;;  %v2574_v60 = vpop.f32.mrb[226].mxu1 }
 0x2a4   :  { %v1807_v63 = vadd.f32 %v1806_v59, %v5351_v61  ;;  %v2575_v0 = vadd.f32 %v2574_v60, %v5351_v61  ;;  %v1808_v5 = vpop.f32.mrb[227].mxu0  ;;  %v2576_v6 = vpop.f32.mrb[227].mxu1 }
 0x2a5   :  { %v1809_v7 = vadd.f32 %v1808_v5, %v5355_v62  ;;  %v2577_v8 = vadd.f32 %v2576_v6, %v5355_v62 }
 0x2a6   :  { %2889 = vst [vmem:[#allocation2 + $0x710] sm:$0xff] %v1807_v63  ;;  %3145 = vst [vmem:[#allocation2 + $0xf10] sm:$0xff] %v2575_v0 }
 0x2a7   :  { %2890 = vst [vmem:[#allocation2 + $0x718] sm:$0xff] %v1809_v7  ;;  %3146 = vst [vmem:[#allocation2 + $0xf18] sm:$0xff] %v2577_v8  ;;  %v1812_v12 = vpop.f32.mrb[228].mxu0  ;;  %v2580_v13 = vpop.f32.mrb[228].mxu1 }
 0x2a8   :  { %v1813_v19 = vadd.f32 %v1812_v12, %v5351_v61  ;;  %v2581_v20 = vadd.f32 %v2580_v13, %v5351_v61  ;;  %v1814_v24 = vpop.f32.mrb[229].mxu0  ;;  %v2582_v25 = vpop.f32.mrb[229].mxu1 }
 0x2a9   :  { %v1815_v26 = vadd.f32 %v1814_v24, %v5355_v62  ;;  %v2583_v27 = vadd.f32 %v2582_v25, %v5355_v62 }
 0x2aa   :  { %2891 = vst [vmem:[#allocation2 + $0x720] sm:$0xff] %v1813_v19  ;;  %3147 = vst [vmem:[#allocation2 + $0xf20] sm:$0xff] %v2581_v20 }
 0x2ab   :  { %2892 = vst [vmem:[#allocation2 + $0x728] sm:$0xff] %v1815_v26  ;;  %3148 = vst [vmem:[#allocation2 + $0xf28] sm:$0xff] %v2583_v27  ;;  %v1818_v29 = vpop.f32.mrb[230].mxu0  ;;  %v2586_v30 = vpop.f32.mrb[230].mxu1 }
 0x2ac   :  { %v1819_v31 = vadd.f32 %v1818_v29, %v5351_v61  ;;  %v2587_v32 = vadd.f32 %v2586_v30, %v5351_v61  ;;  %v1820_v33 = vpop.f32.mrb[231].mxu0  ;;  %v2588_v34 = vpop.f32.mrb[231].mxu1 }
 0x2ad   :  { %v1821_v35 = vadd.f32 %v1820_v33, %v5355_v62  ;;  %v2589_v36 = vadd.f32 %v2588_v34, %v5355_v62 }
 0x2ae   :  { %2893 = vst [vmem:[#allocation2 + $0x730] sm:$0xff] %v1819_v31  ;;  %3149 = vst [vmem:[#allocation2 + $0xf30] sm:$0xff] %v2587_v32 }
 0x2af   :  { %2894 = vst [vmem:[#allocation2 + $0x738] sm:$0xff] %v1821_v35  ;;  %3150 = vst [vmem:[#allocation2 + $0xf38] sm:$0xff] %v2589_v36  ;;  %v1824_v37 = vpop.f32.mrb[232].mxu0  ;;  %v2592_v38 = vpop.f32.mrb[232].mxu1 }
 0x2b0   :  { %v1825_v39 = vadd.f32 %v1824_v37, %v5351_v61  ;;  %v2593_v40 = vadd.f32 %v2592_v38, %v5351_v61  ;;  %v1826_v41 = vpop.f32.mrb[233].mxu0  ;;  %v2594_v42 = vpop.f32.mrb[233].mxu1 }
 0x2b1   :  { %v1827_v43 = vadd.f32 %v1826_v41, %v5355_v62  ;;  %v2595_v44 = vadd.f32 %v2594_v42, %v5355_v62 }
 0x2b2   :  { %2895 = vst [vmem:[#allocation2 + $0x740] sm:$0xff] %v1825_v39  ;;  %3151 = vst [vmem:[#allocation2 + $0xf40] sm:$0xff] %v2593_v40 }
 0x2b3   :  { %2896 = vst [vmem:[#allocation2 + $0x748] sm:$0xff] %v1827_v43  ;;  %3152 = vst [vmem:[#allocation2 + $0xf48] sm:$0xff] %v2595_v44  ;;  %v1830_v45 = vpop.f32.mrb[234].mxu0  ;;  %v2598_v46 = vpop.f32.mrb[234].mxu1 }
 0x2b4   :  { %v1831_v47 = vadd.f32 %v1830_v45, %v5351_v61  ;;  %v2599_v48 = vadd.f32 %v2598_v46, %v5351_v61  ;;  %v1832_v49 = vpop.f32.mrb[235].mxu0  ;;  %v2600_v50 = vpop.f32.mrb[235].mxu1 }
 0x2b5   :  { %v1833_v51 = vadd.f32 %v1832_v49, %v5355_v62  ;;  %v2601_v52 = vadd.f32 %v2600_v50, %v5355_v62 }
 0x2b6   :  { %2897 = vst [vmem:[#allocation2 + $0x750] sm:$0xff] %v1831_v47  ;;  %3153 = vst [vmem:[#allocation2 + $0xf50] sm:$0xff] %v2599_v48 }
 0x2b7   :  { %2898 = vst [vmem:[#allocation2 + $0x758] sm:$0xff] %v1833_v51  ;;  %3154 = vst [vmem:[#allocation2 + $0xf58] sm:$0xff] %v2601_v52  ;;  %v1836_v53 = vpop.f32.mrb[236].mxu0  ;;  %v2604_v54 = vpop.f32.mrb[236].mxu1 }
 0x2b8   :  { %v1837_v55 = vadd.f32 %v1836_v53, %v5351_v61  ;;  %v2605_v56 = vadd.f32 %v2604_v54, %v5351_v61  ;;  %v1838_v57 = vpop.f32.mrb[237].mxu0  ;;  %v2606_v58 = vpop.f32.mrb[237].mxu1 }
 0x2b9   :  { %v1839_v59 = vadd.f32 %v1838_v57, %v5355_v62  ;;  %v2607_v60 = vadd.f32 %v2606_v58, %v5355_v62 }
 0x2ba   :  { %2899 = vst [vmem:[#allocation2 + $0x760] sm:$0xff] %v1837_v55  ;;  %3155 = vst [vmem:[#allocation2 + $0xf60] sm:$0xff] %v2605_v56 }
 0x2bb   :  { %2900 = vst [vmem:[#allocation2 + $0x768] sm:$0xff] %v1839_v59  ;;  %3156 = vst [vmem:[#allocation2 + $0xf68] sm:$0xff] %v2607_v60  ;;  %v1842_v63 = vpop.f32.mrb[238].mxu0  ;;  %v2610_v0 = vpop.f32.mrb[238].mxu1 }
 0x2bc   :  { %v1843_v5 = vadd.f32 %v1842_v63, %v5351_v61  ;;  %v2611_v6 = vadd.f32 %v2610_v0, %v5351_v61  ;;  %v1844_v7 = vpop.f32.mrb[239].mxu0  ;;  %v2612_v8 = vpop.f32.mrb[239].mxu1 }
 0x2bd   :  { %v1845_v12 = vadd.f32 %v1844_v7, %v5355_v62  ;;  %v2613_v13 = vadd.f32 %v2612_v8, %v5355_v62 }
 0x2be   :  { %2901 = vst [vmem:[#allocation2 + $0x770] sm:$0xff] %v1843_v5  ;;  %3157 = vst [vmem:[#allocation2 + $0xf70] sm:$0xff] %v2611_v6 }
 0x2bf   :  { %2902 = vst [vmem:[#allocation2 + $0x778] sm:$0xff] %v1845_v12  ;;  %3158 = vst [vmem:[#allocation2 + $0xf78] sm:$0xff] %v2613_v13  ;;  %v1848_v19 = vpop.f32.mrb[240].mxu0  ;;  %v2616_v20 = vpop.f32.mrb[240].mxu1 }
 0x2c0   :  { %v1849_v24 = vadd.f32 %v1848_v19, %v5351_v61  ;;  %v2617_v25 = vadd.f32 %v2616_v20, %v5351_v61  ;;  %v1850_v26 = vpop.f32.mrb[241].mxu0  ;;  %v2618_v27 = vpop.f32.mrb[241].mxu1 }
 0x2c1   :  { %v1851_v29 = vadd.f32 %v1850_v26, %v5355_v62  ;;  %v2619_v30 = vadd.f32 %v2618_v27, %v5355_v62 }
 0x2c2   :  { %2903 = vst [vmem:[#allocation2 + $0x780] sm:$0xff] %v1849_v24  ;;  %3159 = vst [vmem:[#allocation2 + $0xf80] sm:$0xff] %v2617_v25 }
 0x2c3   :  { %2904 = vst [vmem:[#allocation2 + $0x788] sm:$0xff] %v1851_v29  ;;  %3160 = vst [vmem:[#allocation2 + $0xf88] sm:$0xff] %v2619_v30  ;;  %v1854_v31 = vpop.f32.mrb[242].mxu0  ;;  %v2622_v32 = vpop.f32.mrb[242].mxu1 }
 0x2c4   :  { %v1855_v33 = vadd.f32 %v1854_v31, %v5351_v61  ;;  %v2623_v34 = vadd.f32 %v2622_v32, %v5351_v61  ;;  %v1856_v35 = vpop.f32.mrb[243].mxu0  ;;  %v2624_v36 = vpop.f32.mrb[243].mxu1 }
 0x2c5   :  { %v1857_v37 = vadd.f32 %v1856_v35, %v5355_v62  ;;  %v2625_v38 = vadd.f32 %v2624_v36, %v5355_v62 }
 0x2c6   :  { %2905 = vst [vmem:[#allocation2 + $0x790] sm:$0xff] %v1855_v33  ;;  %3161 = vst [vmem:[#allocation2 + $0xf90] sm:$0xff] %v2623_v34 }
 0x2c7   :  { %2906 = vst [vmem:[#allocation2 + $0x798] sm:$0xff] %v1857_v37  ;;  %3162 = vst [vmem:[#allocation2 + $0xf98] sm:$0xff] %v2625_v38  ;;  %v1860_v39 = vpop.f32.mrb[244].mxu0  ;;  %v2628_v40 = vpop.f32.mrb[244].mxu1 }
 0x2c8   :  { %v1861_v41 = vadd.f32 %v1860_v39, %v5351_v61  ;;  %v2629_v42 = vadd.f32 %v2628_v40, %v5351_v61  ;;  %v1862_v43 = vpop.f32.mrb[245].mxu0  ;;  %v2630_v44 = vpop.f32.mrb[245].mxu1 }
 0x2c9   :  { %v1863_v45 = vadd.f32 %v1862_v43, %v5355_v62  ;;  %v2631_v46 = vadd.f32 %v2630_v44, %v5355_v62 }
 0x2ca   :  { %2907 = vst [vmem:[#allocation2 + $0x7a0] sm:$0xff] %v1861_v41  ;;  %3163 = vst [vmem:[#allocation2 + $0xfa0] sm:$0xff] %v2629_v42  ;;  %v6697_v41 = vmov 0.0   ;;  %v6699_v42 = vmov 0.0  }
 0x2cb   :  { %2908 = vst [vmem:[#allocation2 + $0x7a8] sm:$0xff] %v1863_v45  ;;  %3164 = vst [vmem:[#allocation2 + $0xfa8] sm:$0xff] %v2631_v46  ;;  %v1866_v47 = vpop.f32.mrb[246].mxu0  ;;  %v2634_v48 = vpop.f32.mrb[246].mxu1 }
 0x2cc   :  { %v1867_v49 = vadd.f32 %v1866_v47, %v5351_v61  ;;  %v2635_v50 = vadd.f32 %v2634_v48, %v5351_v61  ;;  %v1868_v51 = vpop.f32.mrb[247].mxu0  ;;  %v2636_v52 = vpop.f32.mrb[247].mxu1 }
 0x2cd   :  { %v1869_v53 = vadd.f32 %v1868_v51, %v5355_v62  ;;  %v2637_v54 = vadd.f32 %v2636_v52, %v5355_v62 }
 0x2ce   :  { %2909 = vst [vmem:[#allocation2 + $0x7b0] sm:$0xff] %v1867_v49  ;;  %3165 = vst [vmem:[#allocation2 + $0xfb0] sm:$0xff] %v2635_v50 }
 0x2cf   :  { %2910 = vst [vmem:[#allocation2 + $0x7b8] sm:$0xff] %v1869_v53  ;;  %3166 = vst [vmem:[#allocation2 + $0xfb8] sm:$0xff] %v2637_v54  ;;  %v1872_v55 = vpop.f32.mrb[248].mxu0  ;;  %v2640_v56 = vpop.f32.mrb[248].mxu1 }
 0x2d0   :  { %v1873_v57 = vadd.f32 %v1872_v55, %v5351_v61  ;;  %v2641_v58 = vadd.f32 %v2640_v56, %v5351_v61  ;;  %v1874_v59 = vpop.f32.mrb[249].mxu0  ;;  %v2642_v60 = vpop.f32.mrb[249].mxu1 }
 0x2d1   :  { %v1875_v63 = vadd.f32 %v1874_v59, %v5355_v62  ;;  %v2643_v0 = vadd.f32 %v2642_v60, %v5355_v62 }
 0x2d2   :  { %2911 = vst [vmem:[#allocation2 + $0x7c0] sm:$0xff] %v1873_v57  ;;  %3167 = vst [vmem:[#allocation2 + $0xfc0] sm:$0xff] %v2641_v58 }
 0x2d3   :  { %2912 = vst [vmem:[#allocation2 + $0x7c8] sm:$0xff] %v1875_v63  ;;  %3168 = vst [vmem:[#allocation2 + $0xfc8] sm:$0xff] %v2643_v0  ;;  %v1878_v5 = vpop.f32.mrb[250].mxu0  ;;  %v2646_v6 = vpop.f32.mrb[250].mxu1 }
 0x2d4   :  { %v1879_v7 = vadd.f32 %v1878_v5, %v5351_v61  ;;  %v2647_v8 = vadd.f32 %v2646_v6, %v5351_v61  ;;  %v1880_v12 = vpop.f32.mrb[251].mxu0  ;;  %v2648_v13 = vpop.f32.mrb[251].mxu1 }
 0x2d5   :  { %v1881_v19 = vadd.f32 %v1880_v12, %v5355_v62  ;;  %v2649_v20 = vadd.f32 %v2648_v13, %v5355_v62 }
 0x2d6   :  { %2913 = vst [vmem:[#allocation2 + $0x7d0] sm:$0xff] %v1879_v7  ;;  %3169 = vst [vmem:[#allocation2 + $0xfd0] sm:$0xff] %v2647_v8 }
 0x2d7   :  { %2914 = vst [vmem:[#allocation2 + $0x7d8] sm:$0xff] %v1881_v19  ;;  %3170 = vst [vmem:[#allocation2 + $0xfd8] sm:$0xff] %v2649_v20  ;;  %v1884_v24 = vpop.f32.mrb[252].mxu0  ;;  %v2652_v25 = vpop.f32.mrb[252].mxu1 }
 0x2d8   :  { %v1885_v26 = vadd.f32 %v1884_v24, %v5351_v61  ;;  %v2653_v27 = vadd.f32 %v2652_v25, %v5351_v61  ;;  %v1886_v29 = vpop.f32.mrb[253].mxu0  ;;  %v2654_v30 = vpop.f32.mrb[253].mxu1 }
 0x2d9   :  { %v1887_v31 = vadd.f32 %v1886_v29, %v5355_v62  ;;  %v2655_v32 = vadd.f32 %v2654_v30, %v5355_v62 }
 0x2da   :  { %2915 = vst [vmem:[#allocation2 + $0x7e0] sm:$0xff] %v1885_v26  ;;  %3171 = vst [vmem:[#allocation2 + $0xfe0] sm:$0xff] %v2653_v27 }
 0x2db   :  { %2916 = vst [vmem:[#allocation2 + $0x7e8] sm:$0xff] %v1887_v31  ;;  %3172 = vst [vmem:[#allocation2 + $0xfe8] sm:$0xff] %v2655_v32  ;;  %v1890_v33 = vpop.f32.mrb[254].mxu0  ;;  %v2658_v34 = vpop.f32.mrb[254].mxu1 }
 0x2dc   :  { %v1891_v35 = vadd.f32 %v1890_v33, %v5351_v61  ;;  %v2659_v36 = vadd.f32 %v2658_v34, %v5351_v61  ;;  %v1892_v37 = vpop.f32.mrb[255].mxu0  ;;  %v2660_v38 = vpop.f32.mrb[255].mxu1 }
 0x2dd   :  { %v1893_v39 = vadd.f32 %v1892_v37, %v5355_v62  ;;  %v2661_v40 = vadd.f32 %v2660_v38, %v5355_v62 }
 0x2de   :  { %2917 = vst [vmem:[#allocation2 + $0x7f0] sm:$0xff] %v1891_v35  ;;  %3173 = vst [vmem:[#allocation2 + $0xff0] sm:$0xff] %v2659_v36 }
 0x2df   :  { %2918 = vst [vmem:[#allocation2 + $0x7f8] sm:$0xff] %v1893_v39  ;;  %3174 = vst [vmem:[#allocation2 + $0xff8] sm:$0xff] %v2661_v40 }
 0x2e0 LB: > { %v6712_v61 = vpack.c.bf16 %v6509_v9, %v6497_v2  ;;  %v6716_v62 = vpack.c.bf16 %v6502_v4, %v6492_v1  ;;  %v6720_v43 = vpack.c.bf16 %v6531_v3, %v6519_v11  ;;  %v6727_v44 = vpack.c.bf16 %v6526_v14, %v6514_v10  ;;  %s6773_s23 = sshll.u32 %s4764_s3, 6  ;;  %s4768_s27 = smov 64   ;;  %s4764_s3 = sphi %s6701_s3, %s3196_s3   ;;  %v4760_v42 = vphi %v6699_v42, %v4101_v42   ;;  %v4756_v41 = vphi %v6697_v41, %v4095_v41  }
 0x2e1   : > { %v4767_v45 = vmov 0.0   ;;  %v6733_v46 = vpack.c.bf16 %v6551_v18, %v6541_v16  ;;  %v6741_v47 = vpack.c.bf16 %v6546_v17, %v6536_v15  ;;  %v6746_v48 = vpack.c.bf16 %v6573_v28, %v6561_v22  ;;  %s3201_s24 = sshra.s32 %s6773_s23, 3  ;;  %s6784_s30 = scalar_lea.vmem %s6888_s4, %s6773_s23 }
 0x2e2   : > { %4520 = vmatprep.subr.bf16.mxu0 %v6712_v61  ;;  %4536 = vmatprep.subr.bf16.mxu1 %v6712_v61  ;;  %v6753_v49 = vpack.c.bf16 %v6566_v23, %v6556_v21  ;;  %vm3208_vm1 = vcmask 523264   ;;  %s4475_s25 = sshll.u32 %s3201_s24, 4  ;;  %s4477_s5 = sadd.s32 8, %s6773_s23 }
 0x2e3   : > { %4522 = vmatpush1.bf16.msra.mxu0 %v6716_v62  ;;  %3276 = vmatprep.mubr.f32.mxu0 %v4767_v45  ;;  %s3205_s26 = scalar_lea.vmem [#allocation2], %s4475_s25  ;;  %s3315_s6 = sshra.s32 %s4477_s5, 3 }
 0x2e4   : > { %4524 = vmatprep.subr.bf16.mxu0 %v6720_v43  ;;  %4538 = vmatpush1.bf16.msra.mxu1 %v6716_v62  ;;  %s4478_s2 = sshll.u32 %s3315_s6, 4  ;;  %s4481_s8 = sadd.s32 16, %s6773_s23 }
 0x2e5   : > { %4540 = vmatprep.subr.bf16.mxu1 %v6720_v43  ;;  %3389 = vmatprep.mubr.f32.mxu1 %v4767_v45  ;;  %s3319_s7 = scalar_lea.vmem [#allocation2], %s4478_s2  ;;  %s3428_s1 = sshra.s32 %s4481_s8, 3 }
 0x2e6   : > { %v3207_v50 = vld [vmem:[%s3205_s26 + $0x8] sm:$0xff]  ;;  %v3206_v55 = vld [vmem:[%s3205_s26] sm:$0xff]  ;;  %s4482_s9 = sshll.u32 %s3428_s1, 4  ;;  %s4485_s11 = sadd.s32 24, %s6773_s23 }
 0x2e7   : > { %4526 = vmatpush1.bf16.msra.mxu0 %v6727_v44  ;;  %v3321_v26 = vld [vmem:[%s3319_s7 + $0x8] sm:$0xff]  ;;  %v3320_v32 = vld [vmem:[%s3319_s7] sm:$0xff]  ;;  %s3432_s10 = scalar_lea.vmem [#allocation2], %s4482_s9  ;;  %s3541_s12 = sshra.s32 %s4485_s11, 3 }
 0x2e8   : > { %4528 = vmatprep.subr.bf16.mxu0 %v6733_v46  ;;  %4542 = vmatpush1.bf16.msra.mxu1 %v6727_v44  ;;  %s4486_s13 = sshll.u32 %s3541_s12, 4  ;;  %s4489_s15 = sadd.s32 32, %s6773_s23 }
 0x2e9   : > { %4544 = vmatprep.subr.bf16.mxu1 %v6733_v46  ;;  %s3545_s14 = scalar_lea.vmem [#allocation2], %s4486_s13  ;;  %s3654_s16 = sshra.s32 %s4489_s15, 3 }
 0x2ea   : > { %s4490_s17 = sshll.u32 %s3654_s16, 4  ;;  %s4493_s19 = sadd.s32 40, %s6773_s23 }
 0x2eb   : > { %4530 = vmatpush1.bf16.msra.mxu0 %v6741_v47  ;;  %s3658_s18 = scalar_lea.vmem [#allocation2], %s4490_s17  ;;  %s3767_s20 = sshra.s32 %s4493_s19, 3 }
 0x2ec   : > { %4532 = vmatprep.subr.bf16.mxu0 %v6746_v48  ;;  %4546 = vmatpush1.bf16.msra.mxu1 %v6741_v47  ;;  %s4494_s0 = sshll.u32 %s3767_s20, 4  ;;  %s4497_s22 = sadd.s32 48, %s6773_s23 }
 0x2ed   : > { %4548 = vmatprep.subr.bf16.mxu1 %v6746_v48  ;;  %s3771_s21 = scalar_lea.vmem [#allocation2], %s4494_s0  ;;  %s3880_s24 = sshra.s32 %s4497_s22, 3 }
 0x2ee   : > { %s4498_s25 = sshll.u32 %s3880_s24, 4  ;;  %s4501_s28 = sadd.s32 56, %s6773_s23 }
 0x2ef   : > { %4534 = vmatpush1.bf16.msra.mxu0 %v6753_v49  ;;  %s3884_s26 = scalar_lea.vmem [#allocation2], %s4498_s25  ;;  %s3993_s29 = sshra.s32 %s4501_s28, 3 }
 0x2f0   : > { %4550 = vmatpush1.bf16.msra.mxu1 %v6753_v49  ;;  %4552 = vmatprep.subr.bf16.mxu0 %v6712_v61  ;;  %s4502_s5 = sshll.u32 %s3993_s29, 4  ;;  %s3196_s3 = sadd.s32 1, %s4764_s3  }
 0x2f1   : > { %4568 = vmatprep.subr.bf16.mxu1 %v6712_v61  ;;  %s3997_s6 = scalar_lea.vmem [#allocation2], %s4502_s5  ;;  %p3193_p0 = scmp.ge.s32.totalorder %s3196_s3, 32  }
 0x2f2   : > { %4425 = vmatmul.mubr.msk.f32.vlgmr.msra.gmra.mrb[0].mxu0 %vm3208_vm1, %v4760_v42 }
 0x2f3   : > { %4554 = vmatpush1.bf16.msra.mxu0 %v6716_v62  ;;  %3502 = vmatprep.mubr.f32.mxu0 %v4767_v45 }
 0x2f4   : > { %4556 = vmatprep.subr.bf16.mxu0 %v6720_v43 }
 0x2f7   : > { %4558 = vmatpush1.bf16.msra.mxu0 %v6727_v44 }
 0x2f8   : > { %4560 = vmatprep.subr.bf16.mxu0 %v6733_v46 }
 0x2fb   : > { %4562 = vmatpush1.bf16.msra.mxu0 %v6741_v47 }
 0x2fc   : > { %4564 = vmatprep.subr.bf16.mxu0 %v6746_v48 }
 0x2ff   : > { %4566 = vmatpush1.bf16.msra.mxu0 %v6753_v49 }
 0x300   : > { %4584 = vmatprep.subr.bf16.mxu0 %v6712_v61 }
 0x3c5   : > { %v3278_v51 = vpop.f32.mrb[0].mxu0 }
 0x3c6   : > { %v3280_v52 = vpop.f32.mrb[1].mxu0  ;;  %v3283_v56 = vadd.f32 %v3278_v51, %v3206_v55 }
 0x3c7   : > { %v3284_v53 = vadd.f32 %v3280_v52, %v3207_v50 }
 0x3c8   : > { %v3285_v57 = vmul.f32 0.5, %v3283_v56 }
 0x3c9   : > { %4678 = vtanh.f32 %v3284_v53  ;;  %v3286_v12 = vmul.f32 0.5, %v3284_v53 }
 0x3ca   : > { %4680 = vtanh.f32 %v3285_v57  ;;  %v3434_v57 = vld [vmem:[%s3432_s10 + $0x8] sm:$0xff] }
 0x3d3   : > { %v4679_v54 = vpop.eup %4678 }
 0x3d4   : > { %3296 = vrot.lane.b32.xlu0 %v4679_v54, %s4768_s27  ;;  %v4681_v58 = vpop.eup %4680 }
 0x3d5   : > { %v3289_v59 = vmul.f32 0.5, %v4681_v58 }
 0x3d7   : > { %v3291_v60 = vadd.f32 0.5, %v3289_v59 }
 0x3d9   : > { %v3294_v5 = vmul.f32 %v4756_v41, %v3291_v60 }
 0x446   : > { %v3297_v63 = vpop.permute.xlu0 %3296 }
 0x447   : > { %v3299_v0 = vmul.f32 %v3297_v63, %v3291_v60 }
 0x449   : > { %3301 = vrot.lane.b32.xlu0 %v3299_v0, %s4768_s27  ;;  %v3433_v0 = vld [vmem:[%s3432_s10] sm:$0xff] }
 0x4bb   : > { %v3302_v6 = vpop.permute.xlu0 %3301 }
 0x4bc   : > { %v3304_v7 = vadd.f32 %v3302_v6, %v3294_v5 }
 0x4be   : > { %4682 = vtanh.f32 %v3304_v7 }
 0x4bf   : > { %4684 = vtanh.f32 %v3286_v12 }
 0x4c8   : > { %v4683_v8 = vpop.eup %4682 }
 0x4c9   : > { %3307 = vrot.lane.b32.xlu1 %v4683_v8, %s4768_s27  ;;  %v4685_v13 = vpop.eup %4684 }
 0x4ca   : > { %v3290_v19 = vmul.f32 0.5, %v4685_v13 }
 0x4cc   : > { %v3292_v20 = vadd.f32 0.5, %v3290_v19 }
 0x53b   : > { %v3308_v24 = vpop.permute.xlu1 %3307 }
 0x53c   : > { %v3310_v25 = vmul.f32 %v3308_v24, %v3292_v20 }
 0x53e   : > { %3312 = vst.msk [vmem:[%s6784_s30] sm:$0xff] %vm3208_vm1, %v3310_v25  ;;  %4429 = vmatmul.mubr.msk.f32.vlgmr.msra.gmra.mrb[0].mxu1 %vm3208_vm1, %v3310_v25 }
 0x53f   : > { %4570 = vmatpush1.bf16.msra.mxu1 %v6716_v62  ;;  %3615 = vmatprep.mubr.f32.mxu1 %v4767_v45 }
 0x540   : > { %4572 = vmatprep.subr.bf16.mxu1 %v6720_v43 }
 0x543   : > { %4574 = vmatpush1.bf16.msra.mxu1 %v6727_v44 }
 0x544   : > { %4576 = vmatprep.subr.bf16.mxu1 %v6733_v46 }
 0x547   : > { %4578 = vmatpush1.bf16.msra.mxu1 %v6741_v47 }
 0x548   : > { %4580 = vmatprep.subr.bf16.mxu1 %v6746_v48 }
 0x54b   : > { %4582 = vmatpush1.bf16.msra.mxu1 %v6753_v49 }
 0x54c   : > { %4600 = vmatprep.subr.bf16.mxu1 %v6712_v61 }
 0x611   : > { %v3391_v27 = vpop.f32.mrb[0].mxu1 }
 0x612   : > { %v3393_v29 = vpop.f32.mrb[1].mxu1  ;;  %v3396_v33 = vadd.f32 %v3391_v27, %v3320_v32 }
 0x613   : > { %v3397_v30 = vadd.f32 %v3393_v29, %v3321_v26 }
 0x614   : > { %v3398_v34 = vmul.f32 0.5, %v3396_v33 }
 0x615   : > { %4686 = vtanh.f32 %v3397_v30  ;;  %v3399_v51 = vmul.f32 0.5, %v3397_v30 }
 0x616   : > { %4688 = vtanh.f32 %v3398_v34  ;;  %v3547_v34 = vld [vmem:[%s3545_s14 + $0x8] sm:$0xff] }
 0x61f   : > { %v4687_v31 = vpop.eup %4686 }
 0x620   : > { %3409 = vrot.lane.b32.xlu1 %v4687_v31, %s4768_s27  ;;  %v4689_v35 = vpop.eup %4688 }
 0x621   : > { %v3402_v36 = vmul.f32 0.5, %v4689_v35 }
 0x623   : > { %v3404_v37 = vadd.f32 0.5, %v3402_v36 }
 0x625   : > { %v3407_v40 = vmul.f32 %v3404_v37, %v3304_v7 }
 0x692   : > { %v3410_v38 = vpop.permute.xlu1 %3409 }
 0x693   : > { %v3412_v39 = vmul.f32 %v3410_v38, %v3404_v37 }
 0x695   : > { %3414 = vrot.lane.b32.xlu0 %v3412_v39, %s4768_s27  ;;  %v3546_v39 = vld [vmem:[%s3545_s14] sm:$0xff] }
 0x707   : > { %v3415_v41 = vpop.permute.xlu0 %3414 }
 0x708   : > { %v3417_v42 = vadd.f32 %v3415_v41, %v3407_v40 }
 0x70a   : > { %4690 = vtanh.f32 %v3417_v42 }
 0x70b   : > { %4692 = vtanh.f32 %v3399_v51 }
 0x714   : > { %v4691_v50 = vpop.eup %4690 }
 0x715   : > { %3420 = vrot.lane.b32.xlu1 %v4691_v50, %s4768_s27  ;;  %v4693_v52 = vpop.eup %4692 }
 0x716   : > { %v3403_v53 = vmul.f32 0.5, %v4693_v52 }
 0x718   : > { %v3405_v54 = vadd.f32 0.5, %v3403_v53 }
 0x787   : > { %v3421_v55 = vpop.permute.xlu1 %3420 }
 0x788   : > { %v3423_v56 = vmul.f32 %v3421_v55, %v3405_v54 }
 0x78a   : > { %4432 = vst.msk [vmem:[%s6784_s30 + $0x8] sm:$0xff] %vm3208_vm1, %v3423_v56  ;;  %4436 = vmatmul.mubr.msk.f32.vlgmr.msra.gmra.mrb[2].mxu0 %vm3208_vm1, %v3423_v56 }
 0x78b   : > { %4586 = vmatpush1.bf16.msra.mxu0 %v6716_v62  ;;  %3728 = vmatprep.mubr.f32.mxu0 %v4767_v45 }
 0x78c   : > { %4588 = vmatprep.subr.bf16.mxu0 %v6720_v43 }
 0x78f   : > { %4590 = vmatpush1.bf16.msra.mxu0 %v6727_v44 }
 0x790   : > { %4592 = vmatprep.subr.bf16.mxu0 %v6733_v46 }
 0x793   : > { %4594 = vmatpush1.bf16.msra.mxu0 %v6741_v47 }
 0x794   : > { %4596 = vmatprep.subr.bf16.mxu0 %v6746_v48 }
 0x797   : > { %4598 = vmatpush1.bf16.msra.mxu0 %v6753_v49 }
 0x798   : > { %4616 = vmatprep.subr.bf16.mxu0 %v6712_v61 }
 0x85d   : > { %v3504_v58 = vpop.f32.mrb[2].mxu0 }
 0x85e   : > { %v3506_v59 = vpop.f32.mrb[3].mxu0  ;;  %v3509_v5 = vadd.f32 %v3504_v58, %v3433_v0 }
 0x85f   : > { %v3510_v60 = vadd.f32 %v3506_v59, %v3434_v57 }
 0x860   : > { %v3511_v6 = vmul.f32 0.5, %v3509_v5  ;;  %v3660_v5 = vld [vmem:[%s3658_s18 + $0x8] sm:$0xff] }
 0x861   : > { %4694 = vtanh.f32 %v3510_v60  ;;  %v3512_v27 = vmul.f32 0.5, %v3510_v60 }
 0x862   : > { %4696 = vtanh.f32 %v3511_v6 }
 0x86b   : > { %v4695_v63 = vpop.eup %4694 }
 0x86c   : > { %3522 = vrot.lane.b32.xlu0 %v4695_v63, %s4768_s27  ;;  %v4697_v7 = vpop.eup %4696 }
 0x86d   : > { %v3515_v8 = vmul.f32 0.5, %v4697_v7 }
 0x86f   : > { %v3517_v12 = vadd.f32 0.5, %v3515_v8 }
 0x871   : > { %v3520_v20 = vmul.f32 %v3517_v12, %v3417_v42 }
 0x8de   : > { %v3523_v13 = vpop.permute.xlu0 %3522 }
 0x8df   : > { %v3525_v19 = vmul.f32 %v3523_v13, %v3517_v12  ;;  %v3659_v13 = vld [vmem:[%s3658_s18] sm:$0xff] }
 0x8e1   : > { %3527 = vrot.lane.b32.xlu1 %v3525_v19, %s4768_s27 }
 0x953   : > { %v3528_v24 = vpop.permute.xlu1 %3527 }
 0x954   : > { %v3530_v25 = vadd.f32 %v3528_v24, %v3520_v20 }
 0x956   : > { %4698 = vtanh.f32 %v3530_v25 }
 0x957   : > { %4700 = vtanh.f32 %v3512_v27 }
 0x960   : > { %v4699_v26 = vpop.eup %4698 }
 0x961   : > { %3533 = vrot.lane.b32.xlu0 %v4699_v26, %s4768_s27  ;;  %v4701_v29 = vpop.eup %4700 }
 0x962   : > { %v3516_v30 = vmul.f32 0.5, %v4701_v29 }
 0x964   : > { %v3518_v31 = vadd.f32 0.5, %v3516_v30 }
 0x9d3   : > { %v3534_v32 = vpop.permute.xlu0 %3533 }
 0x9d4   : > { %v3536_v33 = vmul.f32 %v3534_v32, %v3518_v31 }
 0x9d6   : > { %4439 = vst.msk [vmem:[%s6784_s30 + $0x10] sm:$0xff] %vm3208_vm1, %v3536_v33  ;;  %4443 = vmatmul.mubr.msk.f32.vlgmr.msra.gmra.mrb[2].mxu1 %vm3208_vm1, %v3536_v33 }
 0x9d7   : > { %4602 = vmatpush1.bf16.msra.mxu1 %v6716_v62  ;;  %3841 = vmatprep.mubr.f32.mxu1 %v4767_v45 }
 0x9d8   : > { %4604 = vmatprep.subr.bf16.mxu1 %v6720_v43 }
 0x9db   : > { %4606 = vmatpush1.bf16.msra.mxu1 %v6727_v44 }
 0x9dc   : > { %4608 = vmatprep.subr.bf16.mxu1 %v6733_v46 }
 0x9df   : > { %4610 = vmatpush1.bf16.msra.mxu1 %v6741_v47 }
 0x9e0   : > { %4612 = vmatprep.subr.bf16.mxu1 %v6746_v48 }
 0x9e3   : > { %4614 = vmatpush1.bf16.msra.mxu1 %v6753_v49 }
 0x9e4   : > { %4632 = vmatprep.subr.bf16.mxu1 %v6712_v61 }
 0xaa9   : > { %v3617_v35 = vpop.f32.mrb[2].mxu1 }
 0xaaa   : > { %v3619_v36 = vpop.f32.mrb[3].mxu1  ;;  %v3622_v40 = vadd.f32 %v3617_v35, %v3546_v39 }
 0xaab   : > { %v3623_v37 = vadd.f32 %v3619_v36, %v3547_v34 }
 0xaac   : > { %v3624_v41 = vmul.f32 0.5, %v3622_v40  ;;  %v3773_v40 = vld [vmem:[%s3771_s21 + $0x8] sm:$0xff] }
 0xaad   : > { %4702 = vtanh.f32 %v3623_v37  ;;  %v3625_v57 = vmul.f32 0.5, %v3623_v37 }
 0xaae   : > { %4704 = vtanh.f32 %v3624_v41 }
 0xab7   : > { %v4703_v38 = vpop.eup %4702 }
 0xab8   : > { %3635 = vrot.lane.b32.xlu1 %v4703_v38, %s4768_s27  ;;  %v4705_v42 = vpop.eup %4704 }
 0xab9   : > { %v3628_v50 = vmul.f32 0.5, %v4705_v42 }
 0xabb   : > { %v3630_v51 = vadd.f32 0.5, %v3628_v50 }
 0xabd   : > { %v3633_v53 = vmul.f32 %v3630_v51, %v3530_v25 }
 0xb2a   : > { %v3636_v61 = vpop.permute.xlu1 %3635 }
 0xb2b   : > { %v3638_v52 = vmul.f32 %v3636_v61, %v3630_v51 }
 0xb2d   : > { %3640 = vrot.lane.b32.xlu0 %v3638_v52, %s4768_s27 }
 0xb9f   : > { %v3641_v54 = vpop.permute.xlu0 %3640 }
 0xba0   : > { %v3643_v55 = vadd.f32 %v3641_v54, %v3633_v53 }
 0xba2   : > { %4706 = vtanh.f32 %v3643_v55 }
 0xba3   : > { %4708 = vtanh.f32 %v3625_v57 }
 0xbac   : > { %v4707_v56 = vpop.eup %4706 }
 0xbad   : > { %3646 = vrot.lane.b32.xlu1 %v4707_v56, %s4768_s27  ;;  %v4709_v58 = vpop.eup %4708 }
 0xbae   : > { %v3629_v59 = vmul.f32 0.5, %v4709_v58 }
 0xbb0   : > { %v3631_v60 = vadd.f32 0.5, %v3629_v59 }
 0xc1f   : > { %v3647_v63 = vpop.permute.xlu1 %3646 }
 0xc20   : > { %v3649_v0 = vmul.f32 %v3647_v63, %v3631_v60  ;;  %v3886_v63 = vld [vmem:[%s3884_s26 + $0x8] sm:$0xff] }
 0xc22   : > { %4446 = vst.msk [vmem:[%s6784_s30 + $0x18] sm:$0xff] %vm3208_vm1, %v3649_v0  ;;  %4450 = vmatmul.mubr.msk.f32.vlgmr.msra.gmra.mrb[4].mxu0 %vm3208_vm1, %v3649_v0 }
 0xc23   : > { %4618 = vmatpush1.bf16.msra.mxu0 %v6716_v62  ;;  %3954 = vmatprep.mubr.f32.mxu0 %v4767_v45 }
 0xc24   : > { %4620 = vmatprep.subr.bf16.mxu0 %v6720_v43 }
 0xc27   : > { %4622 = vmatpush1.bf16.msra.mxu0 %v6727_v44 }
 0xc28   : > { %4624 = vmatprep.subr.bf16.mxu0 %v6733_v46 }
 0xc2b   : > { %4626 = vmatpush1.bf16.msra.mxu0 %v6741_v47 }
 0xc2c   : > { %4628 = vmatprep.subr.bf16.mxu0 %v6746_v48 }
 0xc2f   : > { %4630 = vmatpush1.bf16.msra.mxu0 %v6753_v49 }
 0xcf5   : > { %v3730_v6 = vpop.f32.mrb[4].mxu0 }
 0xcf6   : > { %v3732_v7 = vpop.f32.mrb[5].mxu0  ;;  %v3735_v19 = vadd.f32 %v3730_v6, %v3659_v13 }
 0xcf7   : > { %v3736_v8 = vadd.f32 %v3732_v7, %v3660_v5 }
 0xcf8   : > { %v3737_v20 = vmul.f32 0.5, %v3735_v19 }
 0xcf9   : > { %4710 = vtanh.f32 %v3736_v8  ;;  %v3738_v34 = vmul.f32 0.5, %v3736_v8  ;;  %v3885_v8 = vld [vmem:[%s3884_s26] sm:$0xff] }
 0xcfa   : > { %4712 = vtanh.f32 %v3737_v20 }
 0xd03   : > { %v4711_v12 = vpop.eup %4710 }
 0xd04   : > { %3748 = vrot.lane.b32.xlu0 %v4711_v12, %s4768_s27  ;;  %v4713_v24 = vpop.eup %4712 }
 0xd05   : > { %v3741_v25 = vmul.f32 0.5, %v4713_v24 }
 0xd07   : > { %v3743_v26 = vadd.f32 0.5, %v3741_v25 }
 0xd09   : > { %v3746_v30 = vmul.f32 %v3743_v26, %v3643_v55 }
 0xd76   : > { %v3749_v27 = vpop.permute.xlu0 %3748 }
 0xd77   : > { %v3751_v29 = vmul.f32 %v3749_v27, %v3743_v26 }
 0xd79   : > { %3753 = vrot.lane.b32.xlu1 %v3751_v29, %s4768_s27 }
 0xdeb   : > { %v3754_v31 = vpop.permute.xlu1 %3753 }
 0xdec   : > { %v3756_v32 = vadd.f32 %v3754_v31, %v3746_v30 }
 0xdee   : > { %4714 = vtanh.f32 %v3756_v32 }
 0xdef   : > { %4716 = vtanh.f32 %v3738_v34 }
 0xdf8   : > { %v4715_v33 = vpop.eup %4714 }
 0xdf9   : > { %3759 = vrot.lane.b32.xlu0 %v4715_v33, %s4768_s27  ;;  %v4717_v35 = vpop.eup %4716 }
 0xdfa   : > { %v3742_v36 = vmul.f32 0.5, %v4717_v35 }
 0xdfc   : > { %v3744_v37 = vadd.f32 0.5, %v3742_v36 }
 0xe6b   : > { %v3760_v38 = vpop.permute.xlu0 %3759 }
 0xe6c   : > { %v3762_v39 = vmul.f32 %v3760_v38, %v3744_v37  ;;  %v3999_v38 = vld [vmem:[%s3997_s6 + $0x8] sm:$0xff] }
 0xe6e   : > { %4453 = vst.msk [vmem:[%s6784_s30 + $0x20] sm:$0xff] %vm3208_vm1, %v3762_v39  ;;  %4457 = vmatmul.mubr.msk.f32.vlgmr.msra.gmra.mrb[4].mxu1 %vm3208_vm1, %v3762_v39 }
 0xe6f   : > { %4634 = vmatpush1.bf16.msra.mxu1 %v6716_v62  ;;  %4067 = vmatprep.mubr.f32.mxu1 %v4767_v45 }
 0xe70   : > { %4636 = vmatprep.subr.bf16.mxu1 %v6720_v43 }
 0xe73   : > { %4638 = vmatpush1.bf16.msra.mxu1 %v6727_v44  ;;  %v3772_v44 = vld [vmem:[%s3771_s21] sm:$0xff] }
 0xe74   : > { %4640 = vmatprep.subr.bf16.mxu1 %v6733_v46 }
 0xe77   : > { %4642 = vmatpush1.bf16.msra.mxu1 %v6741_v47 }
 0xe78   : > { %4644 = vmatprep.subr.bf16.mxu1 %v6746_v48 }
 0xe7b   : > { %4646 = vmatpush1.bf16.msra.mxu1 %v6753_v49 }
 0xf41   : > { %v3843_v62 = vpop.f32.mrb[4].mxu1 }
 0xf42   : > { %v3845_v41 = vpop.f32.mrb[5].mxu1  ;;  %v3848_v46 = vadd.f32 %v3843_v62, %v3772_v44 }
 0xf43   : > { %v3849_v45 = vadd.f32 %v3845_v41, %v3773_v40 }
 0xf44   : > { %v3850_v42 = vmul.f32 0.5, %v3848_v46 }
 0xf45   : > { %4718 = vtanh.f32 %v3849_v45  ;;  %v3851_v55 = vmul.f32 0.5, %v3849_v45  ;;  %v3998_v45 = vld [vmem:[%s3997_s6] sm:$0xff] }
 0xf46   : > { %4720 = vtanh.f32 %v3850_v42 }
 0xf4f   : > { %v4719_v43 = vpop.eup %4718 }
 0xf50   : > { %3861 = vrot.lane.b32.xlu1 %v4719_v43, %s4768_s27  ;;  %v4721_v47 = vpop.eup %4720 }
 0xf51   : > { %v3854_v48 = vmul.f32 0.5, %v4721_v47 }
 0xf53   : > { %v3856_v50 = vadd.f32 0.5, %v3854_v48 }
 0xf55   : > { %v3859_v61 = vmul.f32 %v3856_v50, %v3756_v32 }
 0xfc2   : > { %v3862_v49 = vpop.permute.xlu1 %3861 }
 0xfc3   : > { %v3864_v51 = vmul.f32 %v3862_v49, %v3856_v50 }
 0xfc5   : > { %3866 = vrot.lane.b32.xlu0 %v3864_v51, %s4768_s27 }
0x1037   : > { %v3867_v52 = vpop.permute.xlu0 %3866 }
0x1038   : > { %v3869_v53 = vadd.f32 %v3867_v52, %v3859_v61 }
0x103a   : > { %4722 = vtanh.f32 %v3869_v53 }
0x103b   : > { %4724 = vtanh.f32 %v3851_v55 }
0x1044   : > { %v4723_v54 = vpop.eup %4722 }
0x1045   : > { %3872 = vrot.lane.b32.xlu1 %v4723_v54, %s4768_s27  ;;  %v4725_v56 = vpop.eup %4724 }
0x1046   : > { %v3855_v57 = vmul.f32 0.5, %v4725_v56 }
0x1048   : > { %v3857_v58 = vadd.f32 0.5, %v3855_v57 }
0x10b7   : > { %v3873_v59 = vpop.permute.xlu1 %3872 }
0x10b8   : > { %v3875_v60 = vmul.f32 %v3873_v59, %v3857_v58 }
0x10ba   : > { %4460 = vst.msk [vmem:[%s6784_s30 + $0x28] sm:$0xff] %vm3208_vm1, %v3875_v60  ;;  %4464 = vmatmul.mubr.msk.f32.vlgmr.msra.gmra.mrb[6].mxu0 %vm3208_vm1, %v3875_v60 }
0x118d   : > { %v3956_v0 = vpop.f32.mrb[6].mxu0 }
0x118e   : > { %v3958_v5 = vpop.f32.mrb[7].mxu0  ;;  %v3961_v12 = vadd.f32 %v3956_v0, %v3885_v8 }
0x118f   : > { %v3962_v6 = vadd.f32 %v3958_v5, %v3886_v63 }
0x1190   : > { %v3963_v13 = vmul.f32 0.5, %v3961_v12 }
0x1191   : > { %4726 = vtanh.f32 %v3962_v6  ;;  %v3964_v32 = vmul.f32 0.5, %v3962_v6 }
0x1192   : > { %4728 = vtanh.f32 %v3963_v13 }
0x119b   : > { %v4727_v7 = vpop.eup %4726 }
0x119c   : > { %3974 = vrot.lane.b32.xlu0 %v4727_v7, %s4768_s27  ;;  %v4729_v19 = vpop.eup %4728 }
0x119d   : > { %v3967_v20 = vmul.f32 0.5, %v4729_v19 }
0x119f   : > { %v3969_v24 = vadd.f32 0.5, %v3967_v20 }
0x11a1   : > { %v3972_v27 = vmul.f32 %v3969_v24, %v3869_v53 }
0x120e   : > { %v3975_v25 = vpop.permute.xlu0 %3974 }
0x120f   : > { %v3977_v26 = vmul.f32 %v3975_v25, %v3969_v24 }
0x1211   : > { %3979 = vrot.lane.b32.xlu1 %v3977_v26, %s4768_s27 }
0x1283   : > { %v3980_v29 = vpop.permute.xlu1 %3979 }
0x1284   : > { %v3982_v30 = vadd.f32 %v3980_v29, %v3972_v27 }
0x1286   : > { %4730 = vtanh.f32 %v3982_v30 }
0x1287   : > { %4732 = vtanh.f32 %v3964_v32 }
0x1290   : > { %v4731_v31 = vpop.eup %4730 }
0x1291   : > { %3985 = vrot.lane.b32.xlu0 %v4731_v31, %s4768_s27  ;;  %v4733_v33 = vpop.eup %4732 }
0x1292   : > { %v3968_v34 = vmul.f32 0.5, %v4733_v33 }
0x1294   : > { %v3970_v35 = vadd.f32 0.5, %v3968_v34 }
0x1303   : > { %v3986_v36 = vpop.permute.xlu0 %3985 }
0x1304   : > { %v3988_v37 = vmul.f32 %v3986_v36, %v3970_v35 }
0x1306   : > { %4467 = vst.msk [vmem:[%s6784_s30 + $0x30] sm:$0xff] %vm3208_vm1, %v3988_v37  ;;  %4471 = vmatmul.mubr.msk.f32.vlgmr.msra.gmra.mrb[6].mxu1 %vm3208_vm1, %v3988_v37 }
0x13d9   : > { %v4069_v39 = vpop.f32.mrb[6].mxu1 }
0x13da   : > { %v4071_v40 = vpop.f32.mrb[7].mxu1  ;;  %v4074_v43 = vadd.f32 %v4069_v39, %v3998_v45 }
0x13db   : > { %v4075_v62 = vadd.f32 %v4071_v40, %v3999_v38 }
0x13dc   : > { %v4076_v44 = vmul.f32 0.5, %v4074_v43 }
0x13dd   : > { %4734 = vtanh.f32 %v4075_v62  ;;  %v4077_v52 = vmul.f32 0.5, %v4075_v62 }
0x13de   : > { %4736 = vtanh.f32 %v4076_v44 }
0x13e7   : > { %v4735_v41 = vpop.eup %4734 }
0x13e8   : > { %4087 = vrot.lane.b32.xlu1 %v4735_v41, %s4768_s27  ;;  %v4737_v46 = vpop.eup %4736 }
0x13e9   : > { %v4080_v42 = vmul.f32 0.5, %v4737_v46 }
0x13eb   : > { %v4082_v47 = vadd.f32 0.5, %v4080_v42 }
0x13ed   : > { %v4085_v49 = vmul.f32 %v4082_v47, %v3982_v30 }
0x145a   : > { %v4088_v48 = vpop.permute.xlu1 %4087 }
0x145b   : > { %v4090_v50 = vmul.f32 %v4088_v48, %v4082_v47 }
0x145d   : > { %4092 = vrot.lane.b32.xlu0 %v4090_v50, %s4768_s27 }
0x14cf   : > { %v4093_v51 = vpop.permute.xlu0 %4092 }
0x14d0   : > { %v4095_v41 = vadd.f32 %v4093_v51, %v4085_v49  }
0x14d2   : > { %4738 = vtanh.f32 %v4095_v41 }
0x14d3   : > { %4740 = vtanh.f32 %v4077_v52 }
0x14dc   : > { %v4739_v61 = vpop.eup %4738 }
0x14dd   : > { %4098 = vrot.lane.b32.xlu1 %v4739_v61, %s4768_s27  ;;  %v4741_v53 = vpop.eup %4740 }
0x14de   : > { %v4081_v54 = vmul.f32 0.5, %v4741_v53 }
0x14e0   : > { %v4083_v55 = vadd.f32 0.5, %v4081_v54 }
0x154c   :  { %3195 = sbr.rel (!%p3193_p0) target bundleno = 736 (0x2e0), region = 59 }
0x154f   : > { %v4099_v56 = vpop.permute.xlu1 %4098 }
0x1550   : > { %v4101_v42 = vmul.f32 %v4099_v56, %v4083_v55  }
0x1552   : > { %4474 = vst.msk [vmem:[%s6784_s30 + $0x38] sm:$0xff] %vm3208_vm1, %v4101_v42 }

</bundles_post_ra>
